<compile_context>
chip_gen: v7x
topology: tpu7x:2x2x1
jax: 0.10.0
libtpu: 0.0.40
codegen_flags: <defaults>
</compile_context>

<pallas_src>
import functools

import jax
import jax.numpy as jnp
from jax.experimental import pallas as pl
from jax.experimental.pallas import tpu as pltpu


def bilstm_crf_kernel(onehot_ref, emb_ref, wih_ref, b_ref, whh_ref,
                      wlin_ref, blin_ref, out_ref,
                      proj_ref, hcat_ref, *, B, T, H):
    """B is the (sublane-padded) batch, T the sequence length, H the LSTM width."""
    f32 = jnp.float32
    H4, H8 = 4 * H, 8 * H

    # Embedding lookup as a one-hot matmul on the MXU, then both directions' input
    # projections fused into a single (T*B, 8H) matmul; park it in VMEM scratch so the
    # unrolled loop only keeps one (B, 4H) slice per direction live at a time.
    x = jnp.dot(onehot_ref[...], emb_ref[...], preferred_element_type=f32)
    proj_ref[...] = jnp.dot(x, wih_ref[...], preferred_element_type=f32) + b_ref[...]

    whh = whh_ref[...]                                   # (H, 8H) = [whh_f | whh_b]

    # Interleaved bidirectional recurrence. State rows 0:B are the forward direction at
    # time s, rows B:2B the backward direction at time T-1-s. One matmul per step.
    h_st = jnp.zeros((2 * B, H), f32)
    c_st = jnp.zeros((2 * B, H), f32)
    for s in range(T):                                   # static unroll, T is small
        tb = T - 1 - s
        recur = jnp.dot(h_st, whh, preferred_element_type=f32)          # (2B, 8H)
        g_f = proj_ref[s * B:(s + 1) * B, 0:H4] + recur[0:B, 0:H4]
        g_b = proj_ref[tb * B:(tb + 1) * B, H4:H8] + recur[B:2 * B, H4:H8]
        gates = jnp.concatenate([g_f, g_b], axis=0)      # (2B, 4H), 8-row aligned
        # PyTorch LSTM gate order: [i, f, g, o]
        i = jax.nn.sigmoid(gates[:, 0 * H:1 * H])
        f = jax.nn.sigmoid(gates[:, 1 * H:2 * H])
        g = jnp.tanh(gates[:, 2 * H:3 * H])
        o = jax.nn.sigmoid(gates[:, 3 * H:4 * H])
        c_st = f * c_st + i * g
        h_st = o * jnp.tanh(c_st)
        # Lane-stacked [h_fwd | h_bwd] slab, aligned to original time indices.
        hcat_ref[s * B:(s + 1) * B, 0:H] = h_st[0:B, :]
        hcat_ref[tb * B:(tb + 1) * B, H:2 * H] = h_st[B:2 * B, :]

    # nn.Dropout(p) is identity in eval mode. Final linear over the contiguous slab,
    # output dim already padded to a full 128-lane group -> unmasked stores.
    logits = jnp.dot(hcat_ref[...], wlin_ref[...], preferred_element_type=f32) + blin_ref[...]
    out_ref[...] = logits.astype(out_ref.dtype)


def bilstm_crf_forward(ids, params):
    """Pallas implementation of BILSTMCRF.forward (eval-mode semantics)."""
    B, T = ids.shape
    V, E = params["emb"].shape
    H = params["whh_f"].shape[0]
    C = params["blin"].shape[-1]

    LANE, SUB = 128, 8
    Bp = max(SUB, ((B + SUB - 1) // SUB) * SUB)    # sublane-pad the batch
    Vp = ((V + LANE - 1) // LANE) * LANE           # lane-pad the one-hot contraction dim
    Cp = ((C + LANE - 1) // LANE) * LANE           # lane-pad the output dim

    # Batch pad (extra rows use token 0; their outputs are sliced away) + time-major one-hot.
    ids_p = jnp.zeros((Bp, T), jnp.int32).at[:B].set(ids.astype(jnp.int32))
    ids_tm = jnp.transpose(ids_p, (1, 0)).reshape(T * Bp)
    onehot = jax.nn.one_hot(ids_tm, Vp, dtype=jnp.float32)               # (T*Bp, Vp)
    # TODO(synk): for large vocab / long sequences replace the one-hot matmul with a
    #             scalar-prefetched row gather (PrefetchScalarGridSpec + pl.ds index_map).

    emb_p = jnp.zeros((Vp, E), jnp.float32).at[:V].set(params["emb"])
    wih_cat = jnp.concatenate([params["wih_f"], params["wih_b"]], axis=1)   # (E, 8H)
    b_cat = jnp.concatenate([params["b_f"], params["b_b"]], axis=1)         # (1, 8H)
    whh_cat = jnp.concatenate([params["whh_f"], params["whh_b"]], axis=1)   # (H, 8H)
    wlin_p = jnp.zeros((2 * H, Cp), jnp.float32).at[:, :C].set(params["wlin"])
    blin_p = jnp.zeros((1, Cp), jnp.float32).at[:, :C].set(params["blin"])

    TB = T * Bp
    kernel = functools.partial(bilstm_crf_kernel, B=Bp, T=T, H=H)

    # Advisory cost hint: this kernel is per-call-overhead dominated, not compute-bound.
    flops = (2 * TB * (Vp * E + E * 8 * H + 2 * H * Cp)
             + 2 * T * (2 * Bp) * H * 8 * H)
    transcendentals = T * 2 * Bp * 6 * H
    bytes_accessed = 4 * (onehot.size + emb_p.size + wih_cat.size + b_cat.size
                          + whh_cat.size + wlin_p.size + blin_p.size + TB * Cp)

    out_tm = pl.pallas_call(
        kernel,
        out_shape=jax.ShapeDtypeStruct((TB, Cp), jnp.float32),
        in_specs=[pl.BlockSpec(memory_space=pltpu.MemorySpace.VMEM)] * 7,
        out_specs=pl.BlockSpec(memory_space=pltpu.MemorySpace.VMEM),
        scratch_shapes=[pltpu.VMEM((TB, 8 * H), jnp.float32),   # fused input projections
                        pltpu.VMEM((TB, 2 * H), jnp.float32)],  # [h_fwd | h_bwd] slab
        compiler_params=pltpu.CompilerParams(vmem_limit_bytes=16 * 1024 * 1024),
        cost_estimate=pl.CostEstimate(flops=flops,
                                      transcendentals=transcendentals,
                                      bytes_accessed=bytes_accessed),
    )(onehot, emb_p, wih_cat, b_cat, whh_cat, wlin_p, blin_p)

    # time-major (T*Bp, Cp) -> batch-major (B, T, C), dropping batch/class padding.
    out = jnp.transpose(out_tm.reshape(T, Bp, Cp), (1, 0, 2))
    return out[:B, :, :C]


def reference_forward(ids, params):
    """Pure-JAX reference of the same forward pass (for verification)."""
    x = params["emb"][ids]                              # (B, T, E)
    B, T, _E = x.shape
    H = params["whh_f"].shape[0]

    def run(wih, whh, b, reverse):
        h = jnp.zeros((B, H), jnp.float32)
        c = jnp.zeros((B, H), jnp.float32)
        hs = [None] * T
        order = range(T - 1, -1, -1) if reverse else range(T)
        for t in order:
            gates = x[:, t, :] @ wih + h @ whh + b
            i = jax.nn.sigmoid(gates[:, :H])
            f = jax.nn.sigmoid(gates[:, H:2 * H])
            g = jnp.tanh(gates[:, 2 * H:3 * H])
            o = jax.nn.sigmoid(gates[:, 3 * H:])
            c = f * c + i * g
            h = o * jnp.tanh(c)
            hs[t] = h
        return jnp.stack(hs, axis=1)                    # (B, T, H)

    hf = run(params["wih_f"], params["whh_f"], params["b_f"], reverse=False)
    hb = run(params["wih_b"], params["whh_b"], params["b_b"], reverse=True)
    hcat = jnp.concatenate([hf, hb], axis=-1)           # (B, T, 2H)
    return hcat @ params["wlin"] + params["blin"]


if __name__ == "__main__":
    # Module hyper-parameters (small, consistent with the PyTorch __init__).
    vocab_size, n_class = 32, 5
    embedding_dim, rnn_units = 128, 128
    B, T = 2, 8

    key = jax.random.PRNGKey(0)
    keys = jax.random.split(key, 10)
    s = 0.1
    params = {
        "emb":   s * jax.random.normal(keys[0], (vocab_size, embedding_dim), jnp.float32),
        # PyTorch LSTM weights are (4H, E)/(4H, H) with gate order [i, f, g, o];
        # stored pre-transposed here, with b = b_ih + b_hh folded into one bias.
        "wih_f": s * jax.random.normal(keys[1], (embedding_dim, 4 * rnn_units), jnp.float32),
        "whh_f": s * jax.random.normal(keys[2], (rnn_units, 4 * rnn_units), jnp.float32),
        "b_f":   s * jax.random.normal(keys[3], (1, 4 * rnn_units), jnp.float32),
        "wih_b": s * jax.random.normal(keys[4], (embedding_dim, 4 * rnn_units), jnp.float32),
        "whh_b": s * jax.random.normal(keys[5], (rnn_units, 4 * rnn_units), jnp.float32),
        "b_b":   s * jax.random.normal(keys[6], (1, 4 * rnn_units), jnp.float32),
        "wlin":  s * jax.random.normal(keys[7], (2 * rnn_units, n_class), jnp.float32),
        "blin":  s * jax.random.normal(keys[8], (1, n_class), jnp.float32),
    }
    ids = jax.random.randint(keys[9], (B, T), 0, vocab_size, dtype=jnp.int32)

    out = jax.block_until_ready(bilstm_crf_forward(ids, params))
    ref = reference_forward(ids, params)

    assert out.shape == (B, T, n_class), out.shape
    assert jnp.allclose(out, ref, atol=1e-4, rtol=1e-4), "Pallas kernel mismatch vs reference"

    # TODO(synk): CRF loss/decode, train-mode dropout and the unused encoder/decoder/dan/
    #             hidden2tag heads are outside forward(); not implemented.
    print("KERNEL_OK")
</pallas_src>

<mosaic_0001>
module attributes {stable_mosaic.version = 11 : i64} {
  func.func @bilstm_crf_kernel(%arg0: memref<64x128xf32, #tpu.memory_space<vmem>>, %arg1: memref<128x128xf32, #tpu.memory_space<vmem>>, %arg2: memref<128x1024xf32, #tpu.memory_space<vmem>>, %arg3: memref<1x1024xf32, #tpu.memory_space<vmem>>, %arg4: memref<128x1024xf32, #tpu.memory_space<vmem>>, %arg5: memref<256x128xf32, #tpu.memory_space<vmem>>, %arg6: memref<1x128xf32, #tpu.memory_space<vmem>>, %arg7: memref<64x128xf32, #tpu.memory_space<vmem>>, %arg8: memref<64x1024xf32, #tpu.memory_space<vmem>>, %arg9: memref<64x256xf32, #tpu.memory_space<vmem>>) attributes {dimension_semantics = [], scalar_prefetch = 0 : i64, scratch_operands = 2 : i64, tpu.core_type = #tpu.core_type<tc>} {
    %c0 = arith.constant 0 : index
    %c0_0 = arith.constant 0 : index
    %0 = vector.load %arg0[%c0, %c0_0] : memref<64x128xf32, #tpu.memory_space<vmem>>, vector<64x128xf32>
    %c0_1 = arith.constant 0 : index
    %c0_2 = arith.constant 0 : index
    %1 = vector.load %arg1[%c0_1, %c0_2] : memref<128x128xf32, #tpu.memory_space<vmem>>, vector<128x128xf32>
    %cst = arith.constant dense<0.000000e+00> : vector<64x128xf32>
    %2 = tpu.matmul %0, %1, %cst {dimension_numbers = #tpu.dot_dimension_numbers<[1], [0], [0], [1], [0, 0, 1, 1], [], []>} : vector<64x128xf32>, vector<128x128xf32>, vector<64x128xf32> -> vector<64x128xf32>
    %c0_3 = arith.constant 0 : index
    %c0_4 = arith.constant 0 : index
    %3 = vector.load %arg2[%c0_3, %c0_4] : memref<128x1024xf32, #tpu.memory_space<vmem>>, vector<128x1024xf32>
    %cst_5 = arith.constant dense<0.000000e+00> : vector<64x1024xf32>
    %4 = tpu.matmul %2, %3, %cst_5 {dimension_numbers = #tpu.dot_dimension_numbers<[1], [0], [0], [1], [0, 0, 1, 1], [], []>} : vector<64x128xf32>, vector<128x1024xf32>, vector<64x1024xf32> -> vector<64x1024xf32>
    %c0_6 = arith.constant 0 : index
    %c0_7 = arith.constant 0 : index
    %5 = vector.load %arg3[%c0_6, %c0_7] : memref<1x1024xf32, #tpu.memory_space<vmem>>, vector<1x1024xf32>
    %6 = vector.broadcast %5 : vector<1x1024xf32> to vector<64x1024xf32>
    %7 = arith.addf %4, %6 : vector<64x1024xf32>
    %c0_8 = arith.constant 0 : index
    %c0_9 = arith.constant 0 : index
    %8 = vector.load %arg8[%c0_8, %c0_9] : memref<64x1024xf32, #tpu.memory_space<vmem>>, vector<64x1024xf32>
    tpu.vector_store %arg8[%c0_8, %c0_9], %7 {strides = array<i32>} : memref<64x1024xf32, #tpu.memory_space<vmem>>, vector<64x1024xf32>,
    %c0_10 = arith.constant 0 : index
    %c0_11 = arith.constant 0 : index
    %9 = vector.load %arg4[%c0_10, %c0_11] : memref<128x1024xf32, #tpu.memory_space<vmem>>, vector<128x1024xf32>
    %cst_12 = arith.constant 0.000000e+00 : f32
    %10 = vector.broadcast %cst_12 : f32 to vector<16x128xf32>
    %cst_13 = arith.constant 0.000000e+00 : f32
    %11 = vector.broadcast %cst_13 : f32 to vector<16x128xf32>
    %cst_14 = arith.constant dense<0.000000e+00> : vector<16x1024xf32>
    %12 = tpu.matmul %10, %9, %cst_14 {dimension_numbers = #tpu.dot_dimension_numbers<[1], [0], [0], [1], [0, 0, 1, 1], [], []>} : vector<16x128xf32>, vector<128x1024xf32>, vector<16x1024xf32> -> vector<16x1024xf32>
    %c0_15 = arith.constant 0 : index
    %c0_16 = arith.constant 0 : index
    %13 = vector.load %arg8[%c0_15, %c0_16] : memref<64x1024xf32, #tpu.memory_space<vmem>>, vector<8x512xf32>
    %14 = vector.extract_strided_slice %12 {offsets = [0, 0], sizes = [8, 512], strides = [1, 1]} : vector<16x1024xf32> to vector<8x512xf32>
    %15 = arith.addf %13, %14 : vector<8x512xf32>
    %c56 = arith.constant 56 : index
    %c512 = arith.constant 512 : index
    %16 = vector.load %arg8[%c56, %c512] : memref<64x1024xf32, #tpu.memory_space<vmem>>, vector<8x512xf32>
    %17 = vector.extract_strided_slice %12 {offsets = [8, 512], sizes = [8, 512], strides = [1, 1]} : vector<16x1024xf32> to vector<8x512xf32>
    %18 = arith.addf %16, %17 : vector<8x512xf32>
    %19 = tpu.concatenate %15, %18 in 0 : vector<8x512xf32>, vector<8x512xf32> -> vector<16x512xf32>
    %20 = vector.extract_strided_slice %19 {offsets = [0, 0], sizes = [16, 128], strides = [1, 1]} : vector<16x512xf32> to vector<16x128xf32>
    %21 = arith.negf %20 : vector<16x128xf32>
    %22 = math.exp %21 : vector<16x128xf32>
    %cst_17 = arith.constant 1.000000e+00 : f32
    %23 = vector.broadcast %cst_17 : f32 to vector<16x128xf32>
    %24 = arith.addf %23, %22 : vector<16x128xf32>
    %25 = arith.divf %23, %24 : vector<16x128xf32>
    %26 = vector.extract_strided_slice %19 {offsets = [0, 128], sizes = [16, 128], strides = [1, 1]} : vector<16x512xf32> to vector<16x128xf32>
    %27 = arith.negf %26 : vector<16x128xf32>
    %28 = math.exp %27 : vector<16x128xf32>
    %cst_18 = arith.constant 1.000000e+00 : f32
    %29 = vector.broadcast %cst_18 : f32 to vector<16x128xf32>
    %30 = arith.addf %29, %28 : vector<16x128xf32>
    %31 = arith.divf %29, %30 : vector<16x128xf32>
    %32 = vector.extract_strided_slice %19 {offsets = [0, 256], sizes = [16, 128], strides = [1, 1]} : vector<16x512xf32> to vector<16x128xf32>
    %33 = math.tanh %32 : vector<16x128xf32>
    %34 = vector.extract_strided_slice %19 {offsets = [0, 384], sizes = [16, 128], strides = [1, 1]} : vector<16x512xf32> to vector<16x128xf32>
    %35 = arith.negf %34 : vector<16x128xf32>
    %36 = math.exp %35 : vector<16x128xf32>
    %cst_19 = arith.constant 1.000000e+00 : f32
    %37 = vector.broadcast %cst_19 : f32 to vector<16x128xf32>
    %38 = arith.addf %37, %36 : vector<16x128xf32>
    %39 = arith.divf %37, %38 : vector<16x128xf32>
    %40 = arith.mulf %31, %11 : vector<16x128xf32>
    %41 = arith.mulf %25, %33 : vector<16x128xf32>
    %42 = arith.addf %40, %41 : vector<16x128xf32>
    %43 = math.tanh %42 : vector<16x128xf32>
    %44 = arith.mulf %39, %43 : vector<16x128xf32>
    %45 = vector.extract_strided_slice %44 {offsets = [0, 0], sizes = [8, 128], strides = [1, 1]} : vector<16x128xf32> to vector<8x128xf32>
    %c0_20 = arith.constant 0 : index
    %c0_21 = arith.constant 0 : index
    %46 = vector.load %arg9[%c0_20, %c0_21] : memref<64x256xf32, #tpu.memory_space<vmem>>, vector<8x128xf32>
    tpu.vector_store %arg9[%c0_20, %c0_21], %45 {strides = array<i32>} : memref<64x256xf32, #tpu.memory_space<vmem>>, vector<8x128xf32>,
    %47 = vector.extract_strided_slice %44 {offsets = [8, 0], sizes = [8, 128], strides = [1, 1]} : vector<16x128xf32> to vector<8x128xf32>
    %c56_22 = arith.constant 56 : index
    %c128 = arith.constant 128 : index
    %48 = vector.load %arg9[%c56_22, %c128] : memref<64x256xf32, #tpu.memory_space<vmem>>, vector<8x128xf32>
    tpu.vector_store %arg9[%c56_22, %c128], %47 {strides = array<i32>} : memref<64x256xf32, #tpu.memory_space<vmem>>, vector<8x128xf32>,
    %cst_23 = arith.constant dense<0.000000e+00> : vector<16x1024xf32>
    %49 = tpu.matmul %44, %9, %cst_23 {dimension_numbers = #tpu.dot_dimension_numbers<[1], [0], [0], [1], [0, 0, 1, 1], [], []>} : vector<16x128xf32>, vector<128x1024xf32>, vector<16x1024xf32> -> vector<16x1024xf32>
    %c8 = arith.constant 8 : index
    %c0_24 = arith.constant 0 : index
    %50 = vector.load %arg8[%c8, %c0_24] : memref<64x1024xf32, #tpu.memory_space<vmem>>, vector<8x512xf32>
    %51 = vector.extract_strided_slice %49 {offsets = [0, 0], sizes = [8, 512], strides = [1, 1]} : vector<16x1024xf32> to vector<8x512xf32>
    %52 = arith.addf %50, %51 : vector<8x512xf32>
    %c48 = arith.constant 48 : index
    %c512_25 = arith.constant 512 : index
    %53 = vector.load %arg8[%c48, %c512_25] : memref<64x1024xf32, #tpu.memory_space<vmem>>, vector<8x512xf32>
    %54 = vector.extract_strided_slice %49 {offsets = [8, 512], sizes = [8, 512], strides = [1, 1]} : vector<16x1024xf32> to vector<8x512xf32>
    %55 = arith.addf %53, %54 : vector<8x512xf32>
    %56 = tpu.concatenate %52, %55 in 0 : vector<8x512xf32>, vector<8x512xf32> -> vector<16x512xf32>
    %57 = vector.extract_strided_slice %56 {offsets = [0, 0], sizes = [16, 128], strides = [1, 1]} : vector<16x512xf32> to vector<16x128xf32>
    %58 = arith.negf %57 : vector<16x128xf32>
    %59 = math.exp %58 : vector<16x128xf32>
    %cst_26 = arith.constant 1.000000e+00 : f32
    %60 = vector.broadcast %cst_26 : f32 to vector<16x128xf32>
    %61 = arith.addf %60, %59 : vector<16x128xf32>
    %62 = arith.divf %60, %61 : vector<16x128xf32>
    %63 = vector.extract_strided_slice %56 {offsets = [0, 128], sizes = [16, 128], strides = [1, 1]} : vector<16x512xf32> to vector<16x128xf32>
    %64 = arith.negf %63 : vector<16x128xf32>
    %65 = math.exp %64 : vector<16x128xf32>
    %cst_27 = arith.constant 1.000000e+00 : f32
    %66 = vector.broadcast %cst_27 : f32 to vector<16x128xf32>
    %67 = arith.addf %66, %65 : vector<16x128xf32>
    %68 = arith.divf %66, %67 : vector<16x128xf32>
    %69 = vector.extract_strided_slice %56 {offsets = [0, 256], sizes = [16, 128], strides = [1, 1]} : vector<16x512xf32> to vector<16x128xf32>
    %70 = math.tanh %69 : vector<16x128xf32>
    %71 = vector.extract_strided_slice %56 {offsets = [0, 384], sizes = [16, 128], strides = [1, 1]} : vector<16x512xf32> to vector<16x128xf32>
    %72 = arith.negf %71 : vector<16x128xf32>
    %73 = math.exp %72 : vector<16x128xf32>
    %cst_28 = arith.constant 1.000000e+00 : f32
    %74 = vector.broadcast %cst_28 : f32 to vector<16x128xf32>
    %75 = arith.addf %74, %73 : vector<16x128xf32>
    %76 = arith.divf %74, %75 : vector<16x128xf32>
    %77 = arith.mulf %68, %42 : vector<16x128xf32>
    %78 = arith.mulf %62, %70 : vector<16x128xf32>
    %79 = arith.addf %77, %78 : vector<16x128xf32>
    %80 = math.tanh %79 : vector<16x128xf32>
    %81 = arith.mulf %76, %80 : vector<16x128xf32>
    %82 = vector.extract_strided_slice %81 {offsets = [0, 0], sizes = [8, 128], strides = [1, 1]} : vector<16x128xf32> to vector<8x128xf32>
    %c8_29 = arith.constant 8 : index
    %c0_30 = arith.constant 0 : index
    %83 = vector.load %arg9[%c8_29, %c0_30] : memref<64x256xf32, #tpu.memory_space<vmem>>, vector<8x128xf32>
    tpu.vector_store %arg9[%c8_29, %c0_30], %82 {strides = array<i32>} : memref<64x256xf32, #tpu.memory_space<vmem>>, vector<8x128xf32>,
    %84 = vector.extract_strided_slice %81 {offsets = [8, 0], sizes = [8, 128], strides = [1, 1]} : vector<16x128xf32> to vector<8x128xf32>
    %c48_31 = arith.constant 48 : index
    %c128_32 = arith.constant 128 : index
    %85 = vector.load %arg9[%c48_31, %c128_32] : memref<64x256xf32, #tpu.memory_space<vmem>>, vector<8x128xf32>
    tpu.vector_store %arg9[%c48_31, %c128_32], %84 {strides = array<i32>} : memref<64x256xf32, #tpu.memory_space<vmem>>, vector<8x128xf32>,
    %cst_33 = arith.constant dense<0.000000e+00> : vector<16x1024xf32>
    %86 = tpu.matmul %81, %9, %cst_33 {dimension_numbers = #tpu.dot_dimension_numbers<[1], [0], [0], [1], [0, 0, 1, 1], [], []>} : vector<16x128xf32>, vector<128x1024xf32>, vector<16x1024xf32> -> vector<16x1024xf32>
    %c16 = arith.constant 16 : index
    %c0_34 = arith.constant 0 : index
    %87 = vector.load %arg8[%c16, %c0_34] : memref<64x1024xf32, #tpu.memory_space<vmem>>, vector<8x512xf32>
    %88 = vector.extract_strided_slice %86 {offsets = [0, 0], sizes = [8, 512], strides = [1, 1]} : vector<16x1024xf32> to vector<8x512xf32>
    %89 = arith.addf %87, %88 : vector<8x512xf32>
    %c40 = arith.constant 40 : index
    %c512_35 = arith.constant 512 : index
    %90 = vector.load %arg8[%c40, %c512_35] : memref<64x1024xf32, #tpu.memory_space<vmem>>, vector<8x512xf32>
    %91 = vector.extract_strided_slice %86 {offsets = [8, 512], sizes = [8, 512], strides = [1, 1]} : vector<16x1024xf32> to vector<8x512xf32>
    %92 = arith.addf %90, %91 : vector<8x512xf32>
    %93 = tpu.concatenate %89, %92 in 0 : vector<8x512xf32>, vector<8x512xf32> -> vector<16x512xf32>
    %94 = vector.extract_strided_slice %93 {offsets = [0, 0], sizes = [16, 128], strides = [1, 1]} : vector<16x512xf32> to vector<16x128xf32>
    %95 = arith.negf %94 : vector<16x128xf32>
    %96 = math.exp %95 : vector<16x128xf32>
    %cst_36 = arith.constant 1.000000e+00 : f32
    %97 = vector.broadcast %cst_36 : f32 to vector<16x128xf32>
    %98 = arith.addf %97, %96 : vector<16x128xf32>
    %99 = arith.divf %97, %98 : vector<16x128xf32>
    %100 = vector.extract_strided_slice %93 {offsets = [0, 128], sizes = [16, 128], strides = [1, 1]} : vector<16x512xf32> to vector<16x128xf32>
    %101 = arith.negf %100 : vector<16x128xf32>
    %102 = math.exp %101 : vector<16x128xf32>
    %cst_37 = arith.constant 1.000000e+00 : f32
    %103 = vector.broadcast %cst_37 : f32 to vector<16x128xf32>
    %104 = arith.addf %103, %102 : vector<16x128xf32>
    %105 = arith.divf %103, %104 : vector<16x128xf32>
    %106 = vector.extract_strided_slice %93 {offsets = [0, 256], sizes = [16, 128], strides = [1, 1]} : vector<16x512xf32> to vector<16x128xf32>
    %107 = math.tanh %106 : vector<16x128xf32>
    %108 = vector.extract_strided_slice %93 {offsets = [0, 384], sizes = [16, 128], strides = [1, 1]} : vector<16x512xf32> to vector<16x128xf32>
    %109 = arith.negf %108 : vector<16x128xf32>
    %110 = math.exp %109 : vector<16x128xf32>
    %cst_38 = arith.constant 1.000000e+00 : f32
    %111 = vector.broadcast %cst_38 : f32 to vector<16x128xf32>
    %112 = arith.addf %111, %110 : vector<16x128xf32>
    %113 = arith.divf %111, %112 : vector<16x128xf32>
    %114 = arith.mulf %105, %79 : vector<16x128xf32>
    %115 = arith.mulf %99, %107 : vector<16x128xf32>
    %116 = arith.addf %114, %115 : vector<16x128xf32>
    %117 = math.tanh %116 : vector<16x128xf32>
    %118 = arith.mulf %113, %117 : vector<16x128xf32>
    %119 = vector.extract_strided_slice %118 {offsets = [0, 0], sizes = [8, 128], strides = [1, 1]} : vector<16x128xf32> to vector<8x128xf32>
    %c16_39 = arith.constant 16 : index
    %c0_40 = arith.constant 0 : index
    %120 = vector.load %arg9[%c16_39, %c0_40] : memref<64x256xf32, #tpu.memory_space<vmem>>, vector<8x128xf32>
    tpu.vector_store %arg9[%c16_39, %c0_40], %119 {strides = array<i32>} : memref<64x256xf32, #tpu.memory_space<vmem>>, vector<8x128xf32>,
    %121 = vector.extract_strided_slice %118 {offsets = [8, 0], sizes = [8, 128], strides = [1, 1]} : vector<16x128xf32> to vector<8x128xf32>
    %c40_41 = arith.constant 40 : index
    %c128_42 = arith.constant 128 : index
    %122 = vector.load %arg9[%c40_41, %c128_42] : memref<64x256xf32, #tpu.memory_space<vmem>>, vector<8x128xf32>
    tpu.vector_store %arg9[%c40_41, %c128_42], %121 {strides = array<i32>} : memref<64x256xf32, #tpu.memory_space<vmem>>, vector<8x128xf32>,
    %cst_43 = arith.constant dense<0.000000e+00> : vector<16x1024xf32>
    %123 = tpu.matmul %118, %9, %cst_43 {dimension_numbers = #tpu.dot_dimension_numbers<[1], [0], [0], [1], [0, 0, 1, 1], [], []>} : vector<16x128xf32>, vector<128x1024xf32>, vector<16x1024xf32> -> vector<16x1024xf32>
    %c24 = arith.constant 24 : index
    %c0_44 = arith.constant 0 : index
    %124 = vector.load %arg8[%c24, %c0_44] : memref<64x1024xf32, #tpu.memory_space<vmem>>, vector<8x512xf32>
    %125 = vector.extract_strided_slice %123 {offsets = [0, 0], sizes = [8, 512], strides = [1, 1]} : vector<16x1024xf32> to vector<8x512xf32>
    %126 = arith.addf %124, %125 : vector<8x512xf32>
    %c32 = arith.constant 32 : index
    %c512_45 = arith.constant 512 : index
    %127 = vector.load %arg8[%c32, %c512_45] : memref<64x1024xf32, #tpu.memory_space<vmem>>, vector<8x512xf32>
    %128 = vector.extract_strided_slice %123 {offsets = [8, 512], sizes = [8, 512], strides = [1, 1]} : vector<16x1024xf32> to vector<8x512xf32>
    %129 = arith.addf %127, %128 : vector<8x512xf32>
    %130 = tpu.concatenate %126, %129 in 0 : vector<8x512xf32>, vector<8x512xf32> -> vector<16x512xf32>
    %131 = vector.extract_strided_slice %130 {offsets = [0, 0], sizes = [16, 128], strides = [1, 1]} : vector<16x512xf32> to vector<16x128xf32>
    %132 = arith.negf %131 : vector<16x128xf32>
    %133 = math.exp %132 : vector<16x128xf32>
    %cst_46 = arith.constant 1.000000e+00 : f32
    %134 = vector.broadcast %cst_46 : f32 to vector<16x128xf32>
    %135 = arith.addf %134, %133 : vector<16x128xf32>
    %136 = arith.divf %134, %135 : vector<16x128xf32>
    %137 = vector.extract_strided_slice %130 {offsets = [0, 128], sizes = [16, 128], strides = [1, 1]} : vector<16x512xf32> to vector<16x128xf32>
    %138 = arith.negf %137 : vector<16x128xf32>
    %139 = math.exp %138 : vector<16x128xf32>
    %cst_47 = arith.constant 1.000000e+00 : f32
    %140 = vector.broadcast %cst_47 : f32 to vector<16x128xf32>
    %141 = arith.addf %140, %139 : vector<16x128xf32>
    %142 = arith.divf %140, %141 : vector<16x128xf32>
    %143 = vector.extract_strided_slice %130 {offsets = [0, 256], sizes = [16, 128], strides = [1, 1]} : vector<16x512xf32> to vector<16x128xf32>
    %144 = math.tanh %143 : vector<16x128xf32>
    %145 = vector.extract_strided_slice %130 {offsets = [0, 384], sizes = [16, 128], strides = [1, 1]} : vector<16x512xf32> to vector<16x128xf32>
    %146 = arith.negf %145 : vector<16x128xf32>
    %147 = math.exp %146 : vector<16x128xf32>
    %cst_48 = arith.constant 1.000000e+00 : f32
    %148 = vector.broadcast %cst_48 : f32 to vector<16x128xf32>
    %149 = arith.addf %148, %147 : vector<16x128xf32>
    %150 = arith.divf %148, %149 : vector<16x128xf32>
    %151 = arith.mulf %142, %116 : vector<16x128xf32>
    %152 = arith.mulf %136, %144 : vector<16x128xf32>
    %153 = arith.addf %151, %152 : vector<16x128xf32>
    %154 = math.tanh %153 : vector<16x128xf32>
    %155 = arith.mulf %150, %154 : vector<16x128xf32>
    %156 = vector.extract_strided_slice %155 {offsets = [0, 0], sizes = [8, 128], strides = [1, 1]} : vector<16x128xf32> to vector<8x128xf32>
    %c24_49 = arith.constant 24 : index
    %c0_50 = arith.constant 0 : index
    %157 = vector.load %arg9[%c24_49, %c0_50] : memref<64x256xf32, #tpu.memory_space<vmem>>, vector<8x128xf32>
    tpu.vector_store %arg9[%c24_49, %c0_50], %156 {strides = array<i32>} : memref<64x256xf32, #tpu.memory_space<vmem>>, vector<8x128xf32>,
    %158 = vector.extract_strided_slice %155 {offsets = [8, 0], sizes = [8, 128], strides = [1, 1]} : vector<16x128xf32> to vector<8x128xf32>
    %c32_51 = arith.constant 32 : index
    %c128_52 = arith.constant 128 : index
    %159 = vector.load %arg9[%c32_51, %c128_52] : memref<64x256xf32, #tpu.memory_space<vmem>>, vector<8x128xf32>
    tpu.vector_store %arg9[%c32_51, %c128_52], %158 {strides = array<i32>} : memref<64x256xf32, #tpu.memory_space<vmem>>, vector<8x128xf32>,
    %cst_53 = arith.constant dense<0.000000e+00> : vector<16x1024xf32>
    %160 = tpu.matmul %155, %9, %cst_53 {dimension_numbers = #tpu.dot_dimension_numbers<[1], [0], [0], [1], [0, 0, 1, 1], [], []>} : vector<16x128xf32>, vector<128x1024xf32>, vector<16x1024xf32> -> vector<16x1024xf32>
    %c32_54 = arith.constant 32 : index
    %c0_55 = arith.constant 0 : index
    %161 = vector.load %arg8[%c32_54, %c0_55] : memref<64x1024xf32, #tpu.memory_space<vmem>>, vector<8x512xf32>
    %162 = vector.extract_strided_slice %160 {offsets = [0, 0], sizes = [8, 512], strides = [1, 1]} : vector<16x1024xf32> to vector<8x512xf32>
    %163 = arith.addf %161, %162 : vector<8x512xf32>
    %c24_56 = arith.constant 24 : index
    %c512_57 = arith.constant 512 : index
    %164 = vector.load %arg8[%c24_56, %c512_57] : memref<64x1024xf32, #tpu.memory_space<vmem>>, vector<8x512xf32>
    %165 = vector.extract_strided_slice %160 {offsets = [8, 512], sizes = [8, 512], strides = [1, 1]} : vector<16x1024xf32> to vector<8x512xf32>
    %166 = arith.addf %164, %165 : vector<8x512xf32>
    %167 = tpu.concatenate %163, %166 in 0 : vector<8x512xf32>, vector<8x512xf32> -> vector<16x512xf32>
    %168 = vector.extract_strided_slice %167 {offsets = [0, 0], sizes = [16, 128], strides = [1, 1]} : vector<16x512xf32> to vector<16x128xf32>
    %169 = arith.negf %168 : vector<16x128xf32>
    %170 = math.exp %169 : vector<16x128xf32>
    %cst_58 = arith.constant 1.000000e+00 : f32
    %171 = vector.broadcast %cst_58 : f32 to vector<16x128xf32>
    %172 = arith.addf %171, %170 : vector<16x128xf32>
    %173 = arith.divf %171, %172 : vector<16x128xf32>
    %174 = vector.extract_strided_slice %167 {offsets = [0, 128], sizes = [16, 128], strides = [1, 1]} : vector<16x512xf32> to vector<16x128xf32>
    %175 = arith.negf %174 : vector<16x128xf32>
    %176 = math.exp %175 : vector<16x128xf32>
    %cst_59 = arith.constant 1.000000e+00 : f32
    %177 = vector.broadcast %cst_59 : f32 to vector<16x128xf32>
    %178 = arith.addf %177, %176 : vector<16x128xf32>
    %179 = arith.divf %177, %178 : vector<16x128xf32>
    %180 = vector.extract_strided_slice %167 {offsets = [0, 256], sizes = [16, 128], strides = [1, 1]} : vector<16x512xf32> to vector<16x128xf32>
    %181 = math.tanh %180 : vector<16x128xf32>
    %182 = vector.extract_strided_slice %167 {offsets = [0, 384], sizes = [16, 128], strides = [1, 1]} : vector<16x512xf32> to vector<16x128xf32>
    %183 = arith.negf %182 : vector<16x128xf32>
    %184 = math.exp %183 : vector<16x128xf32>
    %cst_60 = arith.constant 1.000000e+00 : f32
    %185 = vector.broadcast %cst_60 : f32 to vector<16x128xf32>
    %186 = arith.addf %185, %184 : vector<16x128xf32>
    %187 = arith.divf %185, %186 : vector<16x128xf32>
    %188 = arith.mulf %179, %153 : vector<16x128xf32>
    %189 = arith.mulf %173, %181 : vector<16x128xf32>
    %190 = arith.addf %188, %189 : vector<16x128xf32>
    %191 = math.tanh %190 : vector<16x128xf32>
    %192 = arith.mulf %187, %191 : vector<16x128xf32>
    %193 = vector.extract_strided_slice %192 {offsets = [0, 0], sizes = [8, 128], strides = [1, 1]} : vector<16x128xf32> to vector<8x128xf32>
    %c32_61 = arith.constant 32 : index
    %c0_62 = arith.constant 0 : index
    %194 = vector.load %arg9[%c32_61, %c0_62] : memref<64x256xf32, #tpu.memory_space<vmem>>, vector<8x128xf32>
    tpu.vector_store %arg9[%c32_61, %c0_62], %193 {strides = array<i32>} : memref<64x256xf32, #tpu.memory_space<vmem>>, vector<8x128xf32>,
    %195 = vector.extract_strided_slice %192 {offsets = [8, 0], sizes = [8, 128], strides = [1, 1]} : vector<16x128xf32> to vector<8x128xf32>
    %c24_63 = arith.constant 24 : index
    %c128_64 = arith.constant 128 : index
    %196 = vector.load %arg9[%c24_63, %c128_64] : memref<64x256xf32, #tpu.memory_space<vmem>>, vector<8x128xf32>
    tpu.vector_store %arg9[%c24_63, %c128_64], %195 {strides = array<i32>} : memref<64x256xf32, #tpu.memory_space<vmem>>, vector<8x128xf32>,
    %cst_65 = arith.constant dense<0.000000e+00> : vector<16x1024xf32>
    %197 = tpu.matmul %192, %9, %cst_65 {dimension_numbers = #tpu.dot_dimension_numbers<[1], [0], [0], [1], [0, 0, 1, 1], [], []>} : vector<16x128xf32>, vector<128x1024xf32>, vector<16x1024xf32> -> vector<16x1024xf32>
    %c40_66 = arith.constant 40 : index
    %c0_67 = arith.constant 0 : index
    %198 = vector.load %arg8[%c40_66, %c0_67] : memref<64x1024xf32, #tpu.memory_space<vmem>>, vector<8x512xf32>
    %199 = vector.extract_strided_slice %197 {offsets = [0, 0], sizes = [8, 512], strides = [1, 1]} : vector<16x1024xf32> to vector<8x512xf32>
    %200 = arith.addf %198, %199 : vector<8x512xf32>
    %c16_68 = arith.constant 16 : index
    %c512_69 = arith.constant 512 : index
    %201 = vector.load %arg8[%c16_68, %c512_69] : memref<64x1024xf32, #tpu.memory_space<vmem>>, vector<8x512xf32>
    %202 = vector.extract_strided_slice %197 {offsets = [8, 512], sizes = [8, 512], strides = [1, 1]} : vector<16x1024xf32> to vector<8x512xf32>
    %203 = arith.addf %201, %202 : vector<8x512xf32>
    %204 = tpu.concatenate %200, %203 in 0 : vector<8x512xf32>, vector<8x512xf32> -> vector<16x512xf32>
    %205 = vector.extract_strided_slice %204 {offsets = [0, 0], sizes = [16, 128], strides = [1, 1]} : vector<16x512xf32> to vector<16x128xf32>
    %206 = arith.negf %205 : vector<16x128xf32>
    %207 = math.exp %206 : vector<16x128xf32>
    %cst_70 = arith.constant 1.000000e+00 : f32
    %208 = vector.broadcast %cst_70 : f32 to vector<16x128xf32>
    %209 = arith.addf %208, %207 : vector<16x128xf32>
    %210 = arith.divf %208, %209 : vector<16x128xf32>
    %211 = vector.extract_strided_slice %204 {offsets = [0, 128], sizes = [16, 128], strides = [1, 1]} : vector<16x512xf32> to vector<16x128xf32>
    %212 = arith.negf %211 : vector<16x128xf32>
    %213 = math.exp %212 : vector<16x128xf32>
    %cst_71 = arith.constant 1.000000e+00 : f32
    %214 = vector.broadcast %cst_71 : f32 to vector<16x128xf32>
    %215 = arith.addf %214, %213 : vector<16x128xf32>
    %216 = arith.divf %214, %215 : vector<16x128xf32>
    %217 = vector.extract_strided_slice %204 {offsets = [0, 256], sizes = [16, 128], strides = [1, 1]} : vector<16x512xf32> to vector<16x128xf32>
    %218 = math.tanh %217 : vector<16x128xf32>
    %219 = vector.extract_strided_slice %204 {offsets = [0, 384], sizes = [16, 128], strides = [1, 1]} : vector<16x512xf32> to vector<16x128xf32>
    %220 = arith.negf %219 : vector<16x128xf32>
    %221 = math.exp %220 : vector<16x128xf32>
    %cst_72 = arith.constant 1.000000e+00 : f32
    %222 = vector.broadcast %cst_72 : f32 to vector<16x128xf32>
    %223 = arith.addf %222, %221 : vector<16x128xf32>
    %224 = arith.divf %222, %223 : vector<16x128xf32>
    %225 = arith.mulf %216, %190 : vector<16x128xf32>
    %226 = arith.mulf %210, %218 : vector<16x128xf32>
    %227 = arith.addf %225, %226 : vector<16x128xf32>
    %228 = math.tanh %227 : vector<16x128xf32>
    %229 = arith.mulf %224, %228 : vector<16x128xf32>
    %230 = vector.extract_strided_slice %229 {offsets = [0, 0], sizes = [8, 128], strides = [1, 1]} : vector<16x128xf32> to vector<8x128xf32>
    %c40_73 = arith.constant 40 : index
    %c0_74 = arith.constant 0 : index
    %231 = vector.load %arg9[%c40_73, %c0_74] : memref<64x256xf32, #tpu.memory_space<vmem>>, vector<8x128xf32>
    tpu.vector_store %arg9[%c40_73, %c0_74], %230 {strides = array<i32>} : memref<64x256xf32, #tpu.memory_space<vmem>>, vector<8x128xf32>,
    %232 = vector.extract_strided_slice %229 {offsets = [8, 0], sizes = [8, 128], strides = [1, 1]} : vector<16x128xf32> to vector<8x128xf32>
    %c16_75 = arith.constant 16 : index
    %c128_76 = arith.constant 128 : index
    %233 = vector.load %arg9[%c16_75, %c128_76] : memref<64x256xf32, #tpu.memory_space<vmem>>, vector<8x128xf32>
    tpu.vector_store %arg9[%c16_75, %c128_76], %232 {strides = array<i32>} : memref<64x256xf32, #tpu.memory_space<vmem>>, vector<8x128xf32>,
    %cst_77 = arith.constant dense<0.000000e+00> : vector<16x1024xf32>
    %234 = tpu.matmul %229, %9, %cst_77 {dimension_numbers = #tpu.dot_dimension_numbers<[1], [0], [0], [1], [0, 0, 1, 1], [], []>} : vector<16x128xf32>, vector<128x1024xf32>, vector<16x1024xf32> -> vector<16x1024xf32>
    %c48_78 = arith.constant 48 : index
    %c0_79 = arith.constant 0 : index
    %235 = vector.load %arg8[%c48_78, %c0_79] : memref<64x1024xf32, #tpu.memory_space<vmem>>, vector<8x512xf32>
    %236 = vector.extract_strided_slice %234 {offsets = [0, 0], sizes = [8, 512], strides = [1, 1]} : vector<16x1024xf32> to vector<8x512xf32>
    %237 = arith.addf %235, %236 : vector<8x512xf32>
    %c8_80 = arith.constant 8 : index
    %c512_81 = arith.constant 512 : index
    %238 = vector.load %arg8[%c8_80, %c512_81] : memref<64x1024xf32, #tpu.memory_space<vmem>>, vector<8x512xf32>
    %239 = vector.extract_strided_slice %234 {offsets = [8, 512], sizes = [8, 512], strides = [1, 1]} : vector<16x1024xf32> to vector<8x512xf32>
    %240 = arith.addf %238, %239 : vector<8x512xf32>
    %241 = tpu.concatenate %237, %240 in 0 : vector<8x512xf32>, vector<8x512xf32> -> vector<16x512xf32>
    %242 = vector.extract_strided_slice %241 {offsets = [0, 0], sizes = [16, 128], strides = [1, 1]} : vector<16x512xf32> to vector<16x128xf32>
    %243 = arith.negf %242 : vector<16x128xf32>
    %244 = math.exp %243 : vector<16x128xf32>
    %cst_82 = arith.constant 1.000000e+00 : f32
    %245 = vector.broadcast %cst_82 : f32 to vector<16x128xf32>
    %246 = arith.addf %245, %244 : vector<16x128xf32>
    %247 = arith.divf %245, %246 : vector<16x128xf32>
    %248 = vector.extract_strided_slice %241 {offsets = [0, 128], sizes = [16, 128], strides = [1, 1]} : vector<16x512xf32> to vector<16x128xf32>
    %249 = arith.negf %248 : vector<16x128xf32>
    %250 = math.exp %249 : vector<16x128xf32>
    %cst_83 = arith.constant 1.000000e+00 : f32
    %251 = vector.broadcast %cst_83 : f32 to vector<16x128xf32>
    %252 = arith.addf %251, %250 : vector<16x128xf32>
    %253 = arith.divf %251, %252 : vector<16x128xf32>
    %254 = vector.extract_strided_slice %241 {offsets = [0, 256], sizes = [16, 128], strides = [1, 1]} : vector<16x512xf32> to vector<16x128xf32>
    %255 = math.tanh %254 : vector<16x128xf32>
    %256 = vector.extract_strided_slice %241 {offsets = [0, 384], sizes = [16, 128], strides = [1, 1]} : vector<16x512xf32> to vector<16x128xf32>
    %257 = arith.negf %256 : vector<16x128xf32>
    %258 = math.exp %257 : vector<16x128xf32>
    %cst_84 = arith.constant 1.000000e+00 : f32
    %259 = vector.broadcast %cst_84 : f32 to vector<16x128xf32>
    %260 = arith.addf %259, %258 : vector<16x128xf32>
    %261 = arith.divf %259, %260 : vector<16x128xf32>
    %262 = arith.mulf %253, %227 : vector<16x128xf32>
    %263 = arith.mulf %247, %255 : vector<16x128xf32>
    %264 = arith.addf %262, %263 : vector<16x128xf32>
    %265 = math.tanh %264 : vector<16x128xf32>
    %266 = arith.mulf %261, %265 : vector<16x128xf32>
    %267 = vector.extract_strided_slice %266 {offsets = [0, 0], sizes = [8, 128], strides = [1, 1]} : vector<16x128xf32> to vector<8x128xf32>
    %c48_85 = arith.constant 48 : index
    %c0_86 = arith.constant 0 : index
    %268 = vector.load %arg9[%c48_85, %c0_86] : memref<64x256xf32, #tpu.memory_space<vmem>>, vector<8x128xf32>
    tpu.vector_store %arg9[%c48_85, %c0_86], %267 {strides = array<i32>} : memref<64x256xf32, #tpu.memory_space<vmem>>, vector<8x128xf32>,
    %269 = vector.extract_strided_slice %266 {offsets = [8, 0], sizes = [8, 128], strides = [1, 1]} : vector<16x128xf32> to vector<8x128xf32>
    %c8_87 = arith.constant 8 : index
    %c128_88 = arith.constant 128 : index
    %270 = vector.load %arg9[%c8_87, %c128_88] : memref<64x256xf32, #tpu.memory_space<vmem>>, vector<8x128xf32>
    tpu.vector_store %arg9[%c8_87, %c128_88], %269 {strides = array<i32>} : memref<64x256xf32, #tpu.memory_space<vmem>>, vector<8x128xf32>,
    %cst_89 = arith.constant dense<0.000000e+00> : vector<16x1024xf32>
    %271 = tpu.matmul %266, %9, %cst_89 {dimension_numbers = #tpu.dot_dimension_numbers<[1], [0], [0], [1], [0, 0, 1, 1], [], []>} : vector<16x128xf32>, vector<128x1024xf32>, vector<16x1024xf32> -> vector<16x1024xf32>
    %c56_90 = arith.constant 56 : index
    %c0_91 = arith.constant 0 : index
    %272 = vector.load %arg8[%c56_90, %c0_91] : memref<64x1024xf32, #tpu.memory_space<vmem>>, vector<8x512xf32>
    %273 = vector.extract_strided_slice %271 {offsets = [0, 0], sizes = [8, 512], strides = [1, 1]} : vector<16x1024xf32> to vector<8x512xf32>
    %274 = arith.addf %272, %273 : vector<8x512xf32>
    %c0_92 = arith.constant 0 : index
    %c512_93 = arith.constant 512 : index
    %275 = vector.load %arg8[%c0_92, %c512_93] : memref<64x1024xf32, #tpu.memory_space<vmem>>, vector<8x512xf32>
    %276 = vector.extract_strided_slice %271 {offsets = [8, 512], sizes = [8, 512], strides = [1, 1]} : vector<16x1024xf32> to vector<8x512xf32>
    %277 = arith.addf %275, %276 : vector<8x512xf32>
    %278 = tpu.concatenate %274, %277 in 0 : vector<8x512xf32>, vector<8x512xf32> -> vector<16x512xf32>
    %279 = vector.extract_strided_slice %278 {offsets = [0, 0], sizes = [16, 128], strides = [1, 1]} : vector<16x512xf32> to vector<16x128xf32>
    %280 = arith.negf %279 : vector<16x128xf32>
    %281 = math.exp %280 : vector<16x128xf32>
    %cst_94 = arith.constant 1.000000e+00 : f32
    %282 = vector.broadcast %cst_94 : f32 to vector<16x128xf32>
    %283 = arith.addf %282, %281 : vector<16x128xf32>
    %284 = arith.divf %282, %283 : vector<16x128xf32>
    %285 = vector.extract_strided_slice %278 {offsets = [0, 128], sizes = [16, 128], strides = [1, 1]} : vector<16x512xf32> to vector<16x128xf32>
    %286 = arith.negf %285 : vector<16x128xf32>
    %287 = math.exp %286 : vector<16x128xf32>
    %cst_95 = arith.constant 1.000000e+00 : f32
    %288 = vector.broadcast %cst_95 : f32 to vector<16x128xf32>
    %289 = arith.addf %288, %287 : vector<16x128xf32>
    %290 = arith.divf %288, %289 : vector<16x128xf32>
    %291 = vector.extract_strided_slice %278 {offsets = [0, 256], sizes = [16, 128], strides = [1, 1]} : vector<16x512xf32> to vector<16x128xf32>
    %292 = math.tanh %291 : vector<16x128xf32>
    %293 = vector.extract_strided_slice %278 {offsets = [0, 384], sizes = [16, 128], strides = [1, 1]} : vector<16x512xf32> to vector<16x128xf32>
    %294 = arith.negf %293 : vector<16x128xf32>
    %295 = math.exp %294 : vector<16x128xf32>
    %cst_96 = arith.constant 1.000000e+00 : f32
    %296 = vector.broadcast %cst_96 : f32 to vector<16x128xf32>
    %297 = arith.addf %296, %295 : vector<16x128xf32>
    %298 = arith.divf %296, %297 : vector<16x128xf32>
    %299 = arith.mulf %290, %264 : vector<16x128xf32>
    %300 = arith.mulf %284, %292 : vector<16x128xf32>
    %301 = arith.addf %299, %300 : vector<16x128xf32>
    %302 = math.tanh %301 : vector<16x128xf32>
    %303 = arith.mulf %298, %302 : vector<16x128xf32>
    %304 = vector.extract_strided_slice %303 {offsets = [0, 0], sizes = [8, 128], strides = [1, 1]} : vector<16x128xf32> to vector<8x128xf32>
    %c56_97 = arith.constant 56 : index
    %c0_98 = arith.constant 0 : index
    %305 = vector.load %arg9[%c56_97, %c0_98] : memref<64x256xf32, #tpu.memory_space<vmem>>, vector<8x128xf32>
    tpu.vector_store %arg9[%c56_97, %c0_98], %304 {strides = array<i32>} : memref<64x256xf32, #tpu.memory_space<vmem>>, vector<8x128xf32>,
    %306 = vector.extract_strided_slice %303 {offsets = [8, 0], sizes = [8, 128], strides = [1, 1]} : vector<16x128xf32> to vector<8x128xf32>
    %c0_99 = arith.constant 0 : index
    %c128_100 = arith.constant 128 : index
    %307 = vector.load %arg9[%c0_99, %c128_100] : memref<64x256xf32, #tpu.memory_space<vmem>>, vector<8x128xf32>
    tpu.vector_store %arg9[%c0_99, %c128_100], %306 {strides = array<i32>} : memref<64x256xf32, #tpu.memory_space<vmem>>, vector<8x128xf32>,
    %c0_101 = arith.constant 0 : index
    %c0_102 = arith.constant 0 : index
    %308 = vector.load %arg9[%c0_101, %c0_102] : memref<64x256xf32, #tpu.memory_space<vmem>>, vector<64x256xf32>
    %c0_103 = arith.constant 0 : index
    %c0_104 = arith.constant 0 : index
    %309 = vector.load %arg5[%c0_103, %c0_104] : memref<256x128xf32, #tpu.memory_space<vmem>>, vector<256x128xf32>
    %cst_105 = arith.constant dense<0.000000e+00> : vector<64x128xf32>
    %310 = tpu.matmul %308, %309, %cst_105 {dimension_numbers = #tpu.dot_dimension_numbers<[1], [0], [0], [1], [0, 0, 1, 1], [], []>} : vector<64x256xf32>, vector<256x128xf32>, vector<64x128xf32> -> vector<64x128xf32>
    %c0_106 = arith.constant 0 : index
    %c0_107 = arith.constant 0 : index
    %311 = vector.load %arg6[%c0_106, %c0_107] : memref<1x128xf32, #tpu.memory_space<vmem>>, vector<1x128xf32>
    %312 = vector.broadcast %311 : vector<1x128xf32> to vector<64x128xf32>
    %313 = arith.addf %310, %312 : vector<64x128xf32>
    %c0_108 = arith.constant 0 : index
    %c0_109 = arith.constant 0 : index
    %314 = vector.load %arg7[%c0_108, %c0_109] : memref<64x128xf32, #tpu.memory_space<vmem>>, vector<64x128xf32>
    tpu.vector_store %arg7[%c0_108, %c0_109], %313 {strides = array<i32>} : memref<64x128xf32, #tpu.memory_space<vmem>>, vector<64x128xf32>,
    return
  }
}

</mosaic_0001>

<bundles_post_ra>
// kernel: tpu_custom_call.1
= control target key start
LH: loop header
LB: loop body
LE: loop exit
PB: predicated region body
PF: predicated region fallthrough
CT: control target
= control target key end

     0   :  { %12 = vsyncpa [#allocation5], 0  ;;  %s7270_s0 = inlined_call_operand.hbm [shape: f32[64,128], index: 0, kind: input, shape index: {}]   ;;  %s7271_s1 = inlined_call_operand.hbm [shape: f32[128,128], index: 1, kind: input, shape index: {}]   ;;  %s7272_s2 = inlined_call_operand.hbm [shape: f32[128,1024], index: 2, kind: input, shape index: {}]   ;;  %s7273_s3 = inlined_call_operand.vmem [shape: f32[1,1024], index: 3, kind: input, shape index: {}]   ;;  %s7274_s4 = inlined_call_operand.hbm [shape: f32[128,1024], index: 4, kind: input, shape index: {}]   ;;  %s7275_s5 = inlined_call_operand.hbm [shape: f32[256,128], index: 5, kind: input, shape index: {}]   ;;  %s7276_s6 = inlined_call_operand.vmem [shape: f32[1,128], index: 6, kind: input, shape index: {}]   ;;  %s7277_s7 = inlined_call_operand.hbm [shape: f32[64,128], index: 7, kind: output, shape index: {}]  }
   0x1   :  { %13 = vsyncpa [#allocation8], 0 }
   0x2   :  { %14 = vsyncpa [#allocation11], 0 }
   0x3   :  { %15 = vsyncpa [#allocation6], 0  ;;  %s6077_s24 = smov [#allocation7]   ;;  %s5937_s28 = scalar_lea.hbm %s7271_s1, 2048 }
   0x4   :  { %s33_s25 = sshll.u32 %s6077_s24, 4  ;;  %p5938_p0 = scmp.ne.s32.totalorder %s7271_s1, %s5937_s28  ;;  %s34_s25 = int_to_ptr.vmem [resolvable:$true] %s33_s25 }
   0x5   :  { %p5941_p1 = scmp.lt.u32.totalorder %s5937_s28, %s7271_s1 }
   0x7   :  { %p5943_p2 = pnand %p5941_p1, %p5938_p0 }
   0x9   :  { %5946 = shalt.err (!%p5943_p2)
}
   0xa   :  { %s5947_s10 = scalar_lea.vmem %s34_s25, 2048  ;;  %p5952_p4 = scmp.lt.s32.totalorder %s34_s25, %s34_s25 }
   0xb   :  { %p5948_p3 = scmp.ne.s32.totalorder %s34_s25, %s5947_s10  ;;  %p5953_p5 = scmp.lt.s32.totalorder %s5947_s10, %s5947_s10 }
   0xd   :  { %p5954_p6 = por %p5953_p5, %p5952_p4 }
   0xf   :  { %p5955_p7 = pnand %p5954_p6, %p5948_p3 }
  0x11   :  { %5958 = shalt.err (!%p5955_p7)
}
  0x12   :  { %s6078_s11 = smov 128   ;;  %s6079_s12 = smov 8  }
  0x13   :  { %39 = dma.hbm_to_vmem [thread:$0]  %s7271_s1, 2048, %s34_s25, [#allocation8], %s6078_s11, %s6078_s11, %s6079_s12  }
  0x14   :  { %s6080_s15 = smov [#allocation10]   ;;  %s6081_s17 = smov [#allocation4]  }
  0x15   :  { %s59_s16 = sshll.u32 %s6080_s15, 4  ;;  %s21_s18 = sshll.u32 %s6081_s17, 4  ;;  %s60_s16 = int_to_ptr.vmem [resolvable:$true] %s59_s16  ;;  %s22_s18 = int_to_ptr.vmem [resolvable:$true] %s21_s18 }
  0x16   :  { %s5959_s21 = scalar_lea.hbm %s7274_s4, 16384 }
  0x17   :  { %p5960_p8 = scmp.ne.s32.totalorder %s7274_s4, %s5959_s21  ;;  %p5963_p9 = scmp.lt.u32.totalorder %s5959_s21, %s7274_s4 }
  0x19   :  { %p5965_p10 = pnand %p5963_p9, %p5960_p8 }
  0x1b   :  { %5968 = shalt.err (!%p5965_p10)
}
  0x1c   :  { %s5969_s1 = scalar_lea.vmem %s60_s16, 16384  ;;  %p5974_p12 = scmp.lt.s32.totalorder %s60_s16, %s60_s16 }
  0x1d   :  { %p5970_p11 = scmp.ne.s32.totalorder %s60_s16, %s5969_s1  ;;  %p5975_p13 = scmp.lt.s32.totalorder %s5969_s1, %s5969_s1 }
  0x1f   :  { %p5976_p0 = por %p5975_p13, %p5974_p12 }
  0x21   :  { %p5977_p1 = pnand %p5976_p0, %p5970_p11 }
  0x23   :  { %5980 = shalt.err (!%p5977_p1)
}
  0x24   :  { %s6082_s25 = smov 1024   ;;  %s6083_s27 = smov 64  }
  0x25   :  { %65 = dma.hbm_to_vmem [thread:$0]  %s7274_s4, 16384, %s60_s16, [#allocation11], %s6082_s25, %s6082_s25, %s6083_s27  }
  0x26   :  { %s5981_s9 = scalar_lea.hbm %s7270_s0, 1024 }
  0x27   :  { %p5982_p2 = scmp.ne.s32.totalorder %s7270_s0, %s5981_s9  ;;  %p5985_p3 = scmp.lt.u32.totalorder %s5981_s9, %s7270_s0 }
  0x29   :  { %p5987_p4 = pnand %p5985_p3, %p5982_p2 }
  0x2b   :  { %5990 = shalt.err (!%p5987_p4)
}
  0x2c   :  { %s5991_s17 = scalar_lea.vmem %s22_s18, 1024  ;;  %p5996_p6 = scmp.lt.s32.totalorder %s22_s18, %s22_s18 }
  0x2d   :  { %p5992_p5 = scmp.ne.s32.totalorder %s22_s18, %s5991_s17  ;;  %p5997_p7 = scmp.lt.s32.totalorder %s5991_s17, %s5991_s17 }
  0x2f   :  { %p5998_p8 = por %p5997_p7, %p5996_p6 }
  0x31   :  { %p5999_p9 = pnand %p5998_p8, %p5992_p5 }
  0x33   :  { %6002 = shalt.err (!%p5999_p9)
}
  0x34   :  { %27 = dma.hbm_to_vmem [thread:$0]  %s7270_s0, 1024, %s22_s18, [#allocation5], %s6078_s11, %s6078_s11, %s6079_s12  }
  0x35   :  { %s6084_s19 = smov [#allocation9]   ;;  %s6085_s21 = smov [#allocation12]  }
  0x36   :  { %s45_s20 = sshll.u32 %s6084_s19, 4  ;;  %s71_s22 = sshll.u32 %s6085_s21, 4  ;;  %s46_s20 = int_to_ptr.vmem [resolvable:$true] %s45_s20  ;;  %s72_s22 = int_to_ptr.vmem [resolvable:$true] %s71_s22 }
  0x37   :  { %s6003_s26 = scalar_lea.hbm %s7272_s2, 16384 }
  0x38   :  { %p6004_p10 = scmp.ne.s32.totalorder %s7272_s2, %s6003_s26  ;;  %p6007_p11 = scmp.lt.u32.totalorder %s6003_s26, %s7272_s2 }
  0x3a   :  { %p6009_p12 = pnand %p6007_p11, %p6004_p10 }
  0x3c   :  { %6012 = shalt.err (!%p6009_p12)
}
  0x3d   :  { %s6013_s0 = scalar_lea.vmem %s46_s20, 16384  ;;  %p6018_p0 = scmp.lt.s32.totalorder %s46_s20, %s46_s20 }
  0x3e   :  { %p6014_p13 = scmp.ne.s32.totalorder %s46_s20, %s6013_s0  ;;  %p6019_p1 = scmp.lt.s32.totalorder %s6013_s0, %s6013_s0 }
  0x40   :  { %p6020_p2 = por %p6019_p1, %p6018_p0 }
  0x42   :  { %p6021_p3 = pnand %p6020_p2, %p6014_p13 }
  0x44   :  { %6024 = shalt.err (!%p6021_p3)
}
  0x45   :  { %51 = dma.hbm_to_vmem [thread:$0]  %s7272_s2, 16384, %s46_s20, [#allocation8], %s6082_s25, %s6082_s25, %s6083_s27  }
  0x46   :  { %s6025_s13 = scalar_lea.hbm %s7275_s5, 4096 }
  0x47   :  { %p6026_p4 = scmp.ne.s32.totalorder %s7275_s5, %s6025_s13  ;;  %p6029_p5 = scmp.lt.u32.totalorder %s6025_s13, %s7275_s5 }
  0x49   :  { %p6031_p6 = pnand %p6029_p5, %p6026_p4 }
  0x4b   :  { %6034 = shalt.err (!%p6031_p6)
}
  0x4c   :  { %s6035_s16 = scalar_lea.vmem %s72_s22, 4096  ;;  %p6040_p8 = scmp.lt.s32.totalorder %s72_s22, %s72_s22 }
  0x4d   :  { %p6036_p7 = scmp.ne.s32.totalorder %s72_s22, %s6035_s16  ;;  %p6041_p9 = scmp.lt.s32.totalorder %s6035_s16, %s6035_s16 }
  0x4f   :  { %p6042_p10 = por %p6041_p9, %p6040_p8 }
  0x51   :  { %p6043_p11 = pnand %p6042_p10, %p6036_p7 }
  0x53   :  { %6046 = shalt.err (!%p6043_p11)
}
  0x54   :  { %77 = dma.hbm_to_vmem [thread:$0]  %s7275_s5, 4096, %s72_s22, [#allocation11], %s6078_s11, %s6078_s11, %s6079_s12  }
  0x55   :  { %6069 = dma.done.wait [#allocation5], 1024  }
  0x56   :  { %6070 = vsyncadd [#allocation5], 4294966272 }
  0x57   :  { %6071 = dma.done.wait [#allocation8], 18432  }
  0x58   :  { %6072 = vsyncadd [#allocation8], 4294948864 }
  0x59   :  { %6073 = dma.done.wait [#allocation11], 20480  }
  0x5a   :  { %6074 = vsyncadd [#allocation11], 4294946816  ;;  %v103_v0 = vld [vmem:[#allocation7] sm:$0xff]  ;;  %v104_v1 = vld [vmem:[#allocation7 + $0x8] sm:$0xff] }
  0x5b   :  { %v105_v2 = vld [vmem:[#allocation7 + $0x10] sm:$0xff]  ;;  %v4326_v3 = vpack.c.bf16 %v104_v1, %v103_v0  ;;  %v106_v4 = vld [vmem:[#allocation7 + $0x18] sm:$0xff]  ;;  %v107_v6 = vld [vmem:[#allocation7 + $0x20] sm:$0xff] }
  0x5c   :  { %v4330_v5 = vpack.c.bf16 %v106_v4, %v105_v2  ;;  %v108_v7 = vld [vmem:[#allocation7 + $0x28] sm:$0xff]  ;;  %v95_v9 = vld [vmem:[#allocation4] sm:$0xff]  ;;  %v109_v10 = vld [vmem:[#allocation7 + $0x30] sm:$0xff] }
  0x5d   :  { %4327 = vmatprep.subr.bf16.mxu0 %v4326_v3  ;;  %v4334_v8 = vpack.c.bf16 %v108_v7, %v107_v6  ;;  %v110_v11 = vld [vmem:[#allocation7 + $0x38] sm:$0xff]  ;;  %4314 = vmatprep.mubr.f32.mxu0 %v95_v9  ;;  %v225_v12 = vld [vmem:[#allocation9 + $0x8] sm:$0xff]  ;;  %v224_v16 = vld [vmem:[#allocation9] sm:$0xff] }
  0x5e   :  { %4329 = vmatpush3.bf16.msra.mxu0 %v4326_v3  ;;  %v233_v13 = vld [vmem:[#allocation9 + $0x48] sm:$0xff]  ;;  %v4338_v14 = vpack.c.bf16 %v110_v11, %v109_v10  ;;  %v232_v17 = vld [vmem:[#allocation9 + $0x40] sm:$0xff]  ;;  %v113_v30 = vld [vmem:[#allocation7 + $0x50] sm:$0xff] }
  0x5f   :  { %4331 = vmatprep.subr.bf16.mxu0 %v4330_v5  ;;  %v4358_v15 = vpack.c.bf16 %v233_v13, %v225_v12  ;;  %v111_v18 = vld [vmem:[#allocation7 + $0x40] sm:$0xff]  ;;  %v112_v19 = vld [vmem:[#allocation7 + $0x48] sm:$0xff]  ;;  %v4360_v20 = vpack.c.bf16 %v232_v17, %v224_v16  ;;  %v114_v31 = vld [vmem:[#allocation7 + $0x58] sm:$0xff] }
  0x60   :  { %v241_v21 = vld [vmem:[#allocation9 + $0x88] sm:$0xff]  ;;  %v240_v24 = vld [vmem:[#allocation9 + $0x80] sm:$0xff]  ;;  %v4342_v26 = vpack.c.bf16 %v112_v19, %v111_v18  ;;  %v4346_v38 = vpack.c.bf16 %v114_v31, %v113_v30  ;;  %v117_v48 = vld [vmem:[#allocation7 + $0x70] sm:$0xff] }
  0x61   :  { %4359 = vmatprep.subr.bf16.mxu1 %v4358_v15  ;;  %v249_v22 = vld [vmem:[#allocation9 + $0xc8] sm:$0xff]  ;;  %v248_v25 = vld [vmem:[#allocation9 + $0xc0] sm:$0xff]  ;;  %v118_v52 = vld [vmem:[#allocation7 + $0x78] sm:$0xff] }
  0x62   :  { %4333 = vmatpush3.bf16.msra.mxu0 %v4330_v5  ;;  %4361 = vmatpush1.bf16.msra.mxu1 %v4360_v20  ;;  %v4362_v23 = vpack.c.bf16 %v249_v22, %v241_v21  ;;  %v4364_v27 = vpack.c.bf16 %v248_v25, %v240_v24  ;;  %v257_v28 = vld [vmem:[#allocation9 + $0x108] sm:$0xff]  ;;  %v256_v33 = vld [vmem:[#allocation9 + $0x100] sm:$0xff]  ;;  %v4354_v56 = vpack.c.bf16 %v118_v52, %v117_v48  ;;  %v227_v57 = vld [vmem:[#allocation9 + $0x18] sm:$0xff] }
  0x63   :  { %4335 = vmatprep.subr.bf16.mxu0 %v4334_v8  ;;  %v265_v29 = vld [vmem:[#allocation9 + $0x148] sm:$0xff]  ;;  %v264_v34 = vld [vmem:[#allocation9 + $0x140] sm:$0xff]  ;;  %v235_v61 = vld [vmem:[#allocation9 + $0x58] sm:$0xff] }
  0x64   :  { %4363 = vmatprep.subr.bf16.mxu1 %v4362_v23  ;;  %v4366_v32 = vpack.c.bf16 %v265_v29, %v257_v28  ;;  %v4368_v35 = vpack.c.bf16 %v264_v34, %v256_v33  ;;  %v273_v36 = vld [vmem:[#allocation9 + $0x188] sm:$0xff]  ;;  %v272_v40 = vld [vmem:[#allocation9 + $0x180] sm:$0xff]  ;;  %v4390_v1 = vpack.c.bf16 %v235_v61, %v227_v57  ;;  %v226_v2 = vld [vmem:[#allocation9 + $0x10] sm:$0xff] }
  0x65   :  { %v281_v37 = vld [vmem:[#allocation9 + $0x1c8] sm:$0xff]  ;;  %v280_v41 = vld [vmem:[#allocation9 + $0x1c0] sm:$0xff]  ;;  %v234_v3 = vld [vmem:[#allocation9 + $0x50] sm:$0xff] }
  0x66   :  { %4337 = vmatpush3.bf16.msra.mxu0 %v4334_v8  ;;  %4365 = vmatpush1.bf16.msra.mxu1 %v4364_v27  ;;  %v4370_v39 = vpack.c.bf16 %v281_v37, %v273_v36  ;;  %v115_v42 = vld [vmem:[#allocation7 + $0x60] sm:$0xff]  ;;  %v116_v43 = vld [vmem:[#allocation7 + $0x68] sm:$0xff]  ;;  %v4372_v46 = vpack.c.bf16 %v280_v41, %v272_v40  ;;  %v243_v4 = vld [vmem:[#allocation9 + $0x98] sm:$0xff]  ;;  %v4392_v13 = vpack.c.bf16 %v234_v3, %v226_v2 }
  0x67   :  { %4339 = vmatprep.subr.bf16.mxu0 %v4338_v14  ;;  %4367 = vmatprep.subr.bf16.mxu1 %v4366_v32  ;;  %v289_v44 = vld [vmem:[#allocation9 + $0x208] sm:$0xff]  ;;  %v4350_v47 = vpack.c.bf16 %v116_v43, %v115_v42  ;;  %v288_v50 = vld [vmem:[#allocation9 + $0x200] sm:$0xff]  ;;  %v251_v6 = vld [vmem:[#allocation9 + $0xd8] sm:$0xff] }
  0x68   :  { %v297_v45 = vld [vmem:[#allocation9 + $0x248] sm:$0xff]  ;;  %v296_v51 = vld [vmem:[#allocation9 + $0x240] sm:$0xff]  ;;  %v97_v12 = vld [vmem:[#allocation4 + $0x10] sm:$0xff] }
  0x69   :  { %v4374_v49 = vpack.c.bf16 %v297_v45, %v289_v44  ;;  %v305_v53 = vld [vmem:[#allocation9 + $0x288] sm:$0xff]  ;;  %v4376_v55 = vpack.c.bf16 %v296_v51, %v288_v50  ;;  %v304_v59 = vld [vmem:[#allocation9 + $0x280] sm:$0xff]  ;;  %v242_v15 = vld [vmem:[#allocation9 + $0x90] sm:$0xff] }
  0x6a   :  { %4341 = vmatpush3.bf16.msra.mxu0 %v4338_v14  ;;  %4369 = vmatpush1.bf16.msra.mxu1 %v4368_v35  ;;  %v313_v54 = vld [vmem:[#allocation9 + $0x2c8] sm:$0xff]  ;;  %v312_v60 = vld [vmem:[#allocation9 + $0x2c0] sm:$0xff]  ;;  %v4394_v14 = vpack.c.bf16 %v251_v6, %v243_v4  ;;  %v250_v16 = vld [vmem:[#allocation9 + $0xd0] sm:$0xff]  ;;  %v7278_v6 = vmov 0.0  }
  0x6b   :  { %4343 = vmatprep.subr.bf16.mxu0 %v4342_v26  ;;  %4371 = vmatprep.subr.bf16.mxu1 %v4370_v39  ;;  %v4378_v58 = vpack.c.bf16 %v313_v54, %v305_v53  ;;  %v321_v62 = vld [vmem:[#allocation9 + $0x308] sm:$0xff]  ;;  %v4380_v0 = vpack.c.bf16 %v312_v60, %v304_v59  ;;  %v320_v7 = vld [vmem:[#allocation9 + $0x300] sm:$0xff]  ;;  %v259_v17 = vld [vmem:[#allocation9 + $0x118] sm:$0xff]  ;;  %v4396_v24 = vpack.c.bf16 %v250_v16, %v242_v15 }
  0x6c   :  { %v329_v63 = vld [vmem:[#allocation9 + $0x348] sm:$0xff]  ;;  %v328_v8 = vld [vmem:[#allocation9 + $0x340] sm:$0xff]  ;;  %v267_v19 = vld [vmem:[#allocation9 + $0x158] sm:$0xff]  ;;  %458 = vmatprep.mubr.f32.mxu1 %v7278_v6 }
  0x6d   :  { %v4382_v5 = vpack.c.bf16 %v329_v63, %v321_v62  ;;  %v337_v9 = vld [vmem:[#allocation9 + $0x388] sm:$0xff]  ;;  %v4384_v18 = vpack.c.bf16 %v328_v8, %v320_v7  ;;  %v336_v21 = vld [vmem:[#allocation9 + $0x380] sm:$0xff]  ;;  %v98_v23 = vld [vmem:[#allocation4 + $0x18] sm:$0xff] }
  0x6e   :  { %4345 = vmatpush3.bf16.msra.mxu0 %v4342_v26  ;;  %4373 = vmatpush1.bf16.msra.mxu1 %v4372_v46  ;;  %v345_v10 = vld [vmem:[#allocation9 + $0x3c8] sm:$0xff]  ;;  %v344_v22 = vld [vmem:[#allocation9 + $0x3c0] sm:$0xff]  ;;  %v4398_v26 = vpack.c.bf16 %v267_v19, %v259_v17  ;;  %v258_v27 = vld [vmem:[#allocation9 + $0x110] sm:$0xff] }
  0x6f   :  { %4347 = vmatprep.subr.bf16.mxu0 %v4346_v38  ;;  %4375 = vmatprep.subr.bf16.mxu1 %v4374_v49  ;;  %v96_v11 = vld [vmem:[#allocation4 + $0x8] sm:$0xff]  ;;  %v4386_v20 = vpack.c.bf16 %v345_v10, %v337_v9  ;;  %v99_v25 = vld [vmem:[#allocation4 + $0x20] sm:$0xff]  ;;  %v266_v28 = vld [vmem:[#allocation9 + $0x150] sm:$0xff]  ;;  %v4388_v29 = vpack.c.bf16 %v344_v22, %v336_v21 }
  0x70   :  { %v275_v30 = vld [vmem:[#allocation9 + $0x198] sm:$0xff]  ;;  %v100_v32 = vld [vmem:[#allocation4 + $0x28] sm:$0xff]  ;;  %v4400_v33 = vpack.c.bf16 %v266_v28, %v258_v27  ;;  %v101_v34 = vld [vmem:[#allocation4 + $0x30] sm:$0xff] }
  0x71   :  { %v283_v31 = vld [vmem:[#allocation9 + $0x1d8] sm:$0xff]  ;;  %v274_v36 = vld [vmem:[#allocation9 + $0x190] sm:$0xff]  ;;  %v228_v7 = vld [vmem:[#allocation9 + $0x20] sm:$0xff] }
  0x72   :  { %4349 = vmatpush3.bf16.msra.mxu0 %v4346_v38  ;;  %4377 = vmatpush1.bf16.msra.mxu1 %v4376_v55  ;;  %v4402_v35 = vpack.c.bf16 %v283_v31, %v275_v30  ;;  %v282_v37 = vld [vmem:[#allocation9 + $0x1d0] sm:$0xff]  ;;  %v291_v38 = vld [vmem:[#allocation9 + $0x218] sm:$0xff]  ;;  %v236_v8 = vld [vmem:[#allocation9 + $0x60] sm:$0xff] }
  0x73   :  { %4351 = vmatprep.subr.bf16.mxu0 %v4350_v47  ;;  %4379 = vmatprep.subr.bf16.mxu1 %v4378_v58  ;;  %v299_v39 = vld [vmem:[#allocation9 + $0x258] sm:$0xff]  ;;  %v4404_v41 = vpack.c.bf16 %v282_v37, %v274_v36  ;;  %v290_v43 = vld [vmem:[#allocation9 + $0x210] sm:$0xff]  ;;  %v4424_v15 = vpack.c.bf16 %v236_v8, %v228_v7  ;;  %v244_v17 = vld [vmem:[#allocation9 + $0xa0] sm:$0xff] }
  0x74   :  { %v102_v40 = vld [vmem:[#allocation4 + $0x38] sm:$0xff]  ;;  %v4406_v42 = vpack.c.bf16 %v299_v39, %v291_v38  ;;  %v298_v44 = vld [vmem:[#allocation9 + $0x250] sm:$0xff]  ;;  %v252_v19 = vld [vmem:[#allocation9 + $0xe0] sm:$0xff] }
  0x75   :  { %v307_v45 = vld [vmem:[#allocation9 + $0x298] sm:$0xff]  ;;  %v306_v49 = vld [vmem:[#allocation9 + $0x290] sm:$0xff]  ;;  %v260_v31 = vld [vmem:[#allocation9 + $0x120] sm:$0xff] }
  0x76   :  { %4353 = vmatpush3.bf16.msra.mxu0 %v4350_v47  ;;  %4381 = vmatpush1.bf16.msra.mxu1 %v4380_v0  ;;  %v315_v46 = vld [vmem:[#allocation9 + $0x2d8] sm:$0xff]  ;;  %v4408_v47 = vpack.c.bf16 %v298_v44, %v290_v43  ;;  %v314_v50 = vld [vmem:[#allocation9 + $0x2d0] sm:$0xff]  ;;  %v229_v0 = vld [vmem:[#allocation9 + $0x28] sm:$0xff] }
  0x77   :  { %4355 = vmatprep.subr.bf16.mxu0 %v4354_v56  ;;  %4383 = vmatprep.subr.bf16.mxu1 %v4382_v5  ;;  %v4410_v48 = vpack.c.bf16 %v315_v46, %v307_v45  ;;  %v323_v51 = vld [vmem:[#allocation9 + $0x318] sm:$0xff]  ;;  %v4412_v53 = vpack.c.bf16 %v314_v50, %v306_v49  ;;  %v322_v55 = vld [vmem:[#allocation9 + $0x310] sm:$0xff]  ;;  %v277_v39 = vld [vmem:[#allocation9 + $0x1a8] sm:$0xff] }
  0x78   :  { %v331_v52 = vld [vmem:[#allocation9 + $0x358] sm:$0xff]  ;;  %v338_v61 = vld [vmem:[#allocation9 + $0x390] sm:$0xff]  ;;  %v276_v45 = vld [vmem:[#allocation9 + $0x1a0] sm:$0xff] }
  0x79   :  { %v4414_v54 = vpack.c.bf16 %v331_v52, %v323_v51  ;;  %v339_v57 = vld [vmem:[#allocation9 + $0x398] sm:$0xff]  ;;  %v346_v62 = vld [vmem:[#allocation9 + $0x3d0] sm:$0xff]  ;;  %v284_v46 = vld [vmem:[#allocation9 + $0x1e0] sm:$0xff] }
  0x7a   :  { %4357 = vmatpush3.bf16.msra.mxu0 %v4354_v56  ;;  %4385 = vmatpush1.bf16.msra.mxu1 %v4384_v18  ;;  %v330_v56 = vld [vmem:[#allocation9 + $0x350] sm:$0xff]  ;;  %v347_v58 = vld [vmem:[#allocation9 + $0x3d8] sm:$0xff]  ;;  %v4420_v63 = vpack.c.bf16 %v346_v62, %v338_v61 }
  0x7b   :  { %4391 = vmatprep.subr.bf16.mxu0 %v4390_v1  ;;  %4387 = vmatprep.subr.bf16.mxu1 %v4386_v20  ;;  %v4416_v59 = vpack.c.bf16 %v330_v56, %v322_v55  ;;  %v4418_v60 = vpack.c.bf16 %v347_v58, %v339_v57  ;;  %v237_v1 = vld [vmem:[#allocation9 + $0x68] sm:$0xff]  ;;  %v231_v2 = vld [vmem:[#allocation9 + $0x38] sm:$0xff]  ;;  %v230_v9 = vld [vmem:[#allocation9 + $0x30] sm:$0xff]  ;;  %v4436_v57 = vpack.c.bf16 %v284_v46, %v276_v45 }
  0x7c   :  { %v4422_v3 = vpack.c.bf16 %v237_v1, %v229_v0  ;;  %v239_v4 = vld [vmem:[#allocation9 + $0x78] sm:$0xff]  ;;  %v238_v10 = vld [vmem:[#allocation9 + $0x70] sm:$0xff]  ;;  %v919_v45 = vld [vmem:[#allocation10 + $0x48] sm:$0xff] }
  0x7d   :  { %4315 = vmatmul.mubr.f32.vlgmr.msra.gmra.mrb[0].mxu0 %v96_v11  ;;  %v4454_v5 = vpack.c.bf16 %v239_v4, %v231_v2  ;;  %v245_v11 = vld [vmem:[#allocation9 + $0xa8] sm:$0xff]  ;;  %v4456_v16 = vpack.c.bf16 %v238_v10, %v230_v9  ;;  %v246_v20 = vld [vmem:[#allocation9 + $0xb0] sm:$0xff]  ;;  %v263_v27 = vld [vmem:[#allocation9 + $0x138] sm:$0xff] }
  0x7e   :  { %4317 = vmatprep.mubr.f32.mxu0 %v97_v12  ;;  %4393 = vmatpush1.bf16.msra.mxu0 %v4392_v13  ;;  %v253_v12 = vld [vmem:[#allocation9 + $0xe8] sm:$0xff]  ;;  %v247_v13 = vld [vmem:[#allocation9 + $0xb8] sm:$0xff]  ;;  %v254_v21 = vld [vmem:[#allocation9 + $0xf0] sm:$0xff] }
  0x7f   :  { %4395 = vmatprep.subr.bf16.mxu0 %v4394_v14  ;;  %4389 = vmatpush1.bf16.msra.mxu1 %v4388_v29  ;;  %v255_v14 = vld [vmem:[#allocation9 + $0xf8] sm:$0xff]  ;;  %v4428_v29 = vpack.c.bf16 %v252_v19, %v244_v17  ;;  %v4460_v30 = vpack.c.bf16 %v254_v21, %v246_v20  ;;  %v294_v61 = vld [vmem:[#allocation9 + $0x230] sm:$0xff]  ;;  %v309_v2 = vld [vmem:[#allocation9 + $0x2a8] sm:$0xff] }
  0x80   :  { %4423 = vmatprep.subr.bf16.mxu1 %v4422_v3  ;;  %v271_v28 = vld [vmem:[#allocation9 + $0x178] sm:$0xff]  ;;  %v302_v62 = vld [vmem:[#allocation9 + $0x270] sm:$0xff]  ;;  %v317_v4 = vld [vmem:[#allocation9 + $0x2e8] sm:$0xff] }
  0x81   :  { %4318 = vmatmul.mubr.f32.gmra.mrb[2].mxu0 %v98_v23  ;;  %v4426_v23 = vpack.c.bf16 %v253_v12, %v245_v11  ;;  %v4462_v38 = vpack.c.bf16 %v271_v28, %v263_v27  ;;  %v295_v55 = vld [vmem:[#allocation9 + $0x238] sm:$0xff]  ;;  %v4472_v9 = vpack.c.bf16 %v302_v62, %v294_v61  ;;  %v308_v10 = vld [vmem:[#allocation9 + $0x2a0] sm:$0xff]  ;;  %v310_v12 = vld [vmem:[#allocation9 + $0x2b0] sm:$0xff] }
  0x82   :  { %4320 = vmatprep.mubr.f32.mxu0 %v99_v25  ;;  %4397 = vmatpush1.bf16.msra.mxu0 %v4396_v24  ;;  %v4458_v24 = vpack.c.bf16 %v255_v14, %v247_v13  ;;  %v261_v25 = vld [vmem:[#allocation9 + $0x128] sm:$0xff]  ;;  %v303_v56 = vld [vmem:[#allocation9 + $0x278] sm:$0xff]  ;;  %v316_v11 = vld [vmem:[#allocation9 + $0x2e0] sm:$0xff]  ;;  %v4442_v14 = vpack.c.bf16 %v317_v4, %v309_v2 }
  0x83   :  { %4399 = vmatprep.subr.bf16.mxu0 %v4398_v26  ;;  %v269_v26 = vld [vmem:[#allocation9 + $0x168] sm:$0xff]  ;;  %v4470_v1 = vpack.c.bf16 %v303_v56, %v295_v55  ;;  %v319_v7 = vld [vmem:[#allocation9 + $0x2f8] sm:$0xff]  ;;  %v318_v13 = vld [vmem:[#allocation9 + $0x2f0] sm:$0xff]  ;;  %v4444_v21 = vpack.c.bf16 %v316_v11, %v308_v10 }
  0x84   :  { %v4430_v37 = vpack.c.bf16 %v269_v26, %v261_v25  ;;  %v333_v17 = vld [vmem:[#allocation9 + $0x368] sm:$0xff]  ;;  %v327_v19 = vld [vmem:[#allocation9 + $0x338] sm:$0xff]  ;;  %v332_v25 = vld [vmem:[#allocation9 + $0x360] sm:$0xff] }
  0x85   :  { %4321 = vmatmul.mubr.f32.gmra.mrb[4].mxu0 %v100_v32  ;;  %v335_v20 = vld [vmem:[#allocation9 + $0x378] sm:$0xff]  ;;  %v326_v26 = vld [vmem:[#allocation9 + $0x330] sm:$0xff]  ;;  %v934_v2 = vld [vmem:[#allocation10 + $0xc0] sm:$0xff] }
  0x86   :  { %4323 = vmatprep.mubr.f32.mxu0 %v101_v34  ;;  %4401 = vmatpush1.bf16.msra.mxu0 %v4400_v33  ;;  %v268_v33 = vld [vmem:[#allocation9 + $0x160] sm:$0xff]  ;;  %v262_v34 = vld [vmem:[#allocation9 + $0x130] sm:$0xff]  ;;  %v913_v46 = vld [vmem:[#allocation10 + $0x18] sm:$0xff] }
  0x87   :  { %4403 = vmatprep.subr.bf16.mxu0 %v4402_v35  ;;  %v270_v35 = vld [vmem:[#allocation9 + $0x170] sm:$0xff]  ;;  %v4432_v43 = vpack.c.bf16 %v268_v33, %v260_v31  ;;  %v349_v31 = vld [vmem:[#allocation9 + $0x3e8] sm:$0xff]  ;;  %v343_v33 = vld [vmem:[#allocation9 + $0x3b8] sm:$0xff] }
  0x88   :  { %v4464_v44 = vpack.c.bf16 %v270_v35, %v262_v34  ;;  %v334_v27 = vld [vmem:[#allocation9 + $0x370] sm:$0xff]  ;;  %v351_v34 = vld [vmem:[#allocation9 + $0x3f8] sm:$0xff]  ;;  %v951_v10 = vld [vmem:[#allocation10 + $0x148] sm:$0xff] }
  0x89   :  { %4324 = vmatmul.mubr.f32.gmra.mrb[6].mxu0 %v102_v40  ;;  %v285_v40 = vld [vmem:[#allocation9 + $0x1e8] sm:$0xff]  ;;  %v920_v55 = vld [vmem:[#allocation10 + $0x50] sm:$0xff]  ;;  %v937_v61 = vld [vmem:[#allocation10 + $0xd8] sm:$0xff] }
  0x8a   :  { %4405 = vmatpush1.bf16.msra.mxu0 %v4404_v41  ;;  %571 = vmatprep.mubr.f32.mxu0 %v7278_v6  ;;  %v279_v41 = vld [vmem:[#allocation9 + $0x1b8] sm:$0xff]  ;;  %v4434_v50 = vpack.c.bf16 %v285_v40, %v277_v39  ;;  %v348_v39 = vld [vmem:[#allocation9 + $0x3e0] sm:$0xff]  ;;  %v342_v40 = vld [vmem:[#allocation9 + $0x3b0] sm:$0xff] }
  0x8b   :  { %4407 = vmatprep.subr.bf16.mxu0 %v4406_v42  ;;  %v287_v42 = vld [vmem:[#allocation9 + $0x1f8] sm:$0xff]  ;;  %v928_v4 = vld [vmem:[#allocation10 + $0x90] sm:$0xff] }
  0x8c   :  { %v4466_v51 = vpack.c.bf16 %v287_v42, %v279_v41  ;;  %v350_v41 = vld [vmem:[#allocation9 + $0x3f0] sm:$0xff]  ;;  %v945_v11 = vld [vmem:[#allocation10 + $0x118] sm:$0xff] }
  0x8e   :  { %4409 = vmatpush1.bf16.msra.mxu0 %v4408_v47  ;;  %v278_v47 = vld [vmem:[#allocation9 + $0x1b0] sm:$0xff] }
  0x8f   :  { %4411 = vmatprep.subr.bf16.mxu0 %v4410_v48  ;;  %v286_v48 = vld [vmem:[#allocation9 + $0x1f0] sm:$0xff] }
  0x90   :  { %v4468_v58 = vpack.c.bf16 %v286_v48, %v278_v47  ;;  %v921_v47 = vld [vmem:[#allocation10 + $0x58] sm:$0xff] }
  0x92   :  { %4413 = vmatpush1.bf16.msra.mxu0 %v4412_v53  ;;  %v293_v53 = vld [vmem:[#allocation9 + $0x228] sm:$0xff] }
  0x93   :  { %4415 = vmatprep.subr.bf16.mxu0 %v4414_v54  ;;  %v301_v54 = vld [vmem:[#allocation9 + $0x268] sm:$0xff] }
  0x94   :  { %v4438_v0 = vpack.c.bf16 %v301_v54, %v293_v53  ;;  %v918_v53 = vld [vmem:[#allocation10 + $0x40] sm:$0xff]  ;;  %v912_v54 = vld [vmem:[#allocation10 + $0x10] sm:$0xff] }
  0x96   :  { %4417 = vmatpush1.bf16.msra.mxu0 %v4416_v59  ;;  %v292_v59 = vld [vmem:[#allocation9 + $0x220] sm:$0xff] }
  0x97   :  { %4419 = vmatprep.subr.bf16.mxu0 %v4418_v60  ;;  %v300_v60 = vld [vmem:[#allocation9 + $0x260] sm:$0xff] }
  0x98   :  { %v4440_v8 = vpack.c.bf16 %v300_v60, %v292_v59  ;;  %v935_v59 = vld [vmem:[#allocation10 + $0xc8] sm:$0xff]  ;;  %v929_v60 = vld [vmem:[#allocation10 + $0x98] sm:$0xff] }
  0x9a   :  { %4421 = vmatpush1.bf16.msra.mxu0 %v4420_v63 }
  0x9b   :  { %4455 = vmatprep.subr.bf16.mxu0 %v4454_v5  ;;  %v311_v5 = vld [vmem:[#allocation9 + $0x2b8] sm:$0xff] }
 0x150   :  { %v6205_v18 = vpop.f32.mrb[0].mxu0 }
 0x151   :  { %v6207_v22 = vpop.f32.mrb[1].mxu0 }
 0x152   :  { %459 = vmatmul.mubr.f32.vlgmr.msra.gmra.mrb[0].mxu1 %v6207_v22  ;;  %572 = vmatmul.mubr.f32.vlgmr.msra.gmra.mrb[8].mxu0 %v6207_v22 }
 0x153   :  { %4425 = vmatpush1.bf16.msra.mxu1 %v4424_v15  ;;  %4457 = vmatpush1.bf16.msra.mxu0 %v4456_v16  ;;  %v4474_v15 = vpack.c.bf16 %v319_v7, %v311_v5  ;;  %v325_v16 = vld [vmem:[#allocation9 + $0x328] sm:$0xff]  ;;  %v936_v5 = vld [vmem:[#allocation10 + $0xd0] sm:$0xff] }
 0x154   :  { %464 = vmatprep.mubr.f32.mxu1 %v7278_v6  ;;  %577 = vmatprep.mubr.f32.mxu0 %v7278_v6  ;;  %v6213_v32 = vpop.f32.mrb[2].mxu0  ;;  %v4446_v28 = vpack.c.bf16 %v333_v17, %v325_v16  ;;  %v950_v16 = vld [vmem:[#allocation10 + $0x140] sm:$0xff]  ;;  %v944_v17 = vld [vmem:[#allocation10 + $0x110] sm:$0xff] }
 0x155   :  { %4427 = vmatprep.subr.bf16.mxu1 %v4426_v23  ;;  %4459 = vmatprep.subr.bf16.mxu0 %v4458_v24  ;;  %v6215_v36 = vpop.f32.mrb[3].mxu0  ;;  %v4476_v23 = vpack.c.bf16 %v318_v13, %v310_v12  ;;  %v324_v24 = vld [vmem:[#allocation9 + $0x320] sm:$0xff]  ;;  %v953_v12 = vld [vmem:[#allocation10 + $0x158] sm:$0xff] }
 0x156   :  { %465 = vmatmul.mubr.f32.gmra.mrb[2].mxu1 %v6205_v18  ;;  %578 = vmatmul.mubr.f32.gmra.mrb[10].mxu0 %v6205_v18  ;;  %v4448_v35 = vpack.c.bf16 %v332_v25, %v324_v24  ;;  %v961_v24 = vld [vmem:[#allocation10 + $0x198] sm:$0xff] }
 0x157   :  { %4429 = vmatpush1.bf16.msra.mxu1 %v4428_v29  ;;  %4461 = vmatpush1.bf16.msra.mxu0 %v4460_v30  ;;  %v4478_v29 = vpack.c.bf16 %v335_v20, %v327_v19  ;;  %v341_v30 = vld [vmem:[#allocation9 + $0x3a8] sm:$0xff]  ;;  %v952_v19 = vld [vmem:[#allocation10 + $0x150] sm:$0xff]  ;;  %v6281_v20 = vpack.c.bf16 %v953_v12, %v945_v11  ;;  %v969_v25 = vld [vmem:[#allocation10 + $0x1d8] sm:$0xff] }
 0x158   :  { %470 = vmatprep.mubr.f32.mxu1 %v7278_v6  ;;  %583 = vmatprep.mubr.f32.mxu0 %v7278_v6  ;;  %v6221_v49 = vpop.f32.mrb[4].mxu0  ;;  %v4450_v42 = vpack.c.bf16 %v349_v31, %v341_v30  ;;  %v960_v30 = vld [vmem:[#allocation10 + $0x190] sm:$0xff]  ;;  %v1014_v11 = vld [vmem:[#allocation10 + $0x340] sm:$0xff] }
 0x159   :  { %4431 = vmatprep.subr.bf16.mxu1 %v4430_v37  ;;  %4463 = vmatprep.subr.bf16.mxu0 %v4462_v38  ;;  %v6223_v52 = vpop.f32.mrb[5].mxu0  ;;  %v4480_v37 = vpack.c.bf16 %v334_v27, %v326_v26  ;;  %v340_v38 = vld [vmem:[#allocation9 + $0x3a0] sm:$0xff]  ;;  %7376 = vst [vmem:[#allocation19_spill] sm:$0xff] %v6281_v20  ;;  %v6289_v27 = vpack.c.bf16 %v952_v19, %v944_v17  ;;  %v968_v31 = vld [vmem:[#allocation10 + $0x1d0] sm:$0xff]  ;;  %v1023_v17 = vld [vmem:[#allocation10 + $0x388] sm:$0xff] }
 0x15a   :  { %471 = vmatmul.mubr.f32.gmra.mrb[4].mxu1 %v6215_v36  ;;  %584 = vmatmul.mubr.f32.gmra.mrb[12].mxu0 %v6215_v36  ;;  %v4452_v48 = vpack.c.bf16 %v348_v39, %v340_v38  ;;  %v985_v38 = vld [vmem:[#allocation10 + $0x258] sm:$0xff]  ;;  %v1008_v12 = vld [vmem:[#allocation10 + $0x310] sm:$0xff]  ;;  %v1031_v19 = vld [vmem:[#allocation10 + $0x3c8] sm:$0xff] }
 0x15b   :  { %4433 = vmatpush1.bf16.msra.mxu1 %v4432_v43  ;;  %4465 = vmatpush1.bf16.msra.mxu0 %v4464_v44  ;;  %v4482_v43 = vpack.c.bf16 %v351_v34, %v343_v33  ;;  %v911_v44 = vld [vmem:[#allocation10 + $0x8] sm:$0xff]  ;;  %7378 = vst [vmem:[#allocation21_spill] sm:$0xff] %v6289_v27  ;;  %v6297_v33 = vpack.c.bf16 %v969_v25, %v961_v24 }
 0x15c   :  { %476 = vmatprep.mubr.f32.mxu1 %v7278_v6  ;;  %589 = vmatprep.mubr.f32.mxu0 %v7278_v6  ;;  %v6229_v63 = vpop.f32.mrb[6].mxu0  ;;  %v6249_v56 = vpack.c.bf16 %v919_v45, %v911_v44  ;;  %v975_v34 = vld [vmem:[#allocation10 + $0x208] sm:$0xff]  ;;  %v984_v44 = vld [vmem:[#allocation10 + $0x250] sm:$0xff] }
 0x15d   :  { %4435 = vmatprep.subr.bf16.mxu1 %v4434_v50  ;;  %4467 = vmatprep.subr.bf16.mxu0 %v4466_v51  ;;  %v6231_v3 = vpop.f32.mrb[7].mxu0  ;;  %v4484_v50 = vpack.c.bf16 %v350_v41, %v342_v40  ;;  %v910_v51 = vld [vmem:[#allocation10] sm:$0xff]  ;;  %7380 = vst [vmem:[#allocation23_spill] sm:$0xff] %v6297_v33  ;;  %v6305_v40 = vpack.c.bf16 %v968_v31, %v960_v30  ;;  %v1024_v30 = vld [vmem:[#allocation10 + $0x390] sm:$0xff] }
 0x15e   :  { %477 = vmatmul.mubr.f32.gmra.mrb[6].mxu1 %v6213_v32  ;;  %590 = vmatmul.mubr.f32.gmra.mrb[14].mxu0 %v6213_v32  ;;  %v6255_v62 = vpack.c.bf16 %v918_v53, %v910_v51  ;;  %v974_v41 = vld [vmem:[#allocation10 + $0x200] sm:$0xff]  ;;  %v1032_v31 = vld [vmem:[#allocation10 + $0x3d0] sm:$0xff] }
 0x15f   :  { %4437 = vmatpush1.bf16.msra.mxu1 %v4436_v57  ;;  %4469 = vmatpush1.bf16.msra.mxu0 %v4468_v58  ;;  %v6251_v57 = vpack.c.bf16 %v921_v47, %v913_v46  ;;  %v927_v58 = vld [vmem:[#allocation10 + $0x88] sm:$0xff]  ;;  %7382 = vst [vmem:[#allocation25_spill] sm:$0xff] %v6305_v40 }
 0x160   :  { %482 = vmatprep.mubr.f32.mxu1 %v7278_v6  ;;  %595 = vmatprep.mubr.f32.mxu0 %v7278_v6  ;;  %v6263_v7 = vpack.c.bf16 %v935_v59, %v927_v58  ;;  %v991_v46 = vld [vmem:[#allocation10 + $0x288] sm:$0xff]  ;;  %v992_v58 = vld [vmem:[#allocation10 + $0x290] sm:$0xff] }
 0x161   :  { %4439 = vmatprep.subr.bf16.mxu1 %v4438_v0  ;;  %4471 = vmatprep.subr.bf16.mxu0 %v4470_v1  ;;  %v6257_v0 = vpack.c.bf16 %v920_v55, %v912_v54  ;;  %v926_v1 = vld [vmem:[#allocation10 + $0x80] sm:$0xff]  ;;  %v999_v47 = vld [vmem:[#allocation10 + $0x2c8] sm:$0xff]  ;;  %v1000_v59 = vld [vmem:[#allocation10 + $0x2d0] sm:$0xff] }
 0x162   :  { %483 = vmatmul.mubr.f32.gmra.mrb[8].mxu1 %v6223_v52  ;;  %596 = vmatmul.mubr.f32.gmra.mrb[16].mxu0 %v6223_v52  ;;  %v6271_v13 = vpack.c.bf16 %v934_v2, %v926_v1  ;;  %v990_v54 = vld [vmem:[#allocation10 + $0x280] sm:$0xff]  ;;  %v1015_v1 = vld [vmem:[#allocation10 + $0x348] sm:$0xff]  ;;  %v1009_v2 = vld [vmem:[#allocation10 + $0x318] sm:$0xff] }
 0x163   :  { %4441 = vmatpush1.bf16.msra.mxu1 %v4440_v8  ;;  %4473 = vmatpush1.bf16.msra.mxu0 %v4472_v9  ;;  %v6265_v8 = vpack.c.bf16 %v937_v61, %v929_v60  ;;  %v943_v9 = vld [vmem:[#allocation10 + $0x108] sm:$0xff]  ;;  %v998_v55 = vld [vmem:[#allocation10 + $0x2c0] sm:$0xff] }
 0x164   :  { %488 = vmatprep.mubr.f32.mxu1 %v7278_v6  ;;  %601 = vmatprep.mubr.f32.mxu0 %v7278_v6  ;;  %v1007_v61 = vld [vmem:[#allocation10 + $0x308] sm:$0xff] }
 0x165   :  { %4443 = vmatprep.subr.bf16.mxu1 %v4442_v14  ;;  %4475 = vmatprep.subr.bf16.mxu0 %v4474_v15  ;;  %v6273_v14 = vpack.c.bf16 %v936_v5, %v928_v4  ;;  %v942_v15 = vld [vmem:[#allocation10 + $0x100] sm:$0xff]  ;;  %v1017_v4 = vld [vmem:[#allocation10 + $0x358] sm:$0xff]  ;;  %v6335_v5 = vpack.c.bf16 %v998_v55, %v990_v54  ;;  %v939_v55 = vld [vmem:[#allocation10 + $0xe8] sm:$0xff] }
 0x166   :  { %489 = vmatmul.mubr.f32.gmra.mrb[10].mxu1 %v6221_v49  ;;  %602 = vmatmul.mubr.f32.gmra.mrb[18].mxu0 %v6221_v49  ;;  %v6287_v26 = vpack.c.bf16 %v950_v16, %v942_v15  ;;  %v1016_v15 = vld [vmem:[#allocation10 + $0x350] sm:$0xff]  ;;  %v6345_v16 = vpack.c.bf16 %v1017_v4, %v1009_v2  ;;  %v930_v2 = vld [vmem:[#allocation10 + $0xa0] sm:$0xff] }
 0x167   :  { %4445 = vmatpush1.bf16.msra.mxu1 %v4444_v21  ;;  %4477 = vmatpush1.bf16.msra.mxu0 %v4476_v23  ;;  %v959_v21 = vld [vmem:[#allocation10 + $0x188] sm:$0xff]  ;;  %7389 = vst [vmem:[#allocation32_spill] sm:$0xff] %v6335_v5  ;;  %v6353_v25 = vpack.c.bf16 %v1016_v15, %v1008_v12  ;;  %v938_v4 = vld [vmem:[#allocation10 + $0xe0] sm:$0xff]  ;;  %v932_v12 = vld [vmem:[#allocation10 + $0xb0] sm:$0xff] }
 0x168   :  { %494 = vmatprep.mubr.f32.mxu1 %v7278_v6  ;;  %607 = vmatprep.mubr.f32.mxu0 %v7278_v6  ;;  %v967_v23 = vld [vmem:[#allocation10 + $0x1c8] sm:$0xff]  ;;  %7377 = vst [vmem:[#allocation20_spill] sm:$0xff] %v6287_v26  ;;  %7392 = vst [vmem:[#allocation35_spill] sm:$0xff] %v6345_v16 }
 0x169   :  { %4447 = vmatprep.subr.bf16.mxu1 %v4446_v28  ;;  %4479 = vmatprep.subr.bf16.mxu0 %v4478_v29  ;;  %v958_v28 = vld [vmem:[#allocation10 + $0x180] sm:$0xff]  ;;  %7394 = vst [vmem:[#allocation37_spill] sm:$0xff] %v6353_v25  ;;  %v947_v15 = vld [vmem:[#allocation10 + $0x128] sm:$0xff] }
 0x16a   :  { %495 = vmatmul.mubr.f32.gmra.mrb[12].mxu1 %v6231_v3  ;;  %608 = vmatmul.mubr.f32.gmra.mrb[20].mxu0 %v6231_v3  ;;  %v966_v29 = vld [vmem:[#allocation10 + $0x1c0] sm:$0xff] }
 0x16b   :  { %4449 = vmatpush1.bf16.msra.mxu1 %v4448_v35  ;;  %4481 = vmatpush1.bf16.msra.mxu0 %v4480_v37  ;;  %v983_v35 = vld [vmem:[#allocation10 + $0x248] sm:$0xff]  ;;  %v977_v37 = vld [vmem:[#allocation10 + $0x218] sm:$0xff]  ;;  %v6303_v39 = vpack.c.bf16 %v966_v29, %v958_v28  ;;  %v1022_v28 = vld [vmem:[#allocation10 + $0x380] sm:$0xff] }
 0x16c   :  { %500 = vmatprep.mubr.f32.mxu1 %v7278_v6  ;;  %613 = vmatprep.mubr.f32.mxu0 %v7278_v6  ;;  %v6313_v45 = vpack.c.bf16 %v985_v38, %v977_v37  ;;  %v1030_v29 = vld [vmem:[#allocation10 + $0x3c0] sm:$0xff]  ;;  %v923_v37 = vld [vmem:[#allocation10 + $0x68] sm:$0xff]  ;;  %v917_v38 = vld [vmem:[#allocation10 + $0x38] sm:$0xff] }
 0x16d   :  { %4451 = vmatprep.subr.bf16.mxu1 %v4450_v42  ;;  %4483 = vmatprep.subr.bf16.mxu0 %v4482_v43  ;;  %7381 = vst [vmem:[#allocation24_spill] sm:$0xff] %v6303_v39  ;;  %v982_v42 = vld [vmem:[#allocation10 + $0x240] sm:$0xff]  ;;  %v976_v43 = vld [vmem:[#allocation10 + $0x210] sm:$0xff] }
 0x16e   :  { %501 = vmatmul.mubr.f32.gmra.mrb[14].mxu1 %v6229_v63  ;;  %614 = vmatmul.mubr.f32.gmra.mrb[22].mxu0 %v6229_v63  ;;  %7384 = vst [vmem:[#allocation27_spill] sm:$0xff] %v6313_v45  ;;  %v6319_v51 = vpack.c.bf16 %v982_v42, %v974_v41  ;;  %v6321_v53 = vpack.c.bf16 %v984_v44, %v976_v43  ;;  %v925_v41 = vld [vmem:[#allocation10 + $0x78] sm:$0xff]  ;;  %v914_v44 = vld [vmem:[#allocation10 + $0x20] sm:$0xff] }
 0x16f   :  { %4453 = vmatpush1.bf16.msra.mxu1 %v4452_v48  ;;  %4485 = vmatpush1.bf16.msra.mxu0 %v4484_v50  ;;  %v993_v48 = vld [vmem:[#allocation10 + $0x298] sm:$0xff]  ;;  %v6367_v42 = vpack.c.bf16 %v1030_v29, %v1022_v28  ;;  %v6369_v43 = vpack.c.bf16 %v1032_v31, %v1024_v30  ;;  %v6377_v54 = vpack.c.bf16 %v925_v41, %v917_v38  ;;  %v946_v29 = vld [vmem:[#allocation10 + $0x120] sm:$0xff]  ;;  %v956_v38 = vld [vmem:[#allocation10 + $0x170] sm:$0xff] }
 0x170   :  { %684 = vmatprep.mubr.f32.mxu1 %v7278_v6  ;;  %797 = vmatprep.mubr.f32.mxu0 %v7278_v6  ;;  %v1001_v50 = vld [vmem:[#allocation10 + $0x2d8] sm:$0xff]  ;;  %7385 = vst [vmem:[#allocation28_spill] sm:$0xff] %v6319_v51  ;;  %7386 = vst [vmem:[#allocation29_spill] sm:$0xff] %v6321_v53  ;;  %v954_v30 = vld [vmem:[#allocation10 + $0x160] sm:$0xff] }
 0x171   :  { %4487 = vmatprep.subr.bf16.mxu1 %v6249_v56  ;;  %4519 = vmatprep.subr.bf16.mxu0 %v6251_v57  ;;  %v6329_v60 = vpack.c.bf16 %v1001_v50, %v993_v48  ;;  %7397 = vst [vmem:[#allocation40_spill] sm:$0xff] %v6367_v42  ;;  %7398 = vst [vmem:[#allocation41_spill] sm:$0xff] %v6369_v43  ;;  %v924_v48 = vld [vmem:[#allocation10 + $0x70] sm:$0xff]  ;;  %v963_v41 = vld [vmem:[#allocation10 + $0x1a8] sm:$0xff] }
 0x172   :  { %685 = vmatmul.mubr.f32.vlgmr.msra.gmra.mrb[16].mxu1 %v6207_v22  ;;  %798 = vmatmul.mubr.f32.vlgmr.msra.gmra.mrb[24].mxu0 %v6207_v22  ;;  %v6279_v22 = vpack.c.bf16 %v951_v10, %v943_v9  ;;  %v6337_v9 = vpack.c.bf16 %v1000_v59, %v992_v58  ;;  %v1006_v10 = vld [vmem:[#allocation10 + $0x300] sm:$0xff]  ;;  %7400 = vst [vmem:[#allocation43_spill] sm:$0xff] %v6377_v54  ;;  %v933_v58 = vld [vmem:[#allocation10 + $0xb8] sm:$0xff] }
 0x173   :  { %4489 = vmatpush1.bf16.msra.mxu1 %v6255_v62  ;;  %4521 = vmatpush1.bf16.msra.mxu0 %v6257_v0  ;;  %7388 = vst [vmem:[#allocation31_spill] sm:$0xff] %v6329_v60  ;;  %v6351_v24 = vpack.c.bf16 %v1014_v11, %v1006_v10  ;;  %v941_v59 = vld [vmem:[#allocation10 + $0xf8] sm:$0xff] }
 0x174   :  { %690 = vmatprep.mubr.f32.mxu1 %v7278_v6  ;;  %803 = vmatprep.mubr.f32.mxu0 %v7278_v6  ;;  %7375 = vst [vmem:[#allocation18_spill] sm:$0xff] %v6279_v22  ;;  %7390 = vst [vmem:[#allocation33_spill] sm:$0xff] %v6337_v9  ;;  %v6391_v11 = vpack.c.bf16 %v941_v59, %v933_v58  ;;  %v970_v58 = vld [vmem:[#allocation10 + $0x1e0] sm:$0xff] }
 0x175   :  { %4491 = vmatprep.subr.bf16.mxu1 %v6263_v7  ;;  %4523 = vmatprep.subr.bf16.mxu0 %v6265_v8  ;;  %7393 = vst [vmem:[#allocation36_spill] sm:$0xff] %v6351_v24 }
 0x176   :  { %691 = vmatmul.mubr.f32.gmra.mrb[18].mxu1 %v6205_v18  ;;  %804 = vmatmul.mubr.f32.gmra.mrb[26].mxu0 %v6205_v18  ;;  %v6295_v18 = vpack.c.bf16 %v967_v23, %v959_v21  ;;  %v1025_v21 = vld [vmem:[#allocation10 + $0x398] sm:$0xff] }
 0x177   :  { %4493 = vmatpush1.bf16.msra.mxu1 %v6271_v13  ;;  %4525 = vmatpush1.bf16.msra.mxu0 %v6273_v14  ;;  %v1033_v23 = vld [vmem:[#allocation10 + $0x3d8] sm:$0xff] }
 0x178   :  { %696 = vmatprep.mubr.f32.mxu1 %v7278_v6  ;;  %809 = vmatprep.mubr.f32.mxu0 %v7278_v6  ;;  %7379 = vst [vmem:[#allocation22_spill] sm:$0xff] %v6295_v18 }
 0x179   :  { %4495 = vmatprep.subr.bf16.mxu1 %v6279_v22  ;;  %4527 = vmatprep.subr.bf16.mxu0 %v6281_v20 }
 0x17a   :  { %697 = vmatmul.mubr.f32.gmra.mrb[20].mxu1 %v6215_v36  ;;  %810 = vmatmul.mubr.f32.gmra.mrb[28].mxu0 %v6215_v36  ;;  %v6311_v36 = vpack.c.bf16 %v983_v35, %v975_v34  ;;  %v6361_v34 = vpack.c.bf16 %v1033_v23, %v1025_v21  ;;  %v915_v35 = vld [vmem:[#allocation10 + $0x28] sm:$0xff]  ;;  %v957_v21 = vld [vmem:[#allocation10 + $0x178] sm:$0xff]  ;;  %v6399_v23 = vpack.c.bf16 %v938_v4, %v930_v2  ;;  %v964_v4 = vld [vmem:[#allocation10 + $0x1b0] sm:$0xff] }
 0x17b   :  { %4497 = vmatpush1.bf16.msra.mxu1 %v6287_v26  ;;  %4529 = vmatpush1.bf16.msra.mxu0 %v6289_v27  ;;  %v6375_v50 = vpack.c.bf16 %v923_v37, %v915_v35  ;;  %v948_v37 = vld [vmem:[#allocation10 + $0x130] sm:$0xff] }
 0x17c   :  { %702 = vmatprep.mubr.f32.mxu1 %v7278_v6  ;;  %815 = vmatprep.mubr.f32.mxu0 %v7278_v6  ;;  %7383 = vst [vmem:[#allocation26_spill] sm:$0xff] %v6311_v36  ;;  %7396 = vst [vmem:[#allocation39_spill] sm:$0xff] %v6361_v34 }
 0x17d   :  { %4499 = vmatprep.subr.bf16.mxu1 %v6295_v18  ;;  %4531 = vmatprep.subr.bf16.mxu0 %v6297_v33  ;;  %7399 = vst [vmem:[#allocation42_spill] sm:$0xff] %v6375_v50 }
 0x17e   :  { %703 = vmatmul.mubr.f32.gmra.mrb[22].mxu1 %v6213_v32  ;;  %816 = vmatmul.mubr.f32.gmra.mrb[30].mxu0 %v6213_v32  ;;  %v6327_v32 = vpack.c.bf16 %v999_v47, %v991_v46  ;;  %v922_v46 = vld [vmem:[#allocation10 + $0x60] sm:$0xff]  ;;  %v916_v47 = vld [vmem:[#allocation10 + $0x30] sm:$0xff] }
 0x17f   :  { %4501 = vmatpush1.bf16.msra.mxu1 %v6303_v39  ;;  %4533 = vmatpush1.bf16.msra.mxu0 %v6305_v40 }
 0x180   :  { %708 = vmatprep.mubr.f32.mxu1 %v7278_v6  ;;  %821 = vmatprep.mubr.f32.mxu0 %v7278_v6  ;;  %7387 = vst [vmem:[#allocation30_spill] sm:$0xff] %v6327_v32 }
 0x181   :  { %4503 = vmatprep.subr.bf16.mxu1 %v6311_v36  ;;  %4535 = vmatprep.subr.bf16.mxu0 %v6313_v45 }
 0x182   :  { %709 = vmatmul.mubr.f32.gmra.mrb[24].mxu1 %v6223_v52  ;;  %822 = vmatmul.mubr.f32.gmra.mrb[32].mxu0 %v6223_v52  ;;  %v6343_v52 = vpack.c.bf16 %v1015_v1, %v1007_v61  ;;  %v6383_v61 = vpack.c.bf16 %v922_v46, %v914_v44  ;;  %v6385_v1 = vpack.c.bf16 %v924_v48, %v916_v47  ;;  %v971_v44 = vld [vmem:[#allocation10 + $0x1e8] sm:$0xff]  ;;  %v965_v46 = vld [vmem:[#allocation10 + $0x1b8] sm:$0xff] }
 0x183   :  { %4505 = vmatpush1.bf16.msra.mxu1 %v6319_v51  ;;  %4537 = vmatpush1.bf16.msra.mxu0 %v6321_v53  ;;  %v973_v47 = vld [vmem:[#allocation10 + $0x1f8] sm:$0xff]  ;;  %v6415_v48 = vpack.c.bf16 %v954_v30, %v946_v29  ;;  %v6421_v59 = vpack.c.bf16 %v971_v44, %v963_v41  ;;  %v978_v30 = vld [vmem:[#allocation10 + $0x220] sm:$0xff]  ;;  %v980_v44 = vld [vmem:[#allocation10 + $0x230] sm:$0xff] }
 0x184   :  { %714 = vmatprep.mubr.f32.mxu1 %v7278_v6  ;;  %827 = vmatprep.mubr.f32.mxu0 %v7278_v6  ;;  %7391 = vst [vmem:[#allocation34_spill] sm:$0xff] %v6343_v52  ;;  %v6423_v2 = vpack.c.bf16 %v973_v47, %v965_v46  ;;  %v988_v46 = vld [vmem:[#allocation10 + $0x270] sm:$0xff]  ;;  %v995_v47 = vld [vmem:[#allocation10 + $0x2a8] sm:$0xff] }
 0x185   :  { %4507 = vmatprep.subr.bf16.mxu1 %v6327_v32  ;;  %4539 = vmatprep.subr.bf16.mxu0 %v6329_v60  ;;  %7401 = vst [vmem:[#allocation44_spill] sm:$0xff] %v6415_v48  ;;  %7403 = vst [vmem:[#allocation46_spill] sm:$0xff] %v6421_v59 }
 0x186   :  { %715 = vmatmul.mubr.f32.gmra.mrb[26].mxu1 %v6221_v49  ;;  %828 = vmatmul.mubr.f32.gmra.mrb[34].mxu0 %v6221_v49  ;;  %v6359_v49 = vpack.c.bf16 %v1031_v19, %v1023_v17  ;;  %v955_v17 = vld [vmem:[#allocation10 + $0x168] sm:$0xff]  ;;  %v949_v19 = vld [vmem:[#allocation10 + $0x138] sm:$0xff]  ;;  %7404 = vst [vmem:[#allocation47_spill] sm:$0xff] %v6423_v2 }
 0x187   :  { %4509 = vmatpush1.bf16.msra.mxu1 %v6335_v5  ;;  %4541 = vmatpush1.bf16.msra.mxu0 %v6337_v9  ;;  %v6405_v31 = vpack.c.bf16 %v955_v17, %v947_v15  ;;  %v6407_v35 = vpack.c.bf16 %v957_v21, %v949_v19  ;;  %v987_v15 = vld [vmem:[#allocation10 + $0x268] sm:$0xff]  ;;  %v981_v17 = vld [vmem:[#allocation10 + $0x238] sm:$0xff] }
 0x188   :  { %720 = vmatprep.mubr.f32.mxu1 %v7278_v6  ;;  %833 = vmatprep.mubr.f32.mxu0 %v7278_v6  ;;  %7395 = vst [vmem:[#allocation38_spill] sm:$0xff] %v6359_v49  ;;  %v989_v19 = vld [vmem:[#allocation10 + $0x278] sm:$0xff] }
 0x189   :  { %4511 = vmatprep.subr.bf16.mxu1 %v6343_v52  ;;  %4543 = vmatprep.subr.bf16.mxu0 %v6345_v16  ;;  %v6437_v41 = vpack.c.bf16 %v989_v19, %v981_v17  ;;  %v996_v17 = vld [vmem:[#allocation10 + $0x2b0] sm:$0xff] }
 0x18a   :  { %721 = vmatmul.mubr.f32.gmra.mrb[28].mxu1 %v6231_v3  ;;  %834 = vmatmul.mubr.f32.gmra.mrb[36].mxu0 %v6231_v3  ;;  %v931_v3 = vld [vmem:[#allocation10 + $0xa8] sm:$0xff]  ;;  %v1004_v19 = vld [vmem:[#allocation10 + $0x2f0] sm:$0xff] }
 0x18b   :  { %4513 = vmatpush1.bf16.msra.mxu1 %v6351_v24  ;;  %4545 = vmatpush1.bf16.msra.mxu0 %v6353_v25  ;;  %v6389_v10 = vpack.c.bf16 %v939_v55, %v931_v3  ;;  %v6417_v3 = vpack.c.bf16 %v956_v38, %v948_v37  ;;  %v962_v55 = vld [vmem:[#allocation10 + $0x1a0] sm:$0xff]  ;;  %7408 = vst [vmem:[#allocation51_spill] sm:$0xff] %v6437_v41 }
 0x18c   :  { %726 = vmatprep.mubr.f32.mxu1 %v7278_v6  ;;  %839 = vmatprep.mubr.f32.mxu0 %v7278_v6  ;;  %v6429_v21 = vpack.c.bf16 %v970_v58, %v962_v55  ;;  %v986_v37 = vld [vmem:[#allocation10 + $0x260] sm:$0xff]  ;;  %v6443_v58 = vpack.c.bf16 %v988_v46, %v980_v44 }
 0x18d   :  { %4515 = vmatprep.subr.bf16.mxu1 %v6359_v49  ;;  %4547 = vmatprep.subr.bf16.mxu0 %v6361_v34  ;;  %7402 = vst [vmem:[#allocation45_spill] sm:$0xff] %v6417_v3  ;;  %v6441_v55 = vpack.c.bf16 %v986_v37, %v978_v30  ;;  %v6455_v37 = vpack.c.bf16 %v1004_v19, %v996_v17  ;;  %v1010_v44 = vld [vmem:[#allocation10 + $0x320] sm:$0xff]  ;;  %v1036_v19 = vld [vmem:[#allocation10 + $0x3f0] sm:$0xff] }
 0x18e   :  { %727 = vmatmul.mubr.f32.gmra.mrb[30].mxu1 %v6229_v63  ;;  %840 = vmatmul.mubr.f32.gmra.mrb[38].mxu0 %v6229_v63  ;;  %v940_v63 = vld [vmem:[#allocation10 + $0xf0] sm:$0xff]  ;;  %7405 = vst [vmem:[#allocation48_spill] sm:$0xff] %v6429_v21  ;;  %7410 = vst [vmem:[#allocation53_spill] sm:$0xff] %v6443_v58  ;;  %v1018_v46 = vld [vmem:[#allocation10 + $0x360] sm:$0xff] }
 0x18f   :  { %4517 = vmatpush1.bf16.msra.mxu1 %v6367_v42  ;;  %4549 = vmatpush1.bf16.msra.mxu0 %v6369_v43  ;;  %v6401_v28 = vpack.c.bf16 %v940_v63, %v932_v12  ;;  %v972_v12 = vld [vmem:[#allocation10 + $0x1f0] sm:$0xff]  ;;  %v979_v63 = vld [vmem:[#allocation10 + $0x228] sm:$0xff]  ;;  %7409 = vst [vmem:[#allocation52_spill] sm:$0xff] %v6441_v55  ;;  %v1026_v17 = vld [vmem:[#allocation10 + $0x3a0] sm:$0xff] }
 0x190   :  { %1102 = vmatprep.mubr.f32.mxu1 %v7278_v6  ;;  %1177 = vmatprep.mubr.f32.mxu0 %v7278_v6  ;;  %v6431_v29 = vpack.c.bf16 %v972_v12, %v964_v4  ;;  %v6435_v38 = vpack.c.bf16 %v987_v15, %v979_v63  ;;  %v994_v4 = vld [vmem:[#allocation10 + $0x2a0] sm:$0xff] }
 0x191   :  { %4551 = vmatprep.subr.bf16.mxu1 %v6375_v50  ;;  %4583 = vmatprep.subr.bf16.mxu0 %v6377_v54  ;;  %v1002_v12 = vld [vmem:[#allocation10 + $0x2e0] sm:$0xff] }
 0x192   :  { %1103 = vmatmul.mubr.f32.vlgmr.msra.gmra.mrb[0].mxu1 %v7278_v6  ;;  %1178 = vmatmul.mubr.f32.vlgmr.msra.gmra.mrb[8].mxu0 %v7278_v6  ;;  %7406 = vst [vmem:[#allocation49_spill] sm:$0xff] %v6431_v29  ;;  %7407 = vst [vmem:[#allocation50_spill] sm:$0xff] %v6435_v38  ;;  %v6453_v30 = vpack.c.bf16 %v1002_v12, %v994_v4  ;;  %v6465_v4 = vpack.c.bf16 %v1018_v46, %v1010_v44 }
 0x193   :  { %4553 = vmatpush1.bf16.msra.mxu1 %v6383_v61  ;;  %4585 = vmatpush1.bf16.msra.mxu0 %v6385_v1 }
 0x194   :  { %4555 = vmatprep.subr.bf16.mxu1 %v6389_v10  ;;  %4587 = vmatprep.subr.bf16.mxu0 %v6391_v11 }
 0x195   :  { %1108 = vmatprep.mubr.f32.mxu1 %v7278_v6  ;;  %1183 = vmatprep.mubr.f32.mxu0 %v7278_v6 }
 0x196   :  { %1109 = vmatmul.mubr.f32.gmra.mrb[32].mxu1 %v7278_v6  ;;  %1184 = vmatmul.mubr.f32.gmra.mrb[40].mxu0 %v7278_v6 }
 0x197   :  { %4557 = vmatpush1.bf16.msra.mxu1 %v6399_v23  ;;  %4589 = vmatpush1.bf16.msra.mxu0 %v6401_v28 }
 0x198   :  { %4559 = vmatprep.subr.bf16.mxu1 %v6405_v31  ;;  %4591 = vmatprep.subr.bf16.mxu0 %v6407_v35 }
 0x199   :  { %1252 = vmatprep.mubr.f32.mxu1 %v7278_v6  ;;  %1327 = vmatprep.mubr.f32.mxu0 %v7278_v6  ;;  %v1003_v6 = vld [vmem:[#allocation10 + $0x2e8] sm:$0xff] }
 0x19a   :  { %v6447_v63 = vpack.c.bf16 %v1003_v6, %v995_v47  ;;  %v1020_v47 = vld [vmem:[#allocation10 + $0x370] sm:$0xff] }
 0x19b   :  { %4561 = vmatpush1.bf16.msra.mxu1 %v6415_v48  ;;  %4593 = vmatpush1.bf16.msra.mxu0 %v6417_v3  ;;  %v997_v48 = vld [vmem:[#allocation10 + $0x2b8] sm:$0xff] }
 0x19c   :  { %4563 = vmatprep.subr.bf16.mxu1 %v6421_v59  ;;  %4595 = vmatprep.subr.bf16.mxu0 %v6423_v2  ;;  %v1005_v3 = vld [vmem:[#allocation10 + $0x2f8] sm:$0xff]  ;;  %v1011_v2 = vld [vmem:[#allocation10 + $0x328] sm:$0xff] }
 0x19d   :  { %v6449_v15 = vpack.c.bf16 %v1005_v3, %v997_v48  ;;  %v1013_v59 = vld [vmem:[#allocation10 + $0x338] sm:$0xff]  ;;  %v1012_v3 = vld [vmem:[#allocation10 + $0x330] sm:$0xff] }
 0x19e   :  { %v6467_v12 = vpack.c.bf16 %v1020_v47, %v1012_v3  ;;  %v6533_v3 = vld [vmem:[%s7273_s3] sm:$0xff] }
 0x19f   :  { %4565 = vmatpush1.bf16.msra.mxu1 %v6429_v21  ;;  %4597 = vmatpush1.bf16.msra.mxu0 %v6431_v29  ;;  %v1019_v21 = vld [vmem:[#allocation10 + $0x368] sm:$0xff]  ;;  %v1021_v29 = vld [vmem:[#allocation10 + $0x378] sm:$0xff] }
 0x1a0   :  { %4567 = vmatprep.subr.bf16.mxu1 %v6435_v38  ;;  %4599 = vmatprep.subr.bf16.mxu0 %v6437_v41  ;;  %v6459_v6 = vpack.c.bf16 %v1019_v21, %v1011_v2  ;;  %v6461_v48 = vpack.c.bf16 %v1021_v29, %v1013_v59  ;;  %v1027_v41 = vld [vmem:[#allocation10 + $0x3a8] sm:$0xff]  ;;  %v1029_v38 = vld [vmem:[#allocation10 + $0x3b8] sm:$0xff]  ;;  %v1034_v21 = vld [vmem:[#allocation10 + $0x3e0] sm:$0xff] }
 0x1a1   :  { %v1028_v29 = vld [vmem:[#allocation10 + $0x3b0] sm:$0xff]  ;;  %v6477_v44 = vpack.c.bf16 %v1034_v21, %v1026_v17 }
 0x1a2   :  { %v6479_v46 = vpack.c.bf16 %v1036_v19, %v1028_v29 }
 0x1a3   :  { %4569 = vmatpush1.bf16.msra.mxu1 %v6441_v55  ;;  %4601 = vmatpush1.bf16.msra.mxu0 %v6443_v58  ;;  %v1035_v55 = vld [vmem:[#allocation10 + $0x3e8] sm:$0xff]  ;;  %v1037_v58 = vld [vmem:[#allocation10 + $0x3f8] sm:$0xff] }
 0x1a4   :  { %4571 = vmatprep.subr.bf16.mxu1 %v6447_v63  ;;  %4603 = vmatprep.subr.bf16.mxu0 %v6449_v15  ;;  %v6471_v59 = vpack.c.bf16 %v1035_v55, %v1027_v41  ;;  %v6473_v2 = vpack.c.bf16 %v1037_v58, %v1029_v38  ;;  %v7411_v38 = vmov 0.0   ;;  %v354_v41 = vlaneseq }
 0x1a6   :  { %v6527_v55 = vshrl.u32 %v354_v41, 7 }
 0x1a7   :  { %4573 = vmatpush1.bf16.msra.mxu1 %v6453_v30  ;;  %4605 = vmatpush1.bf16.msra.mxu0 %v6455_v37 }
 0x1a8   :  { %4575 = vmatprep.subr.bf16.mxu1 %v6459_v6  ;;  %4607 = vmatprep.subr.bf16.mxu0 %v6461_v48  ;;  %v356_v58 = vsub.s32 0, %v6527_v55  ;;  %v360_v47 = vsub.s32 1, %v6527_v55  ;;  %v368_v41 = vsub.s32 3, %v6527_v55 }
 0x1aa   :  { %v6537_v17 = vrot.slane %v6533_v3, %v356_v58  ;;  %v6540_v21 = vrot.slane %v6533_v3, %v360_v47  ;;  %v364_v47 = vsub.s32 2, %v6527_v55 }
 0x1ab   :  { %4577 = vmatpush1.bf16.msra.mxu1 %v6465_v4  ;;  %4609 = vmatpush1.bf16.msra.mxu0 %v6467_v12 }
 0x1ac   :  { %4579 = vmatprep.subr.bf16.mxu1 %v6471_v59  ;;  %4611 = vmatprep.subr.bf16.mxu0 %v6473_v2  ;;  %7412 = vst [vmem:[#allocation54_spill] sm:$0xff] %v6537_v17  ;;  %7413 = vst [vmem:[#allocation55_spill] sm:$0xff] %v6540_v21 }
 0x1af   :  { %4581 = vmatpush1.bf16.msra.mxu1 %v6477_v44  ;;  %4613 = vmatpush1.bf16.msra.mxu0 %v6479_v46 }
 0x1b0   :  { %4615 = vmatprep.subr.bf16.mxu1 %v6249_v56  ;;  %4647 = vmatprep.subr.bf16.mxu0 %v6251_v57 }
 0x1b2   :  { %1253 = vmatmul.mubr.f32.vlgmr.msra.gmra.mrb[34].mxu1 %v7411_v38  ;;  %1328 = vmatmul.mubr.f32.vlgmr.msra.gmra.mrb[42].mxu0 %v7411_v38 }
 0x1b3   :  { %1256 = vmatprep.mubr.f32.mxu1 %v7411_v38  ;;  %1331 = vmatprep.mubr.f32.mxu0 %v7411_v38 }
 0x1b4   :  { %4617 = vmatpush1.bf16.msra.mxu1 %v6255_v62  ;;  %4649 = vmatpush1.bf16.msra.mxu0 %v6257_v0 }
 0x1b5   :  { %4619 = vmatprep.subr.bf16.mxu1 %v6263_v7  ;;  %4651 = vmatprep.subr.bf16.mxu0 %v6265_v8 }
 0x1b6   :  { %1257 = vmatmul.mubr.f32.gmra.mrb[30].mxu1 %v7411_v38  ;;  %1332 = vmatmul.mubr.f32.gmra.mrb[38].mxu0 %v7411_v38 }
 0x1b7   :  { %1468 = vmatprep.mubr.f32.mxu1 %v7411_v38  ;;  %1543 = vmatprep.mubr.f32.mxu0 %v7411_v38 }
 0x1b8   :  { %4621 = vmatpush1.bf16.msra.mxu1 %v6271_v13  ;;  %4653 = vmatpush1.bf16.msra.mxu0 %v6273_v14 }
 0x1b9   :  { %4623 = vmatprep.subr.bf16.mxu1 %v6279_v22  ;;  %4655 = vmatprep.subr.bf16.mxu0 %v6281_v20 }
 0x1bc   :  { %4625 = vmatpush1.bf16.msra.mxu1 %v6287_v26  ;;  %4657 = vmatpush1.bf16.msra.mxu0 %v6289_v27 }
 0x1bd   :  { %4627 = vmatprep.subr.bf16.mxu1 %v6295_v18  ;;  %4659 = vmatprep.subr.bf16.mxu0 %v6297_v33 }
 0x1c0   :  { %4629 = vmatpush1.bf16.msra.mxu1 %v6303_v39  ;;  %4661 = vmatpush1.bf16.msra.mxu0 %v6305_v40 }
 0x1c1   :  { %4631 = vmatprep.subr.bf16.mxu1 %v6311_v36  ;;  %4663 = vmatprep.subr.bf16.mxu0 %v6313_v45 }
 0x1c4   :  { %4633 = vmatpush1.bf16.msra.mxu1 %v6319_v51  ;;  %4665 = vmatpush1.bf16.msra.mxu0 %v6321_v53 }
 0x1c5   :  { %4635 = vmatprep.subr.bf16.mxu1 %v6327_v32  ;;  %4667 = vmatprep.subr.bf16.mxu0 %v6329_v60 }
 0x1c8   :  { %4637 = vmatpush1.bf16.msra.mxu1 %v6335_v5  ;;  %4669 = vmatpush1.bf16.msra.mxu0 %v6337_v9 }
 0x1c9   :  { %4639 = vmatprep.subr.bf16.mxu1 %v6343_v52  ;;  %4671 = vmatprep.subr.bf16.mxu0 %v6345_v16 }
 0x1cc   :  { %4641 = vmatpush1.bf16.msra.mxu1 %v6351_v24  ;;  %4673 = vmatpush1.bf16.msra.mxu0 %v6353_v25  ;;  %v6546_v25 = vrot.slane %v6533_v3, %v368_v41 }
 0x1cd   :  { %4643 = vmatprep.subr.bf16.mxu1 %v6359_v49  ;;  %4675 = vmatprep.subr.bf16.mxu0 %v6361_v34 }
 0x1ce   :  { %7414 = vst [vmem:[#allocation56_spill] sm:$0xff] %v6546_v25 }
 0x1d0   :  { %4645 = vmatpush1.bf16.msra.mxu1 %v6367_v42  ;;  %4677 = vmatpush1.bf16.msra.mxu0 %v6369_v43 }
 0x1d1   :  { %4679 = vmatprep.subr.bf16.mxu1 %v6375_v50  ;;  %4711 = vmatprep.subr.bf16.mxu0 %v6377_v54 }
 0x265   :  { %v1104_v29 = vpop.f32.mrb[0].mxu1  ;;  %v1179_v19 = vpop.f32.mrb[8].mxu0 }
 0x266   :  { %v5542_v54 = vadd.f32 %v1104_v29, %v6537_v17  ;;  %v1106_v50 = vpop.f32.mrb[1].mxu1  ;;  %v1181_v43 = vpop.f32.mrb[9].mxu0  ;;  %v6551_v29 = vrot.slane %v6533_v3, %v364_v47  ;;  %v372_v47 = vsub.s32 4, %v6527_v55 }
 0x267   :  { %v5543_v42 = vadd.f32 %v1106_v50, %v6540_v21  ;;  %v5559_v9 = vadd.f32 %v1181_v43, %v6546_v25 }
 0x268   :  { %v4153_v34 = vmul.f32 -1.442695, %v5542_v54  ;;  %7415 = vst [vmem:[#allocation57_spill] sm:$0xff] %v6551_v29  ;;  %v5558_v50 = vadd.f32 %v1179_v19, %v6551_v29 }
 0x269   :  { %v4155_v49 = vmul.f32 -1.442695, %v5543_v42  ;;  %v1110_v58 = vpop.f32.mrb[32].mxu1  ;;  %v1185_v24 = vpop.f32.mrb[40].mxu0  ;;  %v4157_v17 = vmul.f32 -1.442695, %v5559_v9 }
 0x26a   :  { %5681 = vpow2.f32 %v4153_v34  ;;  %v1111_v16 = vpop.f32.mrb[33].mxu1  ;;  %v1186_v52 = vpop.f32.mrb[41].mxu0  ;;  %v376_v9 = vsub.s32 5, %v6527_v55 }
 0x26b   :  { %5683 = vpow2.f32 %v4155_v49 }
 0x26c   :  { %5685 = vpow2.f32 %v4157_v17 }
 0x26d   :  { %5687 = vtanh.f32 %v5558_v50 }
 0x274   :  { %v5682_v42 = vpop.eup %5681 }
 0x275   :  { %v5684_v54 = vpop.eup %5683  ;;  %v1360_v41 = vadd.f32 1.0, %v5682_v42 }
 0x276   :  { %v1372_v24 = vadd.f32 1.0, %v5684_v54  ;;  %v5686_v34 = vpop.eup %5685  ;;  %v6559_v54 = vrot.slane %v6533_v3, %v372_v47 }
 0x277   :  { %5689 = vrcp.f32 %v1360_v41  ;;  %v5688_v16 = vpop.eup %5687  ;;  %v1386_v43 = vadd.f32 1.0, %v5686_v34  ;;  %v6563_v41 = vrot.slane %v6533_v3, %v376_v9 }
 0x278   :  { %5691 = vrcp.f32 %v1372_v24 }
 0x279   :  { %5693 = vrcp.f32 %v1386_v43 }
 0x281   :  { %v5690_v52 = vpop.eup %5689 }
 0x282   :  { %v5692_v49 = vpop.eup %5691  ;;  %v1394_v58 = vmul.f32 %v5690_v52, %v5688_v16  ;;  %v384_v16 = vsub.s32 7, %v6527_v55 }
 0x283   :  { %v1392_v25 = vmul.f32 0.0, %v5692_v49  ;;  %v5694_v9 = vpop.eup %5693 }
 0x284   :  { %v6569_v47 = vrot.slane %v6533_v3, %v384_v16 }
 0x285   :  { %v6556_v19 = vadd.f32 %v1394_v58, %v1392_v25  ;;  %v1254_v29 = vpop.f32.mrb[34].mxu1  ;;  %v1329_v42 = vpop.f32.mrb[42].mxu0 }
 0x286   :  { %v1255_v17 = vpop.f32.mrb[35].mxu1  ;;  %v1330_v50 = vpop.f32.mrb[43].mxu0  ;;  %7417 = vst [vmem:[#allocation59_spill] sm:$0xff] %v6569_v47  ;;  %v380_v42 = vsub.s32 6, %v6527_v55 }
 0x287   :  { %7416 = vst [vmem:[#allocation58_spill] sm:$0xff] %v6556_v19  ;;  %5695 = vtanh.f32 %v6556_v19 }
 0x288   :  { %v6574_v19 = vrot.slane %v6533_v3, %v380_v42  ;;  %v7424_v42 = vld [vmem:[#allocation48_spill] sm:$0xff] }
 0x289   :  { %v1258_v24 = vpop.f32.mrb[30].mxu1  ;;  %v1333_v34 = vpop.f32.mrb[38].mxu0 }
 0x28a   :  { %v5588_v25 = vadd.f32 %v1258_v24, %v6559_v54  ;;  %v1260_v52 = vpop.f32.mrb[31].mxu1  ;;  %v1335_v29 = vpop.f32.mrb[39].mxu0  ;;  %7418 = vst [vmem:[#allocation60_spill] sm:$0xff] %v6574_v19  ;;  %v5604_v55 = vadd.f32 %v1333_v34, %v6574_v19  ;;  %v7420_v34 = vld [vmem:[#allocation44_spill] sm:$0xff] }
 0x28b   :  { %v5589_v49 = vadd.f32 %v1260_v52, %v6563_v41  ;;  %v5605_v50 = vadd.f32 %v1335_v29, %v6569_v47 }
 0x28c   :  { %v4154_v58 = vmul.f32 -1.442695, %v5588_v25 }
 0x28d   :  { %v4156_v43 = vmul.f32 -1.442695, %v5589_v49  ;;  %v4158_v25 = vmul.f32 -1.442695, %v5605_v50  ;;  %v7421_v49 = vld [vmem:[#allocation45_spill] sm:$0xff]  ;;  %v7427_v50 = vld [vmem:[#allocation51_spill] sm:$0xff] }
 0x28e   :  { %5697 = vpow2.f32 %v4154_v58  ;;  %v7422_v58 = vld [vmem:[#allocation46_spill] sm:$0xff] }
 0x28f   :  { %5699 = vpow2.f32 %v4156_v43  ;;  %v7423_v43 = vld [vmem:[#allocation47_spill] sm:$0xff] }
 0x290   :  { %5701 = vpow2.f32 %v4158_v25 }
 0x291   :  { %v5696_v17 = vpop.eup %5695  ;;  %5703 = vtanh.f32 %v5604_v55 }
 0x292   :  { %v6576_v24 = vmul.f32 %v5696_v17, %v5694_v9  ;;  %v7425_v9 = vld [vmem:[#allocation49_spill] sm:$0xff]  ;;  %v7426_v17 = vld [vmem:[#allocation50_spill] sm:$0xff] }
 0x294   :  { %7419 = vst [vmem:[#allocation61_spill] sm:$0xff] %v6576_v24  ;;  %1469 = vmatmul.mubr.f32.vlgmr.msra.gmra.mrb[2].mxu1 %v6576_v24  ;;  %1544 = vmatmul.mubr.f32.vlgmr.msra.gmra.mrb[10].mxu0 %v6576_v24 }
 0x295   :  { %4681 = vmatpush1.bf16.msra.mxu1 %v6383_v61  ;;  %4713 = vmatpush1.bf16.msra.mxu0 %v6385_v1 }
 0x296   :  { %4683 = vmatprep.subr.bf16.mxu1 %v6389_v10  ;;  %4715 = vmatprep.subr.bf16.mxu0 %v6391_v11 }
 0x297   :  { %1474 = vmatprep.mubr.f32.mxu1 %v7411_v38  ;;  %1549 = vmatprep.mubr.f32.mxu0 %v7411_v38 }
 0x298   :  { %v5698_v3 = vpop.eup %5697 }
 0x299   :  { %v5700_v16 = vpop.eup %5699  ;;  %v1361_v52 = vadd.f32 1.0, %v5698_v3  ;;  %4685 = vmatpush1.bf16.msra.mxu1 %v6399_v23  ;;  %4717 = vmatpush1.bf16.msra.mxu0 %v6401_v28 }
 0x29a   :  { %v1373_v29 = vadd.f32 1.0, %v5700_v16  ;;  %4687 = vmatprep.subr.bf16.mxu1 %v6405_v31  ;;  %4719 = vmatprep.subr.bf16.mxu0 %v6407_v35  ;;  %v5702_v25 = vpop.eup %5701  ;;  %v7428_v16 = vld [vmem:[#allocation52_spill] sm:$0xff] }
 0x29b   :  { %5705 = vrcp.f32 %v1361_v52  ;;  %v5704_v55 = vpop.eup %5703  ;;  %v7429_v52 = vld [vmem:[#allocation53_spill] sm:$0xff] }
 0x29c   :  { %5707 = vrcp.f32 %v1373_v29 }
 0x29d   :  { %4689 = vmatpush1.bf16.msra.mxu1 %v7420_v34  ;;  %4721 = vmatpush1.bf16.msra.mxu0 %v7421_v49 }
 0x29e   :  { %4691 = vmatprep.subr.bf16.mxu1 %v7422_v58  ;;  %4723 = vmatprep.subr.bf16.mxu0 %v7423_v43  ;;  %v1387_v58 = vadd.f32 1.0, %v5702_v25  ;;  %v7431_v25 = vld [vmem:[#allocation33_spill] sm:$0xff] }
 0x2a0   :  { %5709 = vrcp.f32 %v1387_v58 }
 0x2a1   :  { %4693 = vmatpush1.bf16.msra.mxu1 %v7424_v42  ;;  %4725 = vmatpush1.bf16.msra.mxu0 %v7425_v9 }
 0x2a2   :  { %4695 = vmatprep.subr.bf16.mxu1 %v7426_v17  ;;  %4727 = vmatprep.subr.bf16.mxu0 %v7427_v50 }
 0x2a5   :  { %v5706_v3 = vpop.eup %5705  ;;  %4697 = vmatpush1.bf16.msra.mxu1 %v7428_v16  ;;  %4729 = vmatpush1.bf16.msra.mxu0 %v7429_v52 }
 0x2a6   :  { %v5708_v29 = vpop.eup %5707  ;;  %v1395_v19 = vmul.f32 %v5706_v3, %v5704_v55  ;;  %4699 = vmatprep.subr.bf16.mxu1 %v6447_v63  ;;  %4731 = vmatprep.subr.bf16.mxu0 %v6449_v15  ;;  %v7432_v55 = vld [vmem:[#allocation34_spill] sm:$0xff]  ;;  %v7433_v3 = vld [vmem:[#allocation35_spill] sm:$0xff] }
 0x2a7   :  { %v1393_v42 = vmul.f32 0.0, %v5708_v29  ;;  %v7434_v29 = vld [vmem:[#allocation36_spill] sm:$0xff] }
 0x2a9   :  { %v6603_v9 = vadd.f32 %v1395_v19, %v1393_v42  ;;  %4701 = vmatpush1.bf16.msra.mxu1 %v6453_v30  ;;  %4733 = vmatpush1.bf16.msra.mxu0 %v6455_v37 }
 0x2aa   :  { %4703 = vmatprep.subr.bf16.mxu1 %v6459_v6  ;;  %4735 = vmatprep.subr.bf16.mxu0 %v6461_v48  ;;  %v5710_v19 = vpop.eup %5709 }
 0x2ab   :  { %5711 = vtanh.f32 %v6603_v9 }
 0x2ad   :  { %4705 = vmatpush1.bf16.msra.mxu1 %v6465_v4  ;;  %4737 = vmatpush1.bf16.msra.mxu0 %v6467_v12 }
 0x2ae   :  { %4707 = vmatprep.subr.bf16.mxu1 %v6471_v59  ;;  %4739 = vmatprep.subr.bf16.mxu0 %v6473_v2 }
 0x2b1   :  { %4709 = vmatpush1.bf16.msra.mxu1 %v6477_v44  ;;  %4741 = vmatpush1.bf16.msra.mxu0 %v6479_v46 }
 0x2b2   :  { %4743 = vmatprep.subr.bf16.mxu1 %v6249_v56  ;;  %4775 = vmatprep.subr.bf16.mxu0 %v6251_v57 }
 0x2b5   :  { %v5712_v58 = vpop.eup %5711 }
 0x2b6   :  { %v6618_v42 = vmul.f32 %v5712_v58, %v5710_v19  ;;  %v7435_v19 = vld [vmem:[#allocation37_spill] sm:$0xff]  ;;  %v7436_v58 = vld [vmem:[#allocation38_spill] sm:$0xff] }
 0x2b8   :  { %7430 = vst [vmem:[#allocation44_spill] sm:$0xff] %v6618_v42  ;;  %1475 = vmatmul.mubr.f32.gmra.mrb[36].mxu1 %v6618_v42  ;;  %1550 = vmatmul.mubr.f32.gmra.mrb[44].mxu0 %v6618_v42 }
 0x2b9   :  { %1618 = vmatprep.mubr.f32.mxu1 %v7411_v38  ;;  %1693 = vmatprep.mubr.f32.mxu0 %v7411_v38 }
 0x2bc   :  { %1619 = vmatmul.mubr.f32.vlgmr.msra.gmra.mrb[38].mxu1 %v6576_v24  ;;  %1694 = vmatmul.mubr.f32.vlgmr.msra.gmra.mrb[46].mxu0 %v6576_v24  ;;  %v7438_v24 = vld [vmem:[#allocation40_spill] sm:$0xff] }
 0x2bd   :  { %1622 = vmatprep.mubr.f32.mxu1 %v7411_v38  ;;  %1697 = vmatprep.mubr.f32.mxu0 %v7411_v38 }
 0x2be   :  { %4745 = vmatpush1.bf16.msra.mxu1 %v6255_v62  ;;  %4777 = vmatpush1.bf16.msra.mxu0 %v6257_v0 }
 0x2bf   :  { %4747 = vmatprep.subr.bf16.mxu1 %v6263_v7  ;;  %4779 = vmatprep.subr.bf16.mxu0 %v6265_v8 }
 0x2c0   :  { %1623 = vmatmul.mubr.f32.gmra.mrb[28].mxu1 %v6618_v42  ;;  %1698 = vmatmul.mubr.f32.gmra.mrb[36].mxu0 %v6618_v42  ;;  %v7437_v42 = vld [vmem:[#allocation39_spill] sm:$0xff] }
 0x2c1   :  { %1834 = vmatprep.mubr.f32.mxu1 %v7411_v38  ;;  %1909 = vmatprep.mubr.f32.mxu0 %v7411_v38 }
 0x2c2   :  { %4749 = vmatpush1.bf16.msra.mxu1 %v6271_v13  ;;  %4781 = vmatpush1.bf16.msra.mxu0 %v6273_v14 }
 0x2c3   :  { %4751 = vmatprep.subr.bf16.mxu1 %v6279_v22  ;;  %4783 = vmatprep.subr.bf16.mxu0 %v6281_v20 }
 0x2c6   :  { %4753 = vmatpush1.bf16.msra.mxu1 %v6287_v26  ;;  %4785 = vmatpush1.bf16.msra.mxu0 %v6289_v27 }
 0x2c7   :  { %4755 = vmatprep.subr.bf16.mxu1 %v6295_v18  ;;  %4787 = vmatprep.subr.bf16.mxu0 %v6297_v33 }
 0x2ca   :  { %4757 = vmatpush1.bf16.msra.mxu1 %v6303_v39  ;;  %4789 = vmatpush1.bf16.msra.mxu0 %v6305_v40 }
 0x2cb   :  { %4759 = vmatprep.subr.bf16.mxu1 %v6311_v36  ;;  %4791 = vmatprep.subr.bf16.mxu0 %v6313_v45 }
 0x2ce   :  { %4761 = vmatpush1.bf16.msra.mxu1 %v6319_v51  ;;  %4793 = vmatpush1.bf16.msra.mxu0 %v6321_v53  ;;  %v7442_v53 = vld [vmem:[#allocation54_spill] sm:$0xff] }
 0x2cf   :  { %4763 = vmatprep.subr.bf16.mxu1 %v6327_v32  ;;  %4795 = vmatprep.subr.bf16.mxu0 %v6329_v60  ;;  %v7439_v32 = vld [vmem:[#allocation41_spill] sm:$0xff]  ;;  %v7440_v60 = vld [vmem:[#allocation42_spill] sm:$0xff] }
 0x2d2   :  { %4765 = vmatpush1.bf16.msra.mxu1 %v6335_v5  ;;  %4797 = vmatpush1.bf16.msra.mxu0 %v7431_v25  ;;  %v7441_v5 = vld [vmem:[#allocation43_spill] sm:$0xff] }
 0x2d3   :  { %4767 = vmatprep.subr.bf16.mxu1 %v7432_v55  ;;  %4799 = vmatprep.subr.bf16.mxu0 %v7433_v3 }
 0x2d6   :  { %4769 = vmatpush1.bf16.msra.mxu1 %v7434_v29  ;;  %4801 = vmatpush1.bf16.msra.mxu0 %v7435_v19 }
 0x2d7   :  { %4771 = vmatprep.subr.bf16.mxu1 %v7436_v58  ;;  %4803 = vmatprep.subr.bf16.mxu0 %v7437_v42  ;;  %v7443_v42 = vld [vmem:[#allocation56_spill] sm:$0xff] }
 0x2da   :  { %4773 = vmatpush1.bf16.msra.mxu1 %v7438_v24  ;;  %4805 = vmatpush1.bf16.msra.mxu0 %v7439_v32  ;;  %v7444_v32 = vld [vmem:[#allocation57_spill] sm:$0xff] }
 0x2db   :  { %4807 = vmatprep.subr.bf16.mxu1 %v7440_v60  ;;  %4839 = vmatprep.subr.bf16.mxu0 %v7441_v5 }
 0x367   :  { %v1470_v25 = vpop.f32.mrb[2].mxu1  ;;  %v1545_v55 = vpop.f32.mrb[10].mxu0 }
 0x368   :  { %v5544_v3 = vadd.f32 %v1470_v25, %v7442_v53  ;;  %v1472_v51 = vpop.f32.mrb[3].mxu1  ;;  %v1547_v29 = vpop.f32.mrb[11].mxu0  ;;  %v5560_v40 = vadd.f32 %v1545_v55, %v7444_v32 }
 0x369   :  { %v5545_v19 = vadd.f32 %v1472_v51, %v6540_v21  ;;  %v5561_v24 = vadd.f32 %v1547_v29, %v7443_v42 }
 0x36a   :  { %v4159_v45 = vmul.f32 -1.442695, %v5544_v3 }
 0x36b   :  { %v4161_v58 = vmul.f32 -1.442695, %v5545_v19  ;;  %v4163_v36 = vmul.f32 -1.442695, %v5561_v24 }
 0x36c   :  { %5713 = vpow2.f32 %v4159_v45 }
 0x36d   :  { %5715 = vpow2.f32 %v4161_v58  ;;  %v7445_v58 = vld [vmem:[#allocation58_spill] sm:$0xff] }
 0x36e   :  { %5717 = vpow2.f32 %v4163_v36 }
 0x36f   :  { %5719 = vtanh.f32 %v5560_v40 }
 0x376   :  { %v5714_v60 = vpop.eup %5713 }
 0x377   :  { %v5716_v39 = vpop.eup %5715  ;;  %v1726_v5 = vadd.f32 1.0, %v5714_v60 }
 0x378   :  { %v1738_v33 = vadd.f32 1.0, %v5716_v39  ;;  %v5718_v25 = vpop.eup %5717 }
 0x379   :  { %5721 = vrcp.f32 %v1726_v5  ;;  %v5720_v53 = vpop.eup %5719  ;;  %v1752_v45 = vadd.f32 1.0, %v5718_v25 }
 0x37a   :  { %5723 = vrcp.f32 %v1738_v33 }
 0x37b   :  { %5725 = vrcp.f32 %v1752_v45 }
 0x383   :  { %v5722_v51 = vpop.eup %5721 }
 0x384   :  { %v5724_v3 = vpop.eup %5723  ;;  %v1760_v19 = vmul.f32 %v5722_v51, %v5720_v53 }
 0x385   :  { %v1758_v21 = vmul.f32 %v5724_v3, %v7445_v58  ;;  %v5726_v32 = vpop.eup %5725 }
 0x387   :  { %v6669_v29 = vadd.f32 %v1760_v19, %v1758_v21 }
 0x389   :  { %5727 = vtanh.f32 %v6669_v29 }
 0x38b   :  { %v1476_v24 = vpop.f32.mrb[36].mxu1  ;;  %v1551_v60 = vpop.f32.mrb[44].mxu0 }
 0x38c   :  { %v1477_v36 = vpop.f32.mrb[37].mxu1  ;;  %v1552_v40 = vpop.f32.mrb[45].mxu0  ;;  %v7448_v60 = vld [vmem:[#allocation46_spill] sm:$0xff] }
 0x38f   :  { %v1620_v39 = vpop.f32.mrb[38].mxu1  ;;  %v1695_v5 = vpop.f32.mrb[46].mxu0 }
 0x390   :  { %v1621_v33 = vpop.f32.mrb[39].mxu1  ;;  %v1696_v55 = vpop.f32.mrb[47].mxu0  ;;  %v7449_v5 = vld [vmem:[#allocation48_spill] sm:$0xff] }
 0x391   :  { %v7450_v33 = vld [vmem:[#allocation49_spill] sm:$0xff] }
 0x393   :  { %v5728_v42 = vpop.eup %5727  ;;  %v1624_v18 = vpop.f32.mrb[28].mxu1 }
 0x394   :  { %v1699_v53 = vpop.f32.mrb[36].mxu0  ;;  %v5586_v25 = vadd.f32 %v1624_v18, %v6559_v54  ;;  %v1626_v51 = vpop.f32.mrb[29].mxu1  ;;  %v6673_v3 = vmul.f32 %v5728_v42, %v5726_v32  ;;  %v7447_v42 = vld [vmem:[#allocation60_spill] sm:$0xff] }
 0x395   :  { %v1701_v21 = vpop.f32.mrb[37].mxu0  ;;  %v5587_v19 = vadd.f32 %v1626_v51, %v6563_v41  ;;  %v5602_v24 = vadd.f32 %v1699_v53, %v7447_v42 }
 0x396   :  { %7446 = vst [vmem:[#allocation45_spill] sm:$0xff] %v6673_v3  ;;  %v4160_v45 = vmul.f32 -1.442695, %v5586_v25  ;;  %1835 = vmatmul.mubr.f32.vlgmr.msra.gmra.mrb[4].mxu1 %v6673_v3  ;;  %1910 = vmatmul.mubr.f32.vlgmr.msra.gmra.mrb[12].mxu0 %v6673_v3  ;;  %v5603_v18 = vadd.f32 %v1701_v21, %v6569_v47 }
 0x397   :  { %v4162_v58 = vmul.f32 -1.442695, %v5587_v19  ;;  %4809 = vmatpush1.bf16.msra.mxu1 %v6383_v61  ;;  %4841 = vmatpush1.bf16.msra.mxu0 %v6385_v1 }
 0x398   :  { %5729 = vpow2.f32 %v4160_v45  ;;  %4811 = vmatprep.subr.bf16.mxu1 %v6389_v10  ;;  %4843 = vmatprep.subr.bf16.mxu0 %v6391_v11  ;;  %v4164_v32 = vmul.f32 -1.442695, %v5603_v18 }
 0x399   :  { %5731 = vpow2.f32 %v4162_v58  ;;  %1840 = vmatprep.mubr.f32.mxu1 %v7411_v38  ;;  %1915 = vmatprep.mubr.f32.mxu0 %v7411_v38 }
 0x39a   :  { %5733 = vpow2.f32 %v4164_v32 }
 0x39b   :  { %4813 = vmatpush1.bf16.msra.mxu1 %v6399_v23  ;;  %4845 = vmatpush1.bf16.msra.mxu0 %v6401_v28  ;;  %5735 = vtanh.f32 %v5602_v24 }
 0x39c   :  { %4815 = vmatprep.subr.bf16.mxu1 %v6405_v31  ;;  %4847 = vmatprep.subr.bf16.mxu0 %v6407_v35 }
 0x39f   :  { %4817 = vmatpush1.bf16.msra.mxu1 %v7420_v34  ;;  %4849 = vmatpush1.bf16.msra.mxu0 %v7421_v49 }
 0x3a0   :  { %4819 = vmatprep.subr.bf16.mxu1 %v7448_v60  ;;  %4851 = vmatprep.subr.bf16.mxu0 %v7423_v43 }
 0x3a2   :  { %v5730_v36 = vpop.eup %5729 }
 0x3a3   :  { %v5732_v40 = vpop.eup %5731  ;;  %v1727_v39 = vadd.f32 1.0, %v5730_v36  ;;  %4821 = vmatpush1.bf16.msra.mxu1 %v7449_v5  ;;  %4853 = vmatpush1.bf16.msra.mxu0 %v7450_v33 }
 0x3a4   :  { %v1739_v55 = vadd.f32 1.0, %v5732_v40  ;;  %4823 = vmatprep.subr.bf16.mxu1 %v7426_v17  ;;  %4855 = vmatprep.subr.bf16.mxu0 %v7427_v50  ;;  %v5734_v53 = vpop.eup %5733  ;;  %v7453_v40 = vld [vmem:[#allocation23_spill] sm:$0xff] }
 0x3a5   :  { %5737 = vrcp.f32 %v1727_v39  ;;  %v5736_v25 = vpop.eup %5735  ;;  %v1753_v45 = vadd.f32 1.0, %v5734_v53  ;;  %v7454_v39 = vld [vmem:[#allocation24_spill] sm:$0xff]  ;;  %v7456_v53 = vld [vmem:[#allocation26_spill] sm:$0xff] }
 0x3a6   :  { %5739 = vrcp.f32 %v1739_v55  ;;  %v7455_v55 = vld [vmem:[#allocation25_spill] sm:$0xff] }
 0x3a7   :  { %4825 = vmatpush1.bf16.msra.mxu1 %v7428_v16  ;;  %4857 = vmatpush1.bf16.msra.mxu0 %v7429_v52  ;;  %5741 = vrcp.f32 %v1753_v45  ;;  %v7461_v45 = vld [vmem:[#allocation31_spill] sm:$0xff] }
 0x3a8   :  { %4827 = vmatprep.subr.bf16.mxu1 %v6447_v63  ;;  %4859 = vmatprep.subr.bf16.mxu0 %v6449_v15 }
 0x3ab   :  { %4829 = vmatpush1.bf16.msra.mxu1 %v6453_v30  ;;  %4861 = vmatpush1.bf16.msra.mxu0 %v6455_v37 }
 0x3ac   :  { %4831 = vmatprep.subr.bf16.mxu1 %v6459_v6  ;;  %4863 = vmatprep.subr.bf16.mxu0 %v6461_v48 }
 0x3af   :  { %v5738_v51 = vpop.eup %5737  ;;  %4833 = vmatpush1.bf16.msra.mxu1 %v6465_v4  ;;  %4865 = vmatpush1.bf16.msra.mxu0 %v6467_v12 }
 0x3b0   :  { %v5740_v21 = vpop.eup %5739  ;;  %v1761_v19 = vmul.f32 %v5738_v51, %v5736_v25  ;;  %4835 = vmatprep.subr.bf16.mxu1 %v6471_v59  ;;  %4867 = vmatprep.subr.bf16.mxu0 %v6473_v2  ;;  %v7457_v25 = vld [vmem:[#allocation27_spill] sm:$0xff]  ;;  %v7458_v51 = vld [vmem:[#allocation28_spill] sm:$0xff] }
 0x3b1   :  { %v1759_v58 = vmul.f32 %v5740_v21, %v6603_v9  ;;  %v5742_v32 = vpop.eup %5741  ;;  %v7452_v9 = vld [vmem:[#allocation22_spill] sm:$0xff]  ;;  %v7459_v21 = vld [vmem:[#allocation29_spill] sm:$0xff] }
 0x3b3   :  { %v6711_v18 = vadd.f32 %v1761_v19, %v1759_v58  ;;  %4837 = vmatpush1.bf16.msra.mxu1 %v6477_v44  ;;  %4869 = vmatpush1.bf16.msra.mxu0 %v6479_v46  ;;  %v7460_v19 = vld [vmem:[#allocation30_spill] sm:$0xff]  ;;  %v7462_v58 = vld [vmem:[#allocation32_spill] sm:$0xff] }
 0x3b4   :  { %4871 = vmatprep.subr.bf16.mxu1 %v6249_v56  ;;  %4903 = vmatprep.subr.bf16.mxu0 %v6251_v57 }
 0x3b5   :  { %5743 = vtanh.f32 %v6711_v18 }
 0x3bf   :  { %v5744_v24 = vpop.eup %5743 }
 0x3c0   :  { %v6718_v36 = vmul.f32 %v5744_v24, %v5742_v32  ;;  %v7463_v32 = vld [vmem:[#allocation33_spill] sm:$0xff]  ;;  %v7464_v24 = vld [vmem:[#allocation34_spill] sm:$0xff] }
 0x3c2   :  { %7451 = vst [vmem:[#allocation47_spill] sm:$0xff] %v6718_v36  ;;  %1841 = vmatmul.mubr.f32.gmra.mrb[40].mxu1 %v6718_v36  ;;  %1916 = vmatmul.mubr.f32.gmra.mrb[48].mxu0 %v6718_v36 }
 0x3c3   :  { %1984 = vmatprep.mubr.f32.mxu1 %v7411_v38  ;;  %2059 = vmatprep.mubr.f32.mxu0 %v7411_v38 }
 0x3c6   :  { %1985 = vmatmul.mubr.f32.vlgmr.msra.gmra.mrb[42].mxu1 %v6673_v3  ;;  %2060 = vmatmul.mubr.f32.vlgmr.msra.gmra.mrb[50].mxu0 %v6673_v3  ;;  %v7466_v3 = vld [vmem:[#allocation36_spill] sm:$0xff] }
 0x3c7   :  { %1988 = vmatprep.mubr.f32.mxu1 %v7411_v38  ;;  %2063 = vmatprep.mubr.f32.mxu0 %v7411_v38 }
 0x3c8   :  { %4873 = vmatpush1.bf16.msra.mxu1 %v6255_v62  ;;  %4905 = vmatpush1.bf16.msra.mxu0 %v6257_v0 }
 0x3c9   :  { %4875 = vmatprep.subr.bf16.mxu1 %v6263_v7  ;;  %4907 = vmatprep.subr.bf16.mxu0 %v6265_v8 }
 0x3ca   :  { %1989 = vmatmul.mubr.f32.gmra.mrb[26].mxu1 %v6718_v36  ;;  %2064 = vmatmul.mubr.f32.gmra.mrb[34].mxu0 %v6718_v36  ;;  %v7465_v36 = vld [vmem:[#allocation35_spill] sm:$0xff] }
 0x3cb   :  { %2200 = vmatprep.mubr.f32.mxu1 %v7411_v38  ;;  %2275 = vmatprep.mubr.f32.mxu0 %v7411_v38 }
 0x3cc   :  { %4877 = vmatpush1.bf16.msra.mxu1 %v6271_v13  ;;  %4909 = vmatpush1.bf16.msra.mxu0 %v6273_v14 }
 0x3cd   :  { %4879 = vmatprep.subr.bf16.mxu1 %v6279_v22  ;;  %4911 = vmatprep.subr.bf16.mxu0 %v6281_v20 }
 0x3d0   :  { %4881 = vmatpush1.bf16.msra.mxu1 %v6287_v26  ;;  %4913 = vmatpush1.bf16.msra.mxu0 %v6289_v27 }
 0x3d1   :  { %4883 = vmatprep.subr.bf16.mxu1 %v7452_v9  ;;  %4915 = vmatprep.subr.bf16.mxu0 %v7453_v40  ;;  %v7475_v40 = vld [vmem:[#allocation55_spill] sm:$0xff] }
 0x3d4   :  { %4885 = vmatpush1.bf16.msra.mxu1 %v7454_v39  ;;  %4917 = vmatpush1.bf16.msra.mxu0 %v7455_v55  ;;  %v7474_v55 = vld [vmem:[#allocation54_spill] sm:$0xff] }
 0x3d5   :  { %4887 = vmatprep.subr.bf16.mxu1 %v7456_v53  ;;  %4919 = vmatprep.subr.bf16.mxu0 %v7457_v25  ;;  %v7467_v53 = vld [vmem:[#allocation37_spill] sm:$0xff]  ;;  %v7468_v25 = vld [vmem:[#allocation38_spill] sm:$0xff] }
 0x3d8   :  { %4889 = vmatpush1.bf16.msra.mxu1 %v7458_v51  ;;  %4921 = vmatpush1.bf16.msra.mxu0 %v7459_v21  ;;  %v7469_v51 = vld [vmem:[#allocation39_spill] sm:$0xff]  ;;  %v7470_v21 = vld [vmem:[#allocation40_spill] sm:$0xff] }
 0x3d9   :  { %4891 = vmatprep.subr.bf16.mxu1 %v7460_v19  ;;  %4923 = vmatprep.subr.bf16.mxu0 %v7461_v45  ;;  %v7471_v19 = vld [vmem:[#allocation41_spill] sm:$0xff]  ;;  %v7472_v45 = vld [vmem:[#allocation42_spill] sm:$0xff] }
 0x3dc   :  { %4893 = vmatpush1.bf16.msra.mxu1 %v7462_v58  ;;  %4925 = vmatpush1.bf16.msra.mxu0 %v7463_v32  ;;  %v7473_v58 = vld [vmem:[#allocation43_spill] sm:$0xff] }
 0x3dd   :  { %4895 = vmatprep.subr.bf16.mxu1 %v7464_v24  ;;  %4927 = vmatprep.subr.bf16.mxu0 %v7465_v36 }
 0x3e0   :  { %4897 = vmatpush1.bf16.msra.mxu1 %v7466_v3  ;;  %4929 = vmatpush1.bf16.msra.mxu0 %v7467_v53 }
 0x3e1   :  { %4899 = vmatprep.subr.bf16.mxu1 %v7468_v25  ;;  %4931 = vmatprep.subr.bf16.mxu0 %v7469_v51  ;;  %v7476_v51 = vld [vmem:[#allocation56_spill] sm:$0xff] }
 0x3e4   :  { %4901 = vmatpush1.bf16.msra.mxu1 %v7470_v21  ;;  %4933 = vmatpush1.bf16.msra.mxu0 %v7471_v19  ;;  %v7477_v19 = vld [vmem:[#allocation57_spill] sm:$0xff] }
 0x3e5   :  { %4935 = vmatprep.subr.bf16.mxu1 %v7472_v45  ;;  %4967 = vmatprep.subr.bf16.mxu0 %v7473_v58 }
 0x469   :  { %v1836_v32 = vpop.f32.mrb[4].mxu1  ;;  %v1911_v24 = vpop.f32.mrb[12].mxu0 }
 0x46a   :  { %v5546_v36 = vadd.f32 %v1836_v32, %v7474_v55  ;;  %v1838_v39 = vpop.f32.mrb[5].mxu1  ;;  %v1913_v3 = vpop.f32.mrb[13].mxu0  ;;  %v5562_v26 = vadd.f32 %v1911_v24, %v7477_v19 }
 0x46b   :  { %v5547_v53 = vadd.f32 %v1838_v39, %v7475_v40  ;;  %v5563_v21 = vadd.f32 %v1913_v3, %v7476_v51 }
 0x46c   :  { %v4165_v9 = vmul.f32 -1.442695, %v5546_v36 }
 0x46d   :  { %v4167_v25 = vmul.f32 -1.442695, %v5547_v53  ;;  %v4169_v27 = vmul.f32 -1.442695, %v5563_v21 }
 0x46e   :  { %5745 = vpow2.f32 %v4165_v9 }
 0x46f   :  { %5747 = vpow2.f32 %v4167_v25 }
 0x470   :  { %5749 = vpow2.f32 %v4169_v27 }
 0x471   :  { %5751 = vtanh.f32 %v5562_v26 }
 0x478   :  { %v5746_v45 = vpop.eup %5745 }
 0x479   :  { %v5748_v20 = vpop.eup %5747  ;;  %v2092_v58 = vadd.f32 1.0, %v5746_v45 }
 0x47a   :  { %v2104_v22 = vadd.f32 1.0, %v5748_v20  ;;  %v5750_v32 = vpop.eup %5749 }
 0x47b   :  { %5753 = vrcp.f32 %v2092_v58  ;;  %v5752_v55 = vpop.eup %5751  ;;  %v2118_v9 = vadd.f32 1.0, %v5750_v32 }
 0x47c   :  { %5755 = vrcp.f32 %v2104_v22 }
 0x47d   :  { %5757 = vrcp.f32 %v2118_v9 }
 0x485   :  { %v5754_v39 = vpop.eup %5753 }
 0x486   :  { %v5756_v36 = vpop.eup %5755  ;;  %v2126_v53 = vmul.f32 %v5754_v39, %v5752_v55 }
 0x487   :  { %v2124_v25 = vmul.f32 %v5756_v36, %v6669_v29  ;;  %v5758_v21 = vpop.eup %5757 }
 0x489   :  { %v6769_v3 = vadd.f32 %v2126_v53, %v2124_v25 }
 0x48b   :  { %5759 = vtanh.f32 %v6769_v3 }
 0x495   :  { %v5760_v45 = vpop.eup %5759  ;;  %v1842_v27 = vpop.f32.mrb[40].mxu1 }
 0x496   :  { %v1917_v26 = vpop.f32.mrb[48].mxu0  ;;  %v1843_v20 = vpop.f32.mrb[41].mxu1  ;;  %v6772_v22 = vmul.f32 %v5760_v45, %v5758_v21 }
 0x497   :  { %v1918_v58 = vpop.f32.mrb[49].mxu0 }
 0x498   :  { %7478 = vst [vmem:[#allocation50_spill] sm:$0xff] %v6772_v22  ;;  %2201 = vmatmul.mubr.f32.vlgmr.msra.gmra.mrb[6].mxu1 %v6772_v22  ;;  %2276 = vmatmul.mubr.f32.vlgmr.msra.gmra.mrb[14].mxu0 %v6772_v22 }
 0x499   :  { %v1986_v55 = vpop.f32.mrb[42].mxu1  ;;  %v2061_v24 = vpop.f32.mrb[50].mxu0  ;;  %4937 = vmatpush1.bf16.msra.mxu1 %v6383_v61  ;;  %4969 = vmatpush1.bf16.msra.mxu0 %v6385_v1 }
 0x49a   :  { %v1987_v29 = vpop.f32.mrb[43].mxu1  ;;  %v2062_v32 = vpop.f32.mrb[51].mxu0  ;;  %4939 = vmatprep.subr.bf16.mxu1 %v6389_v10  ;;  %4971 = vmatprep.subr.bf16.mxu0 %v6391_v11 }
 0x49b   :  { %2206 = vmatprep.mubr.f32.mxu1 %v7411_v38  ;;  %2281 = vmatprep.mubr.f32.mxu0 %v7411_v38 }
 0x49d   :  { %v1990_v39 = vpop.f32.mrb[26].mxu1  ;;  %v2065_v36 = vpop.f32.mrb[34].mxu0  ;;  %4941 = vmatpush1.bf16.msra.mxu1 %v6399_v23  ;;  %4973 = vmatpush1.bf16.msra.mxu0 %v6401_v28 }
 0x49e   :  { %v5584_v53 = vadd.f32 %v1990_v39, %v6559_v54  ;;  %v1992_v9 = vpop.f32.mrb[27].mxu1  ;;  %v2067_v25 = vpop.f32.mrb[35].mxu0  ;;  %4943 = vmatprep.subr.bf16.mxu1 %v6405_v31  ;;  %4975 = vmatprep.subr.bf16.mxu0 %v6407_v35  ;;  %v5600_v58 = vadd.f32 %v2065_v36, %v7447_v42 }
 0x49f   :  { %v5585_v21 = vadd.f32 %v1992_v9, %v6563_v41  ;;  %v5601_v26 = vadd.f32 %v2067_v25, %v6569_v47 }
 0x4a0   :  { %v4166_v45 = vmul.f32 -1.442695, %v5584_v53 }
 0x4a1   :  { %v4168_v27 = vmul.f32 -1.442695, %v5585_v21  ;;  %4945 = vmatpush1.bf16.msra.mxu1 %v7420_v34  ;;  %4977 = vmatpush1.bf16.msra.mxu0 %v7421_v49  ;;  %v4170_v20 = vmul.f32 -1.442695, %v5601_v26 }
 0x4a2   :  { %5761 = vpow2.f32 %v4166_v45  ;;  %4947 = vmatprep.subr.bf16.mxu1 %v7448_v60  ;;  %4979 = vmatprep.subr.bf16.mxu0 %v7423_v43 }
 0x4a3   :  { %5763 = vpow2.f32 %v4168_v27 }
 0x4a4   :  { %5765 = vpow2.f32 %v4170_v20 }
 0x4a5   :  { %4949 = vmatpush1.bf16.msra.mxu1 %v7449_v5  ;;  %4981 = vmatpush1.bf16.msra.mxu0 %v7450_v33  ;;  %5767 = vtanh.f32 %v5600_v58 }
 0x4a6   :  { %4951 = vmatprep.subr.bf16.mxu1 %v7426_v17  ;;  %4983 = vmatprep.subr.bf16.mxu0 %v7427_v50 }
 0x4a9   :  { %4953 = vmatpush1.bf16.msra.mxu1 %v7428_v16  ;;  %4985 = vmatpush1.bf16.msra.mxu0 %v7429_v52 }
 0x4aa   :  { %4955 = vmatprep.subr.bf16.mxu1 %v6447_v63  ;;  %4987 = vmatprep.subr.bf16.mxu0 %v6449_v15 }
 0x4ac   :  { %v5762_v55 = vpop.eup %5761 }
 0x4ad   :  { %v5764_v24 = vpop.eup %5763  ;;  %v2093_v29 = vadd.f32 1.0, %v5762_v55  ;;  %4957 = vmatpush1.bf16.msra.mxu1 %v6453_v30  ;;  %4989 = vmatpush1.bf16.msra.mxu0 %v6455_v37  ;;  %v7481_v55 = vld [vmem:[#allocation19_spill] sm:$0xff] }
 0x4ae   :  { %v2105_v32 = vadd.f32 1.0, %v5764_v24  ;;  %4959 = vmatprep.subr.bf16.mxu1 %v6459_v6  ;;  %4991 = vmatprep.subr.bf16.mxu0 %v6461_v48  ;;  %v5766_v39 = vpop.eup %5765  ;;  %v7482_v24 = vld [vmem:[#allocation20_spill] sm:$0xff] }
 0x4af   :  { %5769 = vrcp.f32 %v2093_v29  ;;  %v5768_v36 = vpop.eup %5767  ;;  %v2119_v21 = vadd.f32 1.0, %v5766_v39  ;;  %v7483_v29 = vld [vmem:[#allocation21_spill] sm:$0xff]  ;;  %v7485_v39 = vld [vmem:[#allocation23_spill] sm:$0xff] }
 0x4b0   :  { %5771 = vrcp.f32 %v2105_v32  ;;  %v7484_v32 = vld [vmem:[#allocation22_spill] sm:$0xff] }
 0x4b1   :  { %4961 = vmatpush1.bf16.msra.mxu1 %v6465_v4  ;;  %4993 = vmatpush1.bf16.msra.mxu0 %v6467_v12  ;;  %5773 = vrcp.f32 %v2119_v21  ;;  %v7490_v21 = vld [vmem:[#allocation28_spill] sm:$0xff] }
 0x4b2   :  { %4963 = vmatprep.subr.bf16.mxu1 %v6471_v59  ;;  %4995 = vmatprep.subr.bf16.mxu0 %v6473_v2 }
 0x4b5   :  { %4965 = vmatpush1.bf16.msra.mxu1 %v6477_v44  ;;  %4997 = vmatpush1.bf16.msra.mxu0 %v6479_v46 }
 0x4b6   :  { %4999 = vmatprep.subr.bf16.mxu1 %v6249_v56  ;;  %5031 = vmatprep.subr.bf16.mxu0 %v6251_v57 }
 0x4b9   :  { %v5770_v53 = vpop.eup %5769 }
 0x4ba   :  { %v5772_v9 = vpop.eup %5771  ;;  %v2127_v25 = vmul.f32 %v5770_v53, %v5768_v36  ;;  %v7486_v36 = vld [vmem:[#allocation24_spill] sm:$0xff]  ;;  %v7487_v53 = vld [vmem:[#allocation25_spill] sm:$0xff] }
 0x4bb   :  { %v2125_v45 = vmul.f32 %v5772_v9, %v6711_v18  ;;  %v5774_v26 = vpop.eup %5773  ;;  %v7480_v18 = vld [vmem:[#allocation18_spill] sm:$0xff] }
 0x4bc   :  { %v7488_v9 = vld [vmem:[#allocation26_spill] sm:$0xff] }
 0x4bd   :  { %v6815_v27 = vadd.f32 %v2127_v25, %v2125_v45  ;;  %v7489_v25 = vld [vmem:[#allocation27_spill] sm:$0xff]  ;;  %v7491_v45 = vld [vmem:[#allocation29_spill] sm:$0xff] }
 0x4bf   :  { %5775 = vtanh.f32 %v6815_v27 }
 0x4c9   :  { %v5776_v20 = vpop.eup %5775 }
 0x4ca   :  { %v6818_v58 = vmul.f32 %v5776_v20, %v5774_v26  ;;  %v7492_v26 = vld [vmem:[#allocation30_spill] sm:$0xff]  ;;  %v7493_v20 = vld [vmem:[#allocation31_spill] sm:$0xff] }
 0x4cc   :  { %7479 = vst [vmem:[#allocation51_spill] sm:$0xff] %v6818_v58  ;;  %2207 = vmatmul.mubr.f32.gmra.mrb[44].mxu1 %v6818_v58  ;;  %2282 = vmatmul.mubr.f32.gmra.mrb[52].mxu0 %v6818_v58 }
 0x4cd   :  { %2350 = vmatprep.mubr.f32.mxu1 %v7411_v38  ;;  %2425 = vmatprep.mubr.f32.mxu0 %v7411_v38 }
 0x4d0   :  { %2351 = vmatmul.mubr.f32.vlgmr.msra.gmra.mrb[46].mxu1 %v6772_v22  ;;  %2426 = vmatmul.mubr.f32.vlgmr.msra.gmra.mrb[54].mxu0 %v6772_v22  ;;  %v7495_v22 = vld [vmem:[#allocation33_spill] sm:$0xff] }
 0x4d1   :  { %2354 = vmatprep.mubr.f32.mxu1 %v7411_v38  ;;  %2429 = vmatprep.mubr.f32.mxu0 %v7411_v38 }
 0x4d2   :  { %5001 = vmatpush1.bf16.msra.mxu1 %v6255_v62  ;;  %5033 = vmatpush1.bf16.msra.mxu0 %v6257_v0 }
 0x4d3   :  { %5003 = vmatprep.subr.bf16.mxu1 %v6263_v7  ;;  %5035 = vmatprep.subr.bf16.mxu0 %v6265_v8 }
 0x4d4   :  { %2355 = vmatmul.mubr.f32.gmra.mrb[24].mxu1 %v6818_v58  ;;  %2430 = vmatmul.mubr.f32.gmra.mrb[32].mxu0 %v6818_v58  ;;  %v7494_v58 = vld [vmem:[#allocation32_spill] sm:$0xff] }
 0x4d5   :  { %2566 = vmatprep.mubr.f32.mxu1 %v7411_v38  ;;  %2641 = vmatprep.mubr.f32.mxu0 %v7411_v38 }
 0x4d6   :  { %5005 = vmatpush1.bf16.msra.mxu1 %v6271_v13  ;;  %5037 = vmatpush1.bf16.msra.mxu0 %v6273_v14 }
 0x4d7   :  { %5007 = vmatprep.subr.bf16.mxu1 %v7480_v18  ;;  %5039 = vmatprep.subr.bf16.mxu0 %v7481_v55 }
 0x4da   :  { %5009 = vmatpush1.bf16.msra.mxu1 %v7482_v24  ;;  %5041 = vmatpush1.bf16.msra.mxu0 %v7483_v29 }
 0x4db   :  { %5011 = vmatprep.subr.bf16.mxu1 %v7484_v32  ;;  %5043 = vmatprep.subr.bf16.mxu0 %v7485_v39  ;;  %v7496_v39 = vld [vmem:[#allocation34_spill] sm:$0xff] }
 0x4dc   :  { %v7506_v32 = vld [vmem:[#allocation54_spill] sm:$0xff] }
 0x4de   :  { %5013 = vmatpush1.bf16.msra.mxu1 %v7486_v36  ;;  %5045 = vmatpush1.bf16.msra.mxu0 %v7487_v53  ;;  %v7497_v36 = vld [vmem:[#allocation35_spill] sm:$0xff]  ;;  %v7498_v53 = vld [vmem:[#allocation36_spill] sm:$0xff] }
 0x4df   :  { %5015 = vmatprep.subr.bf16.mxu1 %v7488_v9  ;;  %5047 = vmatprep.subr.bf16.mxu0 %v7489_v25  ;;  %v7499_v9 = vld [vmem:[#allocation37_spill] sm:$0xff]  ;;  %v7500_v25 = vld [vmem:[#allocation38_spill] sm:$0xff] }
 0x4e2   :  { %5017 = vmatpush1.bf16.msra.mxu1 %v7490_v21  ;;  %5049 = vmatpush1.bf16.msra.mxu0 %v7491_v45  ;;  %v7501_v21 = vld [vmem:[#allocation39_spill] sm:$0xff]  ;;  %v7502_v45 = vld [vmem:[#allocation40_spill] sm:$0xff] }
 0x4e3   :  { %5019 = vmatprep.subr.bf16.mxu1 %v7492_v26  ;;  %5051 = vmatprep.subr.bf16.mxu0 %v7493_v20  ;;  %v7503_v26 = vld [vmem:[#allocation41_spill] sm:$0xff]  ;;  %v7504_v20 = vld [vmem:[#allocation42_spill] sm:$0xff] }
 0x4e6   :  { %5021 = vmatpush1.bf16.msra.mxu1 %v7494_v58  ;;  %5053 = vmatpush1.bf16.msra.mxu0 %v7495_v22  ;;  %v7505_v58 = vld [vmem:[#allocation43_spill] sm:$0xff] }
 0x4e7   :  { %5023 = vmatprep.subr.bf16.mxu1 %v7496_v39  ;;  %5055 = vmatprep.subr.bf16.mxu0 %v7497_v36 }
 0x4ea   :  { %5025 = vmatpush1.bf16.msra.mxu1 %v7498_v53  ;;  %5057 = vmatpush1.bf16.msra.mxu0 %v7499_v9 }
 0x4eb   :  { %5027 = vmatprep.subr.bf16.mxu1 %v7500_v25  ;;  %5059 = vmatprep.subr.bf16.mxu0 %v7501_v21 }
 0x4ee   :  { %5029 = vmatpush1.bf16.msra.mxu1 %v7502_v45  ;;  %5061 = vmatpush1.bf16.msra.mxu0 %v7503_v26 }
 0x4ef   :  { %5063 = vmatprep.subr.bf16.mxu1 %v7504_v20  ;;  %5095 = vmatprep.subr.bf16.mxu0 %v7505_v58 }
 0x56b   :  { %v2202_v22 = vpop.f32.mrb[6].mxu1  ;;  %v2277_v39 = vpop.f32.mrb[14].mxu0 }
 0x56c   :  { %v5548_v36 = vadd.f32 %v2202_v22, %v7506_v32  ;;  %v2204_v29 = vpop.f32.mrb[7].mxu1  ;;  %v2279_v53 = vpop.f32.mrb[15].mxu0  ;;  %v5564_v26 = vadd.f32 %v2277_v39, %v7477_v19 }
 0x56d   :  { %v5549_v9 = vadd.f32 %v2204_v29, %v7475_v40  ;;  %v5565_v45 = vadd.f32 %v2279_v53, %v7476_v51 }
 0x56e   :  { %v4171_v24 = vmul.f32 -1.442695, %v5548_v36 }
 0x56f   :  { %v4173_v25 = vmul.f32 -1.442695, %v5549_v9  ;;  %v4175_v21 = vmul.f32 -1.442695, %v5565_v45 }
 0x570   :  { %5777 = vpow2.f32 %v4171_v24 }
 0x571   :  { %5779 = vpow2.f32 %v4173_v25 }
 0x572   :  { %5781 = vpow2.f32 %v4175_v21 }
 0x573   :  { %5783 = vtanh.f32 %v5564_v26 }
 0x57a   :  { %v5778_v20 = vpop.eup %5777 }
 0x57b   :  { %v5780_v55 = vpop.eup %5779  ;;  %v2458_v58 = vadd.f32 1.0, %v5778_v20 }
 0x57c   :  { %v2470_v18 = vadd.f32 1.0, %v5780_v55  ;;  %v5782_v22 = vpop.eup %5781 }
 0x57d   :  { %5785 = vrcp.f32 %v2458_v58  ;;  %v5784_v32 = vpop.eup %5783  ;;  %v2484_v24 = vadd.f32 1.0, %v5782_v22 }
 0x57e   :  { %5787 = vrcp.f32 %v2470_v18 }
 0x57f   :  { %5789 = vrcp.f32 %v2484_v24 }
 0x587   :  { %v5786_v29 = vpop.eup %5785 }
 0x588   :  { %v5788_v36 = vpop.eup %5787  ;;  %v2492_v9 = vmul.f32 %v5786_v29, %v5784_v32 }
 0x589   :  { %v2490_v25 = vmul.f32 %v5788_v36, %v6769_v3  ;;  %v5790_v39 = vpop.eup %5789 }
 0x58b   :  { %v6869_v53 = vadd.f32 %v2492_v9, %v2490_v25 }
 0x58d   :  { %5791 = vtanh.f32 %v6869_v53 }
 0x597   :  { %v5792_v45 = vpop.eup %5791 }
 0x598   :  { %v6872_v21 = vmul.f32 %v5792_v45, %v5790_v39 }
 0x59a   :  { %7507 = vst [vmem:[#allocation52_spill] sm:$0xff] %v6872_v21  ;;  %2567 = vmatmul.mubr.f32.vlgmr.msra.gmra.mrb[8].mxu1 %v6872_v21  ;;  %2642 = vmatmul.mubr.f32.vlgmr.msra.gmra.mrb[16].mxu0 %v6872_v21 }
 0x59b   :  { %5065 = vmatpush1.bf16.msra.mxu1 %v6383_v61  ;;  %5097 = vmatpush1.bf16.msra.mxu0 %v6385_v1 }
 0x59c   :  { %5067 = vmatprep.subr.bf16.mxu1 %v6389_v10  ;;  %5099 = vmatprep.subr.bf16.mxu0 %v6391_v11 }
 0x59d   :  { %2572 = vmatprep.mubr.f32.mxu1 %v7411_v38  ;;  %2647 = vmatprep.mubr.f32.mxu0 %v7411_v38 }
 0x59f   :  { %v2208_v3 = vpop.f32.mrb[44].mxu1  ;;  %v2283_v58 = vpop.f32.mrb[52].mxu0  ;;  %5069 = vmatpush1.bf16.msra.mxu1 %v6399_v23  ;;  %5101 = vmatpush1.bf16.msra.mxu0 %v6401_v28 }
 0x5a0   :  { %v2209_v18 = vpop.f32.mrb[45].mxu1  ;;  %v2284_v55 = vpop.f32.mrb[53].mxu0  ;;  %5071 = vmatprep.subr.bf16.mxu1 %v6405_v31  ;;  %5103 = vmatprep.subr.bf16.mxu0 %v6407_v35 }
 0x5a3   :  { %v2352_v32 = vpop.f32.mrb[46].mxu1  ;;  %v2427_v26 = vpop.f32.mrb[54].mxu0  ;;  %5073 = vmatpush1.bf16.msra.mxu1 %v7420_v34  ;;  %5105 = vmatpush1.bf16.msra.mxu0 %v7421_v49 }
 0x5a4   :  { %v2353_v20 = vpop.f32.mrb[47].mxu1  ;;  %v2428_v22 = vpop.f32.mrb[55].mxu0  ;;  %5075 = vmatprep.subr.bf16.mxu1 %v7448_v60  ;;  %5107 = vmatprep.subr.bf16.mxu0 %v7423_v43 }
 0x5a7   :  { %v2356_v29 = vpop.f32.mrb[24].mxu1  ;;  %v2431_v36 = vpop.f32.mrb[32].mxu0  ;;  %5077 = vmatpush1.bf16.msra.mxu1 %v7449_v5  ;;  %5109 = vmatpush1.bf16.msra.mxu0 %v7450_v33 }
 0x5a8   :  { %v5582_v9 = vadd.f32 %v2356_v29, %v6559_v54  ;;  %v2358_v24 = vpop.f32.mrb[25].mxu1  ;;  %v2433_v25 = vpop.f32.mrb[33].mxu0  ;;  %5079 = vmatprep.subr.bf16.mxu1 %v7426_v17  ;;  %5111 = vmatprep.subr.bf16.mxu0 %v7427_v50  ;;  %v5598_v55 = vadd.f32 %v2431_v36, %v7447_v42 }
 0x5a9   :  { %v5583_v39 = vadd.f32 %v2358_v24, %v6563_v41  ;;  %v5599_v58 = vadd.f32 %v2433_v25, %v6569_v47 }
 0x5aa   :  { %v4172_v45 = vmul.f32 -1.442695, %v5582_v9 }
 0x5ab   :  { %v4174_v3 = vmul.f32 -1.442695, %v5583_v39  ;;  %5081 = vmatpush1.bf16.msra.mxu1 %v7428_v16  ;;  %5113 = vmatpush1.bf16.msra.mxu0 %v7429_v52  ;;  %v4176_v18 = vmul.f32 -1.442695, %v5599_v58 }
 0x5ac   :  { %5793 = vpow2.f32 %v4172_v45  ;;  %5083 = vmatprep.subr.bf16.mxu1 %v6447_v63  ;;  %5115 = vmatprep.subr.bf16.mxu0 %v6449_v15 }
 0x5ad   :  { %5795 = vpow2.f32 %v4174_v3 }
 0x5ae   :  { %5797 = vpow2.f32 %v4176_v18 }
 0x5af   :  { %5085 = vmatpush1.bf16.msra.mxu1 %v6453_v30  ;;  %5117 = vmatpush1.bf16.msra.mxu0 %v6455_v37  ;;  %5799 = vtanh.f32 %v5598_v55 }
 0x5b0   :  { %5087 = vmatprep.subr.bf16.mxu1 %v6459_v6  ;;  %5119 = vmatprep.subr.bf16.mxu0 %v6461_v48 }
 0x5b3   :  { %5089 = vmatpush1.bf16.msra.mxu1 %v6465_v4  ;;  %5121 = vmatpush1.bf16.msra.mxu0 %v6467_v12 }
 0x5b4   :  { %5091 = vmatprep.subr.bf16.mxu1 %v6471_v59  ;;  %5123 = vmatprep.subr.bf16.mxu0 %v6473_v2 }
 0x5b6   :  { %v5794_v32 = vpop.eup %5793 }
 0x5b7   :  { %v5796_v26 = vpop.eup %5795  ;;  %v2459_v20 = vadd.f32 1.0, %v5794_v32  ;;  %5093 = vmatpush1.bf16.msra.mxu1 %v6477_v44  ;;  %5125 = vmatpush1.bf16.msra.mxu0 %v6479_v46  ;;  %v7510_v32 = vld [vmem:[#allocation19_spill] sm:$0xff] }
 0x5b8   :  { %v2471_v22 = vadd.f32 1.0, %v5796_v26  ;;  %5127 = vmatprep.subr.bf16.mxu1 %v6249_v56  ;;  %5159 = vmatprep.subr.bf16.mxu0 %v6251_v57  ;;  %v5798_v29 = vpop.eup %5797  ;;  %v7511_v26 = vld [vmem:[#allocation20_spill] sm:$0xff] }
 0x5b9   :  { %5801 = vrcp.f32 %v2459_v20  ;;  %v5800_v36 = vpop.eup %5799  ;;  %v2485_v39 = vadd.f32 1.0, %v5798_v29  ;;  %v7512_v20 = vld [vmem:[#allocation21_spill] sm:$0xff]  ;;  %v7514_v29 = vld [vmem:[#allocation23_spill] sm:$0xff] }
 0x5ba   :  { %5803 = vrcp.f32 %v2471_v22  ;;  %v7513_v22 = vld [vmem:[#allocation22_spill] sm:$0xff] }
 0x5bb   :  { %5805 = vrcp.f32 %v2485_v39  ;;  %v7519_v39 = vld [vmem:[#allocation28_spill] sm:$0xff] }
 0x5c3   :  { %v5802_v9 = vpop.eup %5801 }
 0x5c4   :  { %v5804_v24 = vpop.eup %5803  ;;  %v2493_v25 = vmul.f32 %v5802_v9, %v5800_v36  ;;  %v7515_v36 = vld [vmem:[#allocation24_spill] sm:$0xff]  ;;  %v7516_v9 = vld [vmem:[#allocation25_spill] sm:$0xff] }
 0x5c5   :  { %v2491_v45 = vmul.f32 %v5804_v24, %v6815_v27  ;;  %v5806_v58 = vpop.eup %5805  ;;  %v7509_v27 = vld [vmem:[#allocation18_spill] sm:$0xff] }
 0x5c6   :  { %v7517_v24 = vld [vmem:[#allocation26_spill] sm:$0xff] }
 0x5c7   :  { %v6915_v3 = vadd.f32 %v2493_v25, %v2491_v45  ;;  %v7518_v25 = vld [vmem:[#allocation27_spill] sm:$0xff]  ;;  %v7520_v45 = vld [vmem:[#allocation29_spill] sm:$0xff] }
 0x5c9   :  { %5807 = vtanh.f32 %v6915_v3 }
 0x5d3   :  { %v5808_v18 = vpop.eup %5807 }
 0x5d4   :  { %v6918_v55 = vmul.f32 %v5808_v18, %v5806_v58  ;;  %v7521_v58 = vld [vmem:[#allocation30_spill] sm:$0xff]  ;;  %v7522_v18 = vld [vmem:[#allocation31_spill] sm:$0xff] }
 0x5d6   :  { %7508 = vst [vmem:[#allocation53_spill] sm:$0xff] %v6918_v55  ;;  %2573 = vmatmul.mubr.f32.gmra.mrb[48].mxu1 %v6918_v55  ;;  %2648 = vmatmul.mubr.f32.gmra.mrb[56].mxu0 %v6918_v55 }
 0x5d7   :  { %2716 = vmatprep.mubr.f32.mxu1 %v7411_v38  ;;  %2791 = vmatprep.mubr.f32.mxu0 %v7411_v38 }
 0x5da   :  { %2717 = vmatmul.mubr.f32.vlgmr.msra.gmra.mrb[50].mxu1 %v6872_v21  ;;  %2792 = vmatmul.mubr.f32.vlgmr.msra.gmra.mrb[58].mxu0 %v6872_v21  ;;  %v7524_v21 = vld [vmem:[#allocation33_spill] sm:$0xff] }
 0x5db   :  { %2720 = vmatprep.mubr.f32.mxu1 %v7411_v38  ;;  %2795 = vmatprep.mubr.f32.mxu0 %v7411_v38 }
 0x5dc   :  { %5129 = vmatpush1.bf16.msra.mxu1 %v6255_v62  ;;  %5161 = vmatpush1.bf16.msra.mxu0 %v6257_v0 }
 0x5dd   :  { %5131 = vmatprep.subr.bf16.mxu1 %v6263_v7  ;;  %5163 = vmatprep.subr.bf16.mxu0 %v6265_v8 }
 0x5de   :  { %2721 = vmatmul.mubr.f32.gmra.mrb[22].mxu1 %v6918_v55  ;;  %2796 = vmatmul.mubr.f32.gmra.mrb[30].mxu0 %v6918_v55  ;;  %v7523_v55 = vld [vmem:[#allocation32_spill] sm:$0xff] }
 0x5df   :  { %2932 = vmatprep.mubr.f32.mxu1 %v7411_v38  ;;  %3007 = vmatprep.mubr.f32.mxu0 %v7411_v38 }
 0x5e0   :  { %5133 = vmatpush1.bf16.msra.mxu1 %v6271_v13  ;;  %5165 = vmatpush1.bf16.msra.mxu0 %v6273_v14 }
 0x5e1   :  { %5135 = vmatprep.subr.bf16.mxu1 %v7509_v27  ;;  %5167 = vmatprep.subr.bf16.mxu0 %v7510_v32 }
 0x5e4   :  { %5137 = vmatpush1.bf16.msra.mxu1 %v7511_v26  ;;  %5169 = vmatpush1.bf16.msra.mxu0 %v7512_v20 }
 0x5e5   :  { %5139 = vmatprep.subr.bf16.mxu1 %v7513_v22  ;;  %5171 = vmatprep.subr.bf16.mxu0 %v7514_v29  ;;  %v7525_v29 = vld [vmem:[#allocation34_spill] sm:$0xff] }
 0x5e6   :  { %v7535_v22 = vld [vmem:[#allocation54_spill] sm:$0xff] }
 0x5e8   :  { %5141 = vmatpush1.bf16.msra.mxu1 %v7515_v36  ;;  %5173 = vmatpush1.bf16.msra.mxu0 %v7516_v9  ;;  %v7526_v36 = vld [vmem:[#allocation35_spill] sm:$0xff]  ;;  %v7527_v9 = vld [vmem:[#allocation36_spill] sm:$0xff] }
 0x5e9   :  { %5143 = vmatprep.subr.bf16.mxu1 %v7517_v24  ;;  %5175 = vmatprep.subr.bf16.mxu0 %v7518_v25  ;;  %v7528_v24 = vld [vmem:[#allocation37_spill] sm:$0xff]  ;;  %v7529_v25 = vld [vmem:[#allocation38_spill] sm:$0xff] }
 0x5ec   :  { %5145 = vmatpush1.bf16.msra.mxu1 %v7519_v39  ;;  %5177 = vmatpush1.bf16.msra.mxu0 %v7520_v45  ;;  %v7530_v39 = vld [vmem:[#allocation39_spill] sm:$0xff]  ;;  %v7531_v45 = vld [vmem:[#allocation40_spill] sm:$0xff] }
 0x5ed   :  { %5147 = vmatprep.subr.bf16.mxu1 %v7521_v58  ;;  %5179 = vmatprep.subr.bf16.mxu0 %v7522_v18  ;;  %v7532_v58 = vld [vmem:[#allocation41_spill] sm:$0xff]  ;;  %v7533_v18 = vld [vmem:[#allocation42_spill] sm:$0xff] }
 0x5f0   :  { %5149 = vmatpush1.bf16.msra.mxu1 %v7523_v55  ;;  %5181 = vmatpush1.bf16.msra.mxu0 %v7524_v21  ;;  %v7534_v55 = vld [vmem:[#allocation43_spill] sm:$0xff] }
 0x5f1   :  { %5151 = vmatprep.subr.bf16.mxu1 %v7525_v29  ;;  %5183 = vmatprep.subr.bf16.mxu0 %v7526_v36 }
 0x5f4   :  { %5153 = vmatpush1.bf16.msra.mxu1 %v7527_v9  ;;  %5185 = vmatpush1.bf16.msra.mxu0 %v7528_v24 }
 0x5f5   :  { %5155 = vmatprep.subr.bf16.mxu1 %v7529_v25  ;;  %5187 = vmatprep.subr.bf16.mxu0 %v7530_v39 }
 0x5f8   :  { %5157 = vmatpush1.bf16.msra.mxu1 %v7531_v45  ;;  %5189 = vmatpush1.bf16.msra.mxu0 %v7532_v58 }
 0x5f9   :  { %5191 = vmatprep.subr.bf16.mxu1 %v7533_v18  ;;  %5223 = vmatprep.subr.bf16.mxu0 %v7534_v55 }
 0x66d   :  { %v2568_v21 = vpop.f32.mrb[8].mxu1  ;;  %v2643_v29 = vpop.f32.mrb[16].mxu0 }
 0x66e   :  { %v5550_v36 = vadd.f32 %v2568_v21, %v7535_v22  ;;  %v2570_v20 = vpop.f32.mrb[9].mxu1  ;;  %v2645_v9 = vpop.f32.mrb[17].mxu0  ;;  %v5566_v58 = vadd.f32 %v2643_v29, %v7477_v19 }
 0x66f   :  { %v5551_v24 = vadd.f32 %v2570_v20, %v7475_v40  ;;  %v5567_v45 = vadd.f32 %v2645_v9, %v7476_v51 }
 0x670   :  { %v4177_v26 = vmul.f32 -1.442695, %v5550_v36 }
 0x671   :  { %v4179_v25 = vmul.f32 -1.442695, %v5551_v24  ;;  %v4181_v39 = vmul.f32 -1.442695, %v5567_v45 }
 0x672   :  { %5809 = vpow2.f32 %v4177_v26 }
 0x673   :  { %5811 = vpow2.f32 %v4179_v25 }
 0x674   :  { %5813 = vpow2.f32 %v4181_v39 }
 0x675   :  { %5815 = vtanh.f32 %v5566_v58 }
 0x67c   :  { %v5810_v18 = vpop.eup %5809 }
 0x67d   :  { %v5812_v32 = vpop.eup %5811  ;;  %v2824_v55 = vadd.f32 1.0, %v5810_v18 }
 0x67e   :  { %v2836_v27 = vadd.f32 1.0, %v5812_v32  ;;  %v5814_v21 = vpop.eup %5813 }
 0x67f   :  { %5817 = vrcp.f32 %v2824_v55  ;;  %v5816_v22 = vpop.eup %5815  ;;  %v2850_v26 = vadd.f32 1.0, %v5814_v21 }
 0x680   :  { %5819 = vrcp.f32 %v2836_v27 }
 0x681   :  { %5821 = vrcp.f32 %v2850_v26 }
 0x689   :  { %v5818_v20 = vpop.eup %5817 }
 0x68a   :  { %v5820_v36 = vpop.eup %5819  ;;  %v2858_v24 = vmul.f32 %v5818_v20, %v5816_v22 }
 0x68b   :  { %v2856_v25 = vmul.f32 %v5820_v36, %v6869_v53  ;;  %v5822_v29 = vpop.eup %5821 }
 0x68d   :  { %v6969_v9 = vadd.f32 %v2858_v24, %v2856_v25 }
 0x68f   :  { %5823 = vtanh.f32 %v6969_v9 }
 0x699   :  { %v5824_v45 = vpop.eup %5823 }
 0x69a   :  { %v6972_v39 = vmul.f32 %v5824_v45, %v5822_v29 }
 0x69c   :  { %7536 = vst [vmem:[#allocation58_spill] sm:$0xff] %v6972_v39  ;;  %2933 = vmatmul.mubr.f32.vlgmr.msra.gmra.mrb[10].mxu1 %v6972_v39  ;;  %3008 = vmatmul.mubr.f32.vlgmr.msra.gmra.mrb[18].mxu0 %v6972_v39 }
 0x69d   :  { %5193 = vmatpush1.bf16.msra.mxu1 %v6383_v61  ;;  %5225 = vmatpush1.bf16.msra.mxu0 %v6385_v1 }
 0x69e   :  { %5195 = vmatprep.subr.bf16.mxu1 %v6389_v10  ;;  %5227 = vmatprep.subr.bf16.mxu0 %v6391_v11 }
 0x69f   :  { %2938 = vmatprep.mubr.f32.mxu1 %v7411_v38  ;;  %3013 = vmatprep.mubr.f32.mxu0 %v7411_v38 }
 0x6a1   :  { %5197 = vmatpush1.bf16.msra.mxu1 %v6399_v23  ;;  %5229 = vmatpush1.bf16.msra.mxu0 %v6401_v28 }
 0x6a2   :  { %5199 = vmatprep.subr.bf16.mxu1 %v6405_v31  ;;  %5231 = vmatprep.subr.bf16.mxu0 %v6407_v35 }
 0x6a5   :  { %5201 = vmatpush1.bf16.msra.mxu1 %v7420_v34  ;;  %5233 = vmatpush1.bf16.msra.mxu0 %v7421_v49 }
 0x6a6   :  { %5203 = vmatprep.subr.bf16.mxu1 %v7448_v60  ;;  %5235 = vmatprep.subr.bf16.mxu0 %v7423_v43 }
 0x6a9   :  { %v2574_v53 = vpop.f32.mrb[48].mxu1  ;;  %v2649_v55 = vpop.f32.mrb[56].mxu0  ;;  %5205 = vmatpush1.bf16.msra.mxu1 %v7449_v5  ;;  %5237 = vmatpush1.bf16.msra.mxu0 %v7450_v33 }
 0x6aa   :  { %v2575_v27 = vpop.f32.mrb[49].mxu1  ;;  %v2650_v32 = vpop.f32.mrb[57].mxu0  ;;  %5207 = vmatprep.subr.bf16.mxu1 %v7426_v17  ;;  %5239 = vmatprep.subr.bf16.mxu0 %v7427_v50 }
 0x6ad   :  { %v2718_v22 = vpop.f32.mrb[50].mxu1  ;;  %v2793_v58 = vpop.f32.mrb[58].mxu0  ;;  %5209 = vmatpush1.bf16.msra.mxu1 %v7428_v16  ;;  %5241 = vmatpush1.bf16.msra.mxu0 %v7429_v52 }
 0x6ae   :  { %v2719_v18 = vpop.f32.mrb[51].mxu1  ;;  %v2794_v21 = vpop.f32.mrb[59].mxu0  ;;  %5211 = vmatprep.subr.bf16.mxu1 %v6447_v63  ;;  %5243 = vmatprep.subr.bf16.mxu0 %v6449_v15 }
 0x6b1   :  { %v2722_v20 = vpop.f32.mrb[22].mxu1  ;;  %v2797_v36 = vpop.f32.mrb[30].mxu0  ;;  %5213 = vmatpush1.bf16.msra.mxu1 %v6453_v30  ;;  %5245 = vmatpush1.bf16.msra.mxu0 %v6455_v37 }
 0x6b2   :  { %v5580_v24 = vadd.f32 %v2722_v20, %v6559_v54  ;;  %v2724_v26 = vpop.f32.mrb[23].mxu1  ;;  %v2799_v25 = vpop.f32.mrb[31].mxu0  ;;  %5215 = vmatprep.subr.bf16.mxu1 %v6459_v6  ;;  %5247 = vmatprep.subr.bf16.mxu0 %v6461_v48  ;;  %v5596_v32 = vadd.f32 %v2797_v36, %v7447_v42 }
 0x6b3   :  { %v5581_v29 = vadd.f32 %v2724_v26, %v6563_v41  ;;  %v5597_v55 = vadd.f32 %v2799_v25, %v6569_v47 }
 0x6b4   :  { %v4178_v45 = vmul.f32 -1.442695, %v5580_v24 }
 0x6b5   :  { %v4180_v53 = vmul.f32 -1.442695, %v5581_v29  ;;  %5217 = vmatpush1.bf16.msra.mxu1 %v6465_v4  ;;  %5249 = vmatpush1.bf16.msra.mxu0 %v6467_v12  ;;  %v4182_v27 = vmul.f32 -1.442695, %v5597_v55 }
 0x6b6   :  { %5825 = vpow2.f32 %v4178_v45  ;;  %5219 = vmatprep.subr.bf16.mxu1 %v6471_v59  ;;  %5251 = vmatprep.subr.bf16.mxu0 %v6473_v2 }
 0x6b7   :  { %5827 = vpow2.f32 %v4180_v53 }
 0x6b8   :  { %5829 = vpow2.f32 %v4182_v27 }
 0x6b9   :  { %5221 = vmatpush1.bf16.msra.mxu1 %v6477_v44  ;;  %5253 = vmatpush1.bf16.msra.mxu0 %v6479_v46  ;;  %5831 = vtanh.f32 %v5596_v32  ;;  %v7539_v32 = vld [vmem:[#allocation19_spill] sm:$0xff] }
 0x6ba   :  { %5255 = vmatprep.subr.bf16.mxu1 %v6249_v56  ;;  %5287 = vmatprep.subr.bf16.mxu0 %v6251_v57 }
 0x6c0   :  { %v5826_v22 = vpop.eup %5825 }
 0x6c1   :  { %v5828_v58 = vpop.eup %5827  ;;  %v2825_v18 = vadd.f32 1.0, %v5826_v22  ;;  %v7540_v22 = vld [vmem:[#allocation20_spill] sm:$0xff] }
 0x6c2   :  { %v2837_v21 = vadd.f32 1.0, %v5828_v58  ;;  %v5830_v20 = vpop.eup %5829  ;;  %v7541_v58 = vld [vmem:[#allocation21_spill] sm:$0xff] }
 0x6c3   :  { %5833 = vrcp.f32 %v2825_v18  ;;  %v5832_v24 = vpop.eup %5831  ;;  %v2851_v45 = vadd.f32 1.0, %v5830_v20  ;;  %v7542_v18 = vld [vmem:[#allocation22_spill] sm:$0xff]  ;;  %v7544_v20 = vld [vmem:[#allocation24_spill] sm:$0xff] }
 0x6c4   :  { %5835 = vrcp.f32 %v2837_v21  ;;  %v7543_v21 = vld [vmem:[#allocation23_spill] sm:$0xff] }
 0x6c5   :  { %5837 = vrcp.f32 %v2851_v45  ;;  %v7549_v45 = vld [vmem:[#allocation29_spill] sm:$0xff] }
 0x6cd   :  { %v5834_v26 = vpop.eup %5833 }
 0x6ce   :  { %v5836_v25 = vpop.eup %5835  ;;  %v2859_v29 = vmul.f32 %v5834_v26, %v5832_v24  ;;  %v7545_v24 = vld [vmem:[#allocation25_spill] sm:$0xff]  ;;  %v7546_v26 = vld [vmem:[#allocation26_spill] sm:$0xff] }
 0x6cf   :  { %v2857_v53 = vmul.f32 %v5836_v25, %v6915_v3  ;;  %v5838_v36 = vpop.eup %5837  ;;  %v7538_v3 = vld [vmem:[#allocation18_spill] sm:$0xff]  ;;  %v7547_v25 = vld [vmem:[#allocation27_spill] sm:$0xff] }
 0x6d1   :  { %v7015_v47 = vadd.f32 %v2859_v29, %v2857_v53  ;;  %v7548_v29 = vld [vmem:[#allocation28_spill] sm:$0xff]  ;;  %v7550_v53 = vld [vmem:[#allocation30_spill] sm:$0xff] }
 0x6d3   :  { %5839 = vtanh.f32 %v7015_v47 }
 0x6dd   :  { %v5840_v55 = vpop.eup %5839 }
 0x6de   :  { %v7018_v27 = vmul.f32 %v5840_v55, %v5838_v36  ;;  %v7551_v36 = vld [vmem:[#allocation31_spill] sm:$0xff]  ;;  %v7552_v55 = vld [vmem:[#allocation32_spill] sm:$0xff] }
 0x6e0   :  { %7537 = vst [vmem:[#allocation60_spill] sm:$0xff] %v7018_v27  ;;  %2939 = vmatmul.mubr.f32.gmra.mrb[52].mxu1 %v7018_v27  ;;  %3014 = vmatmul.mubr.f32.gmra.mrb[60].mxu0 %v7018_v27 }
 0x6e1   :  { %3082 = vmatprep.mubr.f32.mxu1 %v7411_v38  ;;  %3157 = vmatprep.mubr.f32.mxu0 %v7411_v38 }
 0x6e4   :  { %3083 = vmatmul.mubr.f32.vlgmr.msra.gmra.mrb[54].mxu1 %v6972_v39  ;;  %3158 = vmatmul.mubr.f32.vlgmr.msra.gmra.mrb[62].mxu0 %v6972_v39  ;;  %v7553_v39 = vld [vmem:[#allocation33_spill] sm:$0xff] }
 0x6e5   :  { %3086 = vmatprep.mubr.f32.mxu1 %v7411_v38  ;;  %3161 = vmatprep.mubr.f32.mxu0 %v7411_v38 }
 0x6e6   :  { %5257 = vmatpush1.bf16.msra.mxu1 %v6255_v62  ;;  %5289 = vmatpush1.bf16.msra.mxu0 %v6257_v0 }
 0x6e7   :  { %5259 = vmatprep.subr.bf16.mxu1 %v6263_v7  ;;  %5291 = vmatprep.subr.bf16.mxu0 %v6265_v8 }
 0x6e8   :  { %3087 = vmatmul.mubr.f32.gmra.mrb[20].mxu1 %v7018_v27  ;;  %3162 = vmatmul.mubr.f32.gmra.mrb[28].mxu0 %v7018_v27  ;;  %v7554_v27 = vld [vmem:[#allocation34_spill] sm:$0xff] }
 0x6e9   :  { %3298 = vmatprep.mubr.f32.mxu1 %v7411_v38  ;;  %3373 = vmatprep.mubr.f32.mxu0 %v7411_v38 }
 0x6ea   :  { %5261 = vmatpush1.bf16.msra.mxu1 %v6271_v13  ;;  %5293 = vmatpush1.bf16.msra.mxu0 %v6273_v14 }
 0x6eb   :  { %5263 = vmatprep.subr.bf16.mxu1 %v7538_v3  ;;  %5295 = vmatprep.subr.bf16.mxu0 %v7539_v32 }
 0x6ee   :  { %5265 = vmatpush1.bf16.msra.mxu1 %v7540_v22  ;;  %5297 = vmatpush1.bf16.msra.mxu0 %v7541_v58 }
 0x6ef   :  { %5267 = vmatprep.subr.bf16.mxu1 %v7542_v18  ;;  %5299 = vmatprep.subr.bf16.mxu0 %v7543_v21  ;;  %v7564_v21 = vld [vmem:[#allocation54_spill] sm:$0xff] }
 0x6f2   :  { %5269 = vmatpush1.bf16.msra.mxu1 %v7544_v20  ;;  %5301 = vmatpush1.bf16.msra.mxu0 %v7545_v24  ;;  %v7555_v20 = vld [vmem:[#allocation35_spill] sm:$0xff]  ;;  %v7556_v24 = vld [vmem:[#allocation36_spill] sm:$0xff] }
 0x6f3   :  { %5271 = vmatprep.subr.bf16.mxu1 %v7546_v26  ;;  %5303 = vmatprep.subr.bf16.mxu0 %v7547_v25  ;;  %v7557_v26 = vld [vmem:[#allocation37_spill] sm:$0xff]  ;;  %v7558_v25 = vld [vmem:[#allocation38_spill] sm:$0xff] }
 0x6f6   :  { %5273 = vmatpush1.bf16.msra.mxu1 %v7548_v29  ;;  %5305 = vmatpush1.bf16.msra.mxu0 %v7549_v45  ;;  %v7559_v29 = vld [vmem:[#allocation39_spill] sm:$0xff]  ;;  %v7560_v45 = vld [vmem:[#allocation40_spill] sm:$0xff] }
 0x6f7   :  { %5275 = vmatprep.subr.bf16.mxu1 %v7550_v53  ;;  %5307 = vmatprep.subr.bf16.mxu0 %v7551_v36  ;;  %v7561_v53 = vld [vmem:[#allocation41_spill] sm:$0xff]  ;;  %v7562_v36 = vld [vmem:[#allocation42_spill] sm:$0xff] }
 0x6fa   :  { %5277 = vmatpush1.bf16.msra.mxu1 %v7552_v55  ;;  %5309 = vmatpush1.bf16.msra.mxu0 %v7553_v39  ;;  %v7563_v55 = vld [vmem:[#allocation43_spill] sm:$0xff] }
 0x6fb   :  { %5279 = vmatprep.subr.bf16.mxu1 %v7554_v27  ;;  %5311 = vmatprep.subr.bf16.mxu0 %v7555_v20 }
 0x6fe   :  { %5281 = vmatpush1.bf16.msra.mxu1 %v7556_v24  ;;  %5313 = vmatpush1.bf16.msra.mxu0 %v7557_v26 }
 0x6ff   :  { %5283 = vmatprep.subr.bf16.mxu1 %v7558_v25  ;;  %5315 = vmatprep.subr.bf16.mxu0 %v7559_v29 }
 0x702   :  { %5285 = vmatpush1.bf16.msra.mxu1 %v7560_v45  ;;  %5317 = vmatpush1.bf16.msra.mxu0 %v7561_v53 }
 0x703   :  { %5319 = vmatprep.subr.bf16.mxu1 %v7562_v36  ;;  %5351 = vmatprep.subr.bf16.mxu0 %v7563_v55 }
 0x76f   :  { %v2934_v39 = vpop.f32.mrb[10].mxu1  ;;  %v3009_v27 = vpop.f32.mrb[18].mxu0 }
 0x770   :  { %v5552_v20 = vadd.f32 %v2934_v39, %v7564_v21  ;;  %v2936_v18 = vpop.f32.mrb[11].mxu1  ;;  %v3011_v24 = vpop.f32.mrb[19].mxu0  ;;  %v5568_v53 = vadd.f32 %v3009_v27, %v7477_v19 }
 0x771   :  { %v5553_v26 = vadd.f32 %v2936_v18, %v7475_v40  ;;  %v5569_v45 = vadd.f32 %v3011_v24, %v7476_v51 }
 0x772   :  { %v4183_v58 = vmul.f32 -1.442695, %v5552_v20 }
 0x773   :  { %v4185_v25 = vmul.f32 -1.442695, %v5553_v26  ;;  %v4187_v29 = vmul.f32 -1.442695, %v5569_v45 }
 0x774   :  { %5841 = vpow2.f32 %v4183_v58 }
 0x775   :  { %5843 = vpow2.f32 %v4185_v25 }
 0x776   :  { %5845 = vpow2.f32 %v4187_v29 }
 0x777   :  { %5847 = vtanh.f32 %v5568_v53 }
 0x77e   :  { %v5842_v36 = vpop.eup %5841 }
 0x77f   :  { %v5844_v22 = vpop.eup %5843  ;;  %v3190_v55 = vadd.f32 1.0, %v5842_v36 }
 0x780   :  { %v3202_v32 = vadd.f32 1.0, %v5844_v22  ;;  %v5846_v39 = vpop.eup %5845 }
 0x781   :  { %5849 = vrcp.f32 %v3190_v55  ;;  %v5848_v21 = vpop.eup %5847  ;;  %v3216_v58 = vadd.f32 1.0, %v5846_v39 }
 0x782   :  { %5851 = vrcp.f32 %v3202_v32 }
 0x783   :  { %5853 = vrcp.f32 %v3216_v58 }
 0x78b   :  { %v5850_v18 = vpop.eup %5849 }
 0x78c   :  { %v5852_v20 = vpop.eup %5851  ;;  %v3224_v26 = vmul.f32 %v5850_v18, %v5848_v21 }
 0x78d   :  { %v3222_v25 = vmul.f32 %v5852_v20, %v6969_v9  ;;  %v5854_v27 = vpop.eup %5853 }
 0x78f   :  { %v7069_v24 = vadd.f32 %v3224_v26, %v3222_v25 }
 0x791   :  { %5855 = vtanh.f32 %v7069_v24 }
 0x79b   :  { %v5856_v45 = vpop.eup %5855 }
 0x79c   :  { %v7072_v29 = vmul.f32 %v5856_v45, %v5854_v27 }
 0x79e   :  { %3299 = vmatmul.mubr.f32.vlgmr.msra.gmra.mrb[12].mxu1 %v7072_v29  ;;  %3374 = vmatmul.mubr.f32.vlgmr.msra.gmra.mrb[20].mxu0 %v7072_v29 }
 0x79f   :  { %5321 = vmatpush1.bf16.msra.mxu1 %v6383_v61  ;;  %5353 = vmatpush1.bf16.msra.mxu0 %v6385_v1 }
 0x7a0   :  { %5323 = vmatprep.subr.bf16.mxu1 %v6389_v10  ;;  %5355 = vmatprep.subr.bf16.mxu0 %v6391_v11 }
 0x7a1   :  { %3304 = vmatprep.mubr.f32.mxu1 %v7411_v38  ;;  %3379 = vmatprep.mubr.f32.mxu0 %v7411_v38 }
 0x7a3   :  { %5325 = vmatpush1.bf16.msra.mxu1 %v6399_v23  ;;  %5357 = vmatpush1.bf16.msra.mxu0 %v6401_v28 }
 0x7a4   :  { %5327 = vmatprep.subr.bf16.mxu1 %v6405_v31  ;;  %5359 = vmatprep.subr.bf16.mxu0 %v6407_v35 }
 0x7a7   :  { %5329 = vmatpush1.bf16.msra.mxu1 %v7420_v34  ;;  %5361 = vmatpush1.bf16.msra.mxu0 %v7421_v49 }
 0x7a8   :  { %5331 = vmatprep.subr.bf16.mxu1 %v7448_v60  ;;  %5363 = vmatprep.subr.bf16.mxu0 %v7423_v43 }
 0x7ab   :  { %5333 = vmatpush1.bf16.msra.mxu1 %v7449_v5  ;;  %5365 = vmatpush1.bf16.msra.mxu0 %v7450_v33 }
 0x7ac   :  { %5335 = vmatprep.subr.bf16.mxu1 %v7426_v17  ;;  %5367 = vmatprep.subr.bf16.mxu0 %v7427_v50 }
 0x7af   :  { %5337 = vmatpush1.bf16.msra.mxu1 %v7428_v16  ;;  %5369 = vmatpush1.bf16.msra.mxu0 %v7429_v52 }
 0x7b0   :  { %5339 = vmatprep.subr.bf16.mxu1 %v6447_v63  ;;  %5371 = vmatprep.subr.bf16.mxu0 %v6449_v15 }
 0x7b3   :  { %v2940_v9 = vpop.f32.mrb[52].mxu1  ;;  %v3015_v32 = vpop.f32.mrb[60].mxu0  ;;  %5341 = vmatpush1.bf16.msra.mxu1 %v6453_v30  ;;  %5373 = vmatpush1.bf16.msra.mxu0 %v6455_v37 }
 0x7b4   :  { %v2941_v22 = vpop.f32.mrb[53].mxu1  ;;  %v3016_v21 = vpop.f32.mrb[61].mxu0  ;;  %5343 = vmatprep.subr.bf16.mxu1 %v6459_v6  ;;  %5375 = vmatprep.subr.bf16.mxu0 %v6461_v48  ;;  %v7565_v32 = vld [vmem:[#allocation59_spill] sm:$0xff] }
 0x7b7   :  { %v3084_v53 = vpop.f32.mrb[54].mxu1  ;;  %v3159_v36 = vpop.f32.mrb[62].mxu0  ;;  %5345 = vmatpush1.bf16.msra.mxu1 %v6465_v4  ;;  %5377 = vmatpush1.bf16.msra.mxu0 %v6467_v12 }
 0x7b8   :  { %v3085_v55 = vpop.f32.mrb[55].mxu1  ;;  %v3160_v39 = vpop.f32.mrb[63].mxu0  ;;  %5347 = vmatprep.subr.bf16.mxu1 %v6471_v59  ;;  %5379 = vmatprep.subr.bf16.mxu0 %v6473_v2 }
 0x7bb   :  { %v3088_v18 = vpop.f32.mrb[20].mxu1  ;;  %v3163_v20 = vpop.f32.mrb[28].mxu0  ;;  %5349 = vmatpush1.bf16.msra.mxu1 %v6477_v44  ;;  %5381 = vmatpush1.bf16.msra.mxu0 %v6479_v46 }
 0x7bc   :  { %v5578_v26 = vadd.f32 %v3088_v18, %v6559_v54  ;;  %v3090_v58 = vpop.f32.mrb[21].mxu1  ;;  %v3165_v25 = vpop.f32.mrb[29].mxu0  ;;  %5383 = vmatprep.subr.bf16.mxu1 %v6249_v56  ;;  %5415 = vmatprep.subr.bf16.mxu0 %v6251_v57  ;;  %v5594_v53 = vadd.f32 %v3163_v20, %v7447_v42 }
 0x7bd   :  { %v5579_v27 = vadd.f32 %v3090_v58, %v6563_v41  ;;  %v5595_v22 = vadd.f32 %v3165_v25, %v7565_v32 }
 0x7be   :  { %v4184_v45 = vmul.f32 -1.442695, %v5578_v26 }
 0x7bf   :  { %v4186_v9 = vmul.f32 -1.442695, %v5579_v27  ;;  %v4188_v21 = vmul.f32 -1.442695, %v5595_v22 }
 0x7c0   :  { %5857 = vpow2.f32 %v4184_v45 }
 0x7c1   :  { %5859 = vpow2.f32 %v4186_v9 }
 0x7c2   :  { %5861 = vpow2.f32 %v4188_v21 }
 0x7c3   :  { %5863 = vtanh.f32 %v5594_v53  ;;  %v7571_v53 = vld [vmem:[#allocation24_spill] sm:$0xff] }
 0x7ca   :  { %v5858_v36 = vpop.eup %5857 }
 0x7cb   :  { %v5860_v55 = vpop.eup %5859  ;;  %v3191_v39 = vadd.f32 1.0, %v5858_v36  ;;  %v7572_v36 = vld [vmem:[#allocation25_spill] sm:$0xff] }
 0x7cc   :  { %v3203_v18 = vadd.f32 1.0, %v5860_v55  ;;  %v5862_v56 = vpop.eup %5861  ;;  %v7573_v55 = vld [vmem:[#allocation26_spill] sm:$0xff] }
 0x7cd   :  { %5865 = vrcp.f32 %v3191_v39  ;;  %v5864_v57 = vpop.eup %5863  ;;  %v3217_v45 = vadd.f32 1.0, %v5862_v56  ;;  %v7577_v39 = vld [vmem:[#allocation30_spill] sm:$0xff]  ;;  %v7579_v56 = vld [vmem:[#allocation32_spill] sm:$0xff] }
 0x7ce   :  { %5867 = vrcp.f32 %v3203_v18  ;;  %v7578_v18 = vld [vmem:[#allocation31_spill] sm:$0xff] }
 0x7cf   :  { %5869 = vrcp.f32 %v3217_v45  ;;  %v7584_v45 = vld [vmem:[#allocation37_spill] sm:$0xff] }
 0x7d7   :  { %v5866_v58 = vpop.eup %5865 }
 0x7d8   :  { %v5868_v26 = vpop.eup %5867  ;;  %v3225_v27 = vmul.f32 %v5866_v58, %v5864_v57  ;;  %v7580_v57 = vld [vmem:[#allocation33_spill] sm:$0xff]  ;;  %v7581_v58 = vld [vmem:[#allocation34_spill] sm:$0xff] }
 0x7d9   :  { %v3223_v9 = vmul.f32 %v5868_v26, %v7015_v47  ;;  %v5870_v20 = vpop.eup %5869  ;;  %v7570_v47 = vld [vmem:[#allocation23_spill] sm:$0xff] }
 0x7da   :  { %v7582_v26 = vld [vmem:[#allocation35_spill] sm:$0xff] }
 0x7db   :  { %v7115_v25 = vadd.f32 %v3225_v27, %v3223_v9  ;;  %v7583_v27 = vld [vmem:[#allocation36_spill] sm:$0xff]  ;;  %v7585_v9 = vld [vmem:[#allocation38_spill] sm:$0xff] }
 0x7dd   :  { %5871 = vtanh.f32 %v7115_v25 }
 0x7e7   :  { %v5872_v22 = vpop.eup %5871 }
 0x7e8   :  { %v7118_v21 = vmul.f32 %v5872_v22, %v5870_v20  ;;  %v7586_v20 = vld [vmem:[#allocation39_spill] sm:$0xff]  ;;  %v7587_v22 = vld [vmem:[#allocation40_spill] sm:$0xff] }
 0x7ea   :  { %3305 = vmatmul.mubr.f32.gmra.mrb[56].mxu1 %v7118_v21  ;;  %3380 = vmatmul.mubr.f32.gmra.mrb[64].mxu0 %v7118_v21 }
 0x7eb   :  { %3448 = vmatprep.mubr.f32.mxu1 %v7411_v38  ;;  %3523 = vmatprep.mubr.f32.mxu0 %v7411_v38 }
 0x7ee   :  { %3449 = vmatmul.mubr.f32.vlgmr.msra.gmra.mrb[58].mxu1 %v7072_v29  ;;  %3524 = vmatmul.mubr.f32.vlgmr.msra.gmra.mrb[66].mxu0 %v7072_v29 }
 0x7ef   :  { %3452 = vmatprep.mubr.f32.mxu1 %v7411_v38  ;;  %3527 = vmatprep.mubr.f32.mxu0 %v7411_v38 }
 0x7f0   :  { %5385 = vmatpush1.bf16.msra.mxu1 %v6255_v62  ;;  %5417 = vmatpush1.bf16.msra.mxu0 %v6257_v0  ;;  %v7566_v62 = vld [vmem:[#allocation19_spill] sm:$0xff]  ;;  %v7567_v0 = vld [vmem:[#allocation20_spill] sm:$0xff] }
 0x7f1   :  { %5387 = vmatprep.subr.bf16.mxu1 %v6263_v7  ;;  %5419 = vmatprep.subr.bf16.mxu0 %v6265_v8  ;;  %v7568_v7 = vld [vmem:[#allocation21_spill] sm:$0xff]  ;;  %v7569_v8 = vld [vmem:[#allocation22_spill] sm:$0xff] }
 0x7f2   :  { %3453 = vmatmul.mubr.f32.gmra.mrb[18].mxu1 %v7118_v21  ;;  %3528 = vmatmul.mubr.f32.gmra.mrb[26].mxu0 %v7118_v21 }
 0x7f3   :  { %3664 = vmatprep.mubr.f32.mxu1 %v7411_v38  ;;  %3739 = vmatprep.mubr.f32.mxu0 %v7411_v38 }
 0x7f4   :  { %5389 = vmatpush1.bf16.msra.mxu1 %v6271_v13  ;;  %5421 = vmatpush1.bf16.msra.mxu0 %v6273_v14  ;;  %v7574_v13 = vld [vmem:[#allocation27_spill] sm:$0xff]  ;;  %v7575_v14 = vld [vmem:[#allocation28_spill] sm:$0xff] }
 0x7f5   :  { %5391 = vmatprep.subr.bf16.mxu1 %v7538_v3  ;;  %5423 = vmatprep.subr.bf16.mxu0 %v7566_v62  ;;  %v7576_v3 = vld [vmem:[#allocation29_spill] sm:$0xff] }
 0x7f6   :  { %v7588_v62 = vld [vmem:[#allocation41_spill] sm:$0xff] }
 0x7f8   :  { %5393 = vmatpush1.bf16.msra.mxu1 %v7567_v0  ;;  %5425 = vmatpush1.bf16.msra.mxu0 %v7568_v7  ;;  %v7589_v0 = vld [vmem:[#allocation42_spill] sm:$0xff]  ;;  %v7590_v7 = vld [vmem:[#allocation43_spill] sm:$0xff] }
 0x7f9   :  { %5395 = vmatprep.subr.bf16.mxu1 %v7569_v8  ;;  %5427 = vmatprep.subr.bf16.mxu0 %v7570_v47 }
 0x7fc   :  { %5397 = vmatpush1.bf16.msra.mxu1 %v7571_v53  ;;  %5429 = vmatpush1.bf16.msra.mxu0 %v7572_v36  ;;  %v7591_v53 = vld [vmem:[#allocation54_spill] sm:$0xff] }
 0x7fd   :  { %5399 = vmatprep.subr.bf16.mxu1 %v7573_v55  ;;  %5431 = vmatprep.subr.bf16.mxu0 %v7574_v13 }
 0x800   :  { %5401 = vmatpush1.bf16.msra.mxu1 %v7575_v14  ;;  %5433 = vmatpush1.bf16.msra.mxu0 %v7576_v3 }
 0x801   :  { %5403 = vmatprep.subr.bf16.mxu1 %v7577_v39  ;;  %5435 = vmatprep.subr.bf16.mxu0 %v7578_v18 }
 0x804   :  { %5405 = vmatpush1.bf16.msra.mxu1 %v7579_v56  ;;  %5437 = vmatpush1.bf16.msra.mxu0 %v7580_v57 }
 0x805   :  { %5407 = vmatprep.subr.bf16.mxu1 %v7581_v58  ;;  %5439 = vmatprep.subr.bf16.mxu0 %v7582_v26 }
 0x808   :  { %5409 = vmatpush1.bf16.msra.mxu1 %v7583_v27  ;;  %5441 = vmatpush1.bf16.msra.mxu0 %v7584_v45 }
 0x809   :  { %5411 = vmatprep.subr.bf16.mxu1 %v7585_v9  ;;  %5443 = vmatprep.subr.bf16.mxu0 %v7586_v20 }
 0x80c   :  { %5413 = vmatpush1.bf16.msra.mxu1 %v7587_v22  ;;  %5445 = vmatpush1.bf16.msra.mxu0 %v7588_v62 }
 0x80d   :  { %5447 = vmatprep.subr.bf16.mxu1 %v7589_v0  ;;  %5479 = vmatprep.subr.bf16.mxu0 %v7590_v7 }
 0x871   :  { %v3300_v8 = vpop.f32.mrb[12].mxu1  ;;  %v3375_v47 = vpop.f32.mrb[20].mxu0 }
 0x872   :  { %v5554_v36 = vadd.f32 %v3300_v8, %v7591_v53  ;;  %v3302_v55 = vpop.f32.mrb[13].mxu1  ;;  %v3377_v13 = vpop.f32.mrb[21].mxu0  ;;  %v5570_v57 = vadd.f32 %v3375_v47, %v7477_v19 }
 0x873   :  { %v5555_v14 = vadd.f32 %v3302_v55, %v7475_v40  ;;  %v5571_v18 = vadd.f32 %v3377_v13, %v7476_v51 }
 0x874   :  { %v4189_v3 = vmul.f32 -1.442695, %v5554_v36 }
 0x875   :  { %v4191_v39 = vmul.f32 -1.442695, %v5555_v14  ;;  %v4193_v56 = vmul.f32 -1.442695, %v5571_v18  ;;  %v3999_v18 = vld [vmem:[#allocation12 + $0x88] sm:$0xff] }
 0x876   :  { %5873 = vpow2.f32 %v4189_v3 }
 0x877   :  { %5875 = vpow2.f32 %v4191_v39 }
 0x878   :  { %5877 = vpow2.f32 %v4193_v56 }
 0x879   :  { %5879 = vtanh.f32 %v5570_v57  ;;  %v3982_v57 = vld [vmem:[#allocation12] sm:$0xff] }
 0x880   :  { %v5874_v58 = vpop.eup %5873 }
 0x881   :  { %v5876_v26 = vpop.eup %5875  ;;  %v3556_v27 = vadd.f32 1.0, %v5874_v58  ;;  %v3983_v58 = vld [vmem:[#allocation12 + $0x8] sm:$0xff] }
 0x882   :  { %v3568_v45 = vadd.f32 1.0, %v5876_v26  ;;  %v5878_v9 = vpop.eup %5877  ;;  %v5512_v26 = vpack.c.bf16 %v3983_v58, %v3982_v57  ;;  %v3997_v57 = vld [vmem:[#allocation12 + $0x78] sm:$0xff] }
 0x883   :  { %5881 = vrcp.f32 %v3556_v27  ;;  %v5880_v20 = vpop.eup %5879  ;;  %v3582_v7 = vadd.f32 1.0, %v5878_v9  ;;  %v4000_v27 = vld [vmem:[#allocation12 + $0x90] sm:$0xff] }
 0x884   :  { %5883 = vrcp.f32 %v3568_v45  ;;  %v4001_v45 = vld [vmem:[#allocation12 + $0x98] sm:$0xff] }
 0x885   :  { %5885 = vrcp.f32 %v3582_v7  ;;  %v5514_v9 = vpack.c.bf16 %v4001_v45, %v4000_v27 }
 0x88d   :  { %v5882_v22 = vpop.eup %5881 }
 0x88e   :  { %v5884_v62 = vpop.eup %5883  ;;  %v3590_v0 = vmul.f32 %v5882_v22, %v5880_v20  ;;  %v3984_v20 = vld [vmem:[#allocation12 + $0x10] sm:$0xff]  ;;  %v3985_v22 = vld [vmem:[#allocation12 + $0x18] sm:$0xff] }
 0x88f   :  { %v3588_v8 = vmul.f32 %v5884_v62, %v7069_v24  ;;  %v5886_v47 = vpop.eup %5885  ;;  %v5516_v62 = vpack.c.bf16 %v3985_v22, %v3984_v20 }
 0x891   :  { %v7169_v36 = vadd.f32 %v3590_v0, %v3588_v8  ;;  %v4003_v0 = vld [vmem:[#allocation12 + $0xa8] sm:$0xff]  ;;  %v3986_v8 = vld [vmem:[#allocation12 + $0x20] sm:$0xff] }
 0x893   :  { %5887 = vtanh.f32 %v7169_v36 }
 0x89d   :  { %v5888_v55 = vpop.eup %5887 }
 0x89e   :  { %v7172_v13 = vmul.f32 %v5888_v55, %v5886_v47  ;;  %v3987_v47 = vld [vmem:[#allocation12 + $0x28] sm:$0xff] }
 0x89f   :  { %v5520_v55 = vpack.c.bf16 %v3987_v47, %v3986_v8 }
 0x8a0   :  { %3665 = vmatmul.mubr.f32.vlgmr.msra.gmra.mrb[14].mxu1 %v7172_v13  ;;  %3740 = vmatmul.mubr.f32.vlgmr.msra.gmra.mrb[22].mxu0 %v7172_v13 }
 0x8a1   :  { %5449 = vmatpush1.bf16.msra.mxu1 %v6383_v61  ;;  %5481 = vmatpush1.bf16.msra.mxu0 %v6385_v1 }
 0x8a2   :  { %5451 = vmatprep.subr.bf16.mxu1 %v6389_v10  ;;  %5483 = vmatprep.subr.bf16.mxu0 %v6391_v11 }
 0x8a3   :  { %3670 = vmatprep.mubr.f32.mxu1 %v7411_v38  ;;  %3745 = vmatprep.mubr.f32.mxu0 %v7411_v38 }
 0x8a5   :  { %5453 = vmatpush1.bf16.msra.mxu1 %v6399_v23  ;;  %5485 = vmatpush1.bf16.msra.mxu0 %v6401_v28 }
 0x8a6   :  { %5455 = vmatprep.subr.bf16.mxu1 %v6405_v31  ;;  %5487 = vmatprep.subr.bf16.mxu0 %v6407_v35 }
 0x8a9   :  { %5457 = vmatpush1.bf16.msra.mxu1 %v7420_v34  ;;  %5489 = vmatpush1.bf16.msra.mxu0 %v7421_v49 }
 0x8aa   :  { %5459 = vmatprep.subr.bf16.mxu1 %v7448_v60  ;;  %5491 = vmatprep.subr.bf16.mxu0 %v7423_v43 }
 0x8ad   :  { %5461 = vmatpush1.bf16.msra.mxu1 %v7449_v5  ;;  %5493 = vmatpush1.bf16.msra.mxu0 %v7450_v33 }
 0x8ae   :  { %5463 = vmatprep.subr.bf16.mxu1 %v7426_v17  ;;  %5495 = vmatprep.subr.bf16.mxu0 %v7427_v50 }
 0x8b1   :  { %5465 = vmatpush1.bf16.msra.mxu1 %v7428_v16  ;;  %5497 = vmatpush1.bf16.msra.mxu0 %v7429_v52 }
 0x8b2   :  { %5467 = vmatprep.subr.bf16.mxu1 %v6447_v63  ;;  %5499 = vmatprep.subr.bf16.mxu0 %v6449_v15 }
 0x8b5   :  { %5469 = vmatpush1.bf16.msra.mxu1 %v6453_v30  ;;  %5501 = vmatpush1.bf16.msra.mxu0 %v6455_v37 }
 0x8b6   :  { %5471 = vmatprep.subr.bf16.mxu1 %v6459_v6  ;;  %5503 = vmatprep.subr.bf16.mxu0 %v6461_v48 }
 0x8b9   :  { %5473 = vmatpush1.bf16.msra.mxu1 %v6465_v4  ;;  %5505 = vmatpush1.bf16.msra.mxu0 %v6467_v12 }
 0x8ba   :  { %5475 = vmatprep.subr.bf16.mxu1 %v6471_v59  ;;  %5507 = vmatprep.subr.bf16.mxu0 %v6473_v2 }
 0x8bd   :  { %v3306_v61 = vpop.f32.mrb[56].mxu1  ;;  %v3381_v1 = vpop.f32.mrb[64].mxu0  ;;  %5477 = vmatpush1.bf16.msra.mxu1 %v6477_v44  ;;  %5509 = vmatpush1.bf16.msra.mxu0 %v6479_v46 }
 0x8be   :  { %v3307_v10 = vpop.f32.mrb[57].mxu1  ;;  %v3382_v11 = vpop.f32.mrb[65].mxu0  ;;  %v4004_v61 = vld [vmem:[#allocation12 + $0xb0] sm:$0xff]  ;;  %v4005_v1 = vld [vmem:[#allocation12 + $0xb8] sm:$0xff] }
 0x8bf   :  { %v5522_v10 = vpack.c.bf16 %v4005_v1, %v4004_v61  ;;  %v3988_v11 = vld [vmem:[#allocation12 + $0x30] sm:$0xff] }
 0x8c1   :  { %v3450_v23 = vpop.f32.mrb[58].mxu1  ;;  %v3525_v28 = vpop.f32.mrb[66].mxu0 }
 0x8c2   :  { %v3451_v31 = vpop.f32.mrb[59].mxu1  ;;  %v3526_v35 = vpop.f32.mrb[67].mxu0  ;;  %v3989_v23 = vld [vmem:[#allocation12 + $0x38] sm:$0xff] }
 0x8c3   :  { %v5524_v28 = vpack.c.bf16 %v3989_v23, %v3988_v11  ;;  %v4006_v31 = vld [vmem:[#allocation12 + $0xc0] sm:$0xff]  ;;  %v4007_v35 = vld [vmem:[#allocation12 + $0xc8] sm:$0xff] }
 0x8c5   :  { %v3454_v63 = vpop.f32.mrb[18].mxu1  ;;  %v3529_v15 = vpop.f32.mrb[26].mxu0 }
 0x8c6   :  { %v5576_v30 = vadd.f32 %v3454_v63, %v6559_v54  ;;  %v3456_v37 = vpop.f32.mrb[19].mxu1  ;;  %v3531_v6 = vpop.f32.mrb[27].mxu0  ;;  %v5592_v44 = vadd.f32 %v3529_v15, %v7447_v42  ;;  %v3990_v63 = vld [vmem:[#allocation12 + $0x40] sm:$0xff]  ;;  %v5526_v15 = vpack.c.bf16 %v4007_v35, %v4006_v31 }
 0x8c7   :  { %v5577_v48 = vadd.f32 %v3456_v37, %v6563_v41  ;;  %v5593_v59 = vadd.f32 %v3531_v6, %v7565_v32  ;;  %v4008_v37 = vld [vmem:[#allocation12 + $0xd0] sm:$0xff]  ;;  %v4009_v6 = vld [vmem:[#allocation12 + $0xd8] sm:$0xff] }
 0x8c8   :  { %v4190_v4 = vmul.f32 -1.442695, %v5576_v30  ;;  %v3991_v30 = vld [vmem:[#allocation12 + $0x48] sm:$0xff] }
 0x8c9   :  { %v4192_v12 = vmul.f32 -1.442695, %v5577_v48  ;;  %v4194_v2 = vmul.f32 -1.442695, %v5593_v59  ;;  %v5528_v48 = vpack.c.bf16 %v3991_v30, %v3990_v63  ;;  %v3993_v59 = vld [vmem:[#allocation12 + $0x58] sm:$0xff] }
 0x8ca   :  { %5889 = vpow2.f32 %v4190_v4  ;;  %v5530_v4 = vpack.c.bf16 %v4009_v6, %v4008_v37 }
 0x8cb   :  { %5891 = vpow2.f32 %v4192_v12  ;;  %v3992_v12 = vld [vmem:[#allocation12 + $0x50] sm:$0xff] }
 0x8cc   :  { %5893 = vpow2.f32 %v4194_v2  ;;  %v4010_v2 = vld [vmem:[#allocation12 + $0xe0] sm:$0xff] }
 0x8cd   :  { %5895 = vtanh.f32 %v5592_v44  ;;  %v4011_v44 = vld [vmem:[#allocation12 + $0xe8] sm:$0xff] }
 0x8d4   :  { %v5890_v46 = vpop.eup %5889 }
 0x8d5   :  { %v5892_v34 = vpop.eup %5891  ;;  %v3557_v49 = vadd.f32 1.0, %v5890_v46  ;;  %v5532_v46 = vpack.c.bf16 %v3993_v59, %v3992_v12 }
 0x8d6   :  { %v3569_v43 = vadd.f32 1.0, %v5892_v34  ;;  %v5894_v17 = vpop.eup %5893  ;;  %v5534_v34 = vpack.c.bf16 %v4011_v44, %v4010_v2 }
 0x8d7   :  { %5897 = vrcp.f32 %v3557_v49  ;;  %v5896_v50 = vpop.eup %5895  ;;  %v3583_v5 = vadd.f32 1.0, %v5894_v17  ;;  %v3994_v49 = vld [vmem:[#allocation12 + $0x60] sm:$0xff] }
 0x8d8   :  { %5899 = vrcp.f32 %v3569_v43  ;;  %v3995_v43 = vld [vmem:[#allocation12 + $0x68] sm:$0xff] }
 0x8d9   :  { %5901 = vrcp.f32 %v3583_v5 }
 0x8e1   :  { %v5898_v16 = vpop.eup %5897 }
 0x8e2   :  { %v5900_v52 = vpop.eup %5899  ;;  %v3591_v60 = vmul.f32 %v5898_v16, %v5896_v50  ;;  %v4012_v16 = vld [vmem:[#allocation12 + $0xf0] sm:$0xff] }
 0x8e3   :  { %v3589_v33 = vmul.f32 %v5900_v52, %v7115_v25  ;;  %v5902_v14 = vpop.eup %5901  ;;  %v3998_v25 = vld [vmem:[#allocation12 + $0x80] sm:$0xff]  ;;  %v4013_v52 = vld [vmem:[#allocation12 + $0xf8] sm:$0xff] }
 0x8e4   :  { %v5510_v56 = vpack.c.bf16 %v3999_v18, %v3998_v25  ;;  %v5538_v18 = vpack.c.bf16 %v4013_v52, %v4012_v16 }
 0x8e5   :  { %v7213_v24 = vadd.f32 %v3591_v60, %v3589_v33 }
 0x8e6   :  { %5511 = vmatprep.subr.bf16.mxu1 %v5510_v56  ;;  %v3996_v56 = vld [vmem:[#allocation12 + $0x70] sm:$0xff] }
 0x8e7   :  { %5903 = vtanh.f32 %v7213_v24 }
 0x8f1   :  { %v5904_v3 = vpop.eup %5903 }
 0x8f2   :  { %v7216_v39 = vmul.f32 %v5904_v3, %v5902_v14  ;;  %v5536_v3 = vpack.c.bf16 %v3995_v43, %v3994_v49 }
 0x8f4   :  { %3671 = vmatmul.mubr.f32.gmra.mrb[60].mxu1 %v7216_v39  ;;  %3746 = vmatmul.mubr.f32.gmra.mrb[68].mxu0 %v7216_v39 }
 0x8f5   :  { %3814 = vmatprep.mubr.f32.mxu1 %v7411_v38  ;;  %3889 = vmatprep.mubr.f32.mxu0 %v7411_v38 }
 0x8f8   :  { %3815 = vmatmul.mubr.f32.vlgmr.msra.gmra.mrb[62].mxu1 %v7172_v13  ;;  %3890 = vmatmul.mubr.f32.vlgmr.msra.gmra.mrb[70].mxu0 %v7172_v13 }
 0x8f9   :  { %3818 = vmatprep.mubr.f32.mxu1 %v7411_v38  ;;  %3893 = vmatprep.mubr.f32.mxu0 %v7411_v38  ;;  %v4002_v38 = vld [vmem:[#allocation12 + $0xa0] sm:$0xff] }
 0x8fa   :  { %5513 = vmatpush3.bf16.msra.mxu1 %v5512_v26  ;;  %v5518_v7 = vpack.c.bf16 %v4003_v0, %v4002_v38  ;;  %v5540_v26 = vpack.c.bf16 %v3997_v57, %v3996_v56  ;;  %v7595_v56 = vld [vmem:[#allocation60_spill] sm:$0xff]  ;;  %v7597_v57 = vld [vmem:[#allocation53_spill] sm:$0xff] }
 0x8fb   :  { %5515 = vmatprep.subr.bf16.mxu1 %v5514_v9 }
 0x8fc   :  { %3819 = vmatmul.mubr.f32.gmra.mrb[16].mxu1 %v7216_v39  ;;  %3894 = vmatmul.mubr.f32.gmra.mrb[24].mxu0 %v7216_v39 }
 0x8fe   :  { %5517 = vmatpush3.bf16.msra.mxu1 %v5516_v62 }
 0x8ff   :  { %5519 = vmatprep.subr.bf16.mxu1 %v5518_v7 }
 0x902   :  { %5521 = vmatpush3.bf16.msra.mxu1 %v5520_v55 }
 0x903   :  { %5523 = vmatprep.subr.bf16.mxu1 %v5522_v10 }
 0x906   :  { %5525 = vmatpush3.bf16.msra.mxu1 %v5524_v28 }
 0x907   :  { %5527 = vmatprep.subr.bf16.mxu1 %v5526_v15 }
 0x90a   :  { %5529 = vmatpush3.bf16.msra.mxu1 %v5528_v48 }
 0x90b   :  { %5531 = vmatprep.subr.bf16.mxu1 %v5530_v4 }
 0x90e   :  { %5533 = vmatpush3.bf16.msra.mxu1 %v5532_v46 }
 0x90f   :  { %5535 = vmatprep.subr.bf16.mxu1 %v5534_v34 }
 0x912   :  { %5537 = vmatpush3.bf16.msra.mxu1 %v5536_v3  ;;  %v7592_v3 = vld [vmem:[#allocation61_spill] sm:$0xff] }
 0x913   :  { %5539 = vmatprep.subr.bf16.mxu1 %v5538_v18  ;;  %v7594_v18 = vld [vmem:[#allocation50_spill] sm:$0xff] }
 0x916   :  { %5541 = vmatpush3.bf16.msra.mxu1 %v5540_v26  ;;  %v7599_v26 = vld [vmem:[#allocation51_spill] sm:$0xff] }
 0x973   :  { %v3666_v17 = vpop.f32.mrb[14].mxu1  ;;  %v3741_v50 = vpop.f32.mrb[22].mxu0 }
 0x974   :  { %v5556_v60 = vadd.f32 %v3666_v17, %v7591_v53  ;;  %v3668_v5 = vpop.f32.mrb[15].mxu1  ;;  %v3743_v33 = vpop.f32.mrb[23].mxu0  ;;  %v5572_v45 = vadd.f32 %v3741_v50, %v7477_v19 }
 0x975   :  { %v5557_v14 = vadd.f32 %v3668_v5, %v7475_v40  ;;  %v5573_v27 = vadd.f32 %v3743_v33, %v7476_v51 }
 0x976   :  { %v4195_v25 = vmul.f32 -1.442695, %v5556_v60 }
 0x977   :  { %v4197_v58 = vmul.f32 -1.442695, %v5557_v14  ;;  %v4199_v53 = vmul.f32 -1.442695, %v5573_v27  ;;  %v7600_v27 = vld [vmem:[#allocation47_spill] sm:$0xff] }
 0x978   :  { %5905 = vpow2.f32 %v4195_v25  ;;  %v7593_v25 = vld [vmem:[#allocation45_spill] sm:$0xff] }
 0x979   :  { %5907 = vpow2.f32 %v4197_v58  ;;  %v7598_v58 = vld [vmem:[#allocation58_spill] sm:$0xff] }
 0x97a   :  { %5909 = vpow2.f32 %v4199_v53  ;;  %v4201_v53 = vld [vmem:[%s7276_s6] ss:$0 sm:$0xff]  ;;  %s6087_s6 = smov [#allocation13]  }
 0x97b   :  { %5911 = vtanh.f32 %v5572_v45  ;;  %s4139_s20 = sshll.u32 %s6087_s6, 4  ;;  %s4140_s20 = int_to_ptr.vmem [resolvable:$true] %s4139_s20 }
 0x97c   :  { %s6047_s21 = scalar_lea.vmem %s4140_s20, 1024  ;;  %p6052_p13 = scmp.lt.s32.totalorder %s4140_s20, %s4140_s20 }
 0x97d   :  { %p6048_p12 = scmp.ne.s32.totalorder %s4140_s20, %s6047_s21  ;;  %p6053_p0 = scmp.lt.s32.totalorder %s6047_s21, %s6047_s21 }
 0x97f   :  { %p6054_p1 = por %p6053_p0, %p6052_p13 }
 0x981   :  { %p6055_p2 = pnand %p6054_p1, %p6048_p12 }
 0x982   :  { %v5906_v40 = vpop.eup %5905 }
 0x983   :  { %v5908_v9 = vpop.eup %5907  ;;  %v3922_v20 = vadd.f32 1.0, %v5906_v40 }
 0x984   :  { %v3934_v22 = vadd.f32 1.0, %v5908_v9  ;;  %v5910_v62 = vpop.eup %5909 }
 0x985   :  { %5913 = vrcp.f32 %v3922_v20  ;;  %v5912_v38 = vpop.eup %5911  ;;  %v3948_v47 = vadd.f32 1.0, %v5910_v62 }
 0x986   :  { %5915 = vrcp.f32 %v3934_v22 }
 0x987   :  { %5917 = vrcp.f32 %v3948_v47 }
 0x98f   :  { %v5914_v0 = vpop.eup %5913 }
 0x990   :  { %v5916_v7 = vpop.eup %5915  ;;  %v3956_v8 = vmul.f32 %v5914_v0, %v5912_v38 }
 0x991   :  { %v3954_v51 = vmul.f32 %v5916_v7, %v7169_v36  ;;  %v5918_v19 = vpop.eup %5917 }
 0x993   :  { %v3958_v55 = vadd.f32 %v3956_v8, %v3954_v51 }
 0x995   :  { %5919 = vtanh.f32 %v3958_v55 }
 0x99f   :  { %v5920_v61 = vpop.eup %5919 }
 0x9a0   :  { %v3962_v1 = vmul.f32 %v5920_v61, %v5918_v19 }
 0x9c7   :  { %v3672_v10 = vpop.f32.mrb[60].mxu1  ;;  %v3747_v11 = vpop.f32.mrb[68].mxu0 }
 0x9c8   :  { %v3673_v23 = vpop.f32.mrb[61].mxu1  ;;  %v3748_v28 = vpop.f32.mrb[69].mxu0 }
 0x9cb   :  { %v3816_v31 = vpop.f32.mrb[62].mxu1  ;;  %v3891_v35 = vpop.f32.mrb[70].mxu0 }
 0x9cc   :  { %v3817_v63 = vpop.f32.mrb[63].mxu1  ;;  %v3892_v15 = vpop.f32.mrb[71].mxu0 }
 0x9cf   :  { %v3820_v30 = vpop.f32.mrb[16].mxu1  ;;  %v3895_v37 = vpop.f32.mrb[24].mxu0 }
 0x9d0   :  { %v5574_v6 = vadd.f32 %v3820_v30, %v6559_v54  ;;  %v3822_v48 = vpop.f32.mrb[17].mxu1  ;;  %v3897_v36 = vpop.f32.mrb[25].mxu0  ;;  %v5590_v46 = vadd.f32 %v3895_v37, %v7447_v42 }
 0x9d1   :  { %v5575_v4 = vadd.f32 %v3822_v48, %v6563_v41  ;;  %v5591_v2 = vadd.f32 %v3897_v36, %v7565_v32 }
 0x9d2   :  { %v4196_v12 = vmul.f32 -1.442695, %v5574_v6 }
 0x9d3   :  { %v4198_v59 = vmul.f32 -1.442695, %v5575_v4  ;;  %v4200_v44 = vmul.f32 -1.442695, %v5591_v2 }
 0x9d4   :  { %5921 = vpow2.f32 %v4196_v12 }
 0x9d5   :  { %5923 = vpow2.f32 %v4198_v59 }
 0x9d6   :  { %5925 = vpow2.f32 %v4200_v44 }
 0x9d7   :  { %5927 = vtanh.f32 %v5590_v46 }
 0x9de   :  { %v5922_v34 = vpop.eup %5921 }
 0x9df   :  { %v5924_v49 = vpop.eup %5923  ;;  %v3923_v43 = vadd.f32 1.0, %v5922_v34 }
 0x9e0   :  { %v3935_v17 = vadd.f32 1.0, %v5924_v49  ;;  %v5926_v54 = vpop.eup %5925 }
 0x9e1   :  { %5929 = vrcp.f32 %v3923_v43  ;;  %v5928_v50 = vpop.eup %5927  ;;  %v3949_v60 = vadd.f32 1.0, %v5926_v54 }
 0x9e2   :  { %5931 = vrcp.f32 %v3935_v17 }
 0x9e3   :  { %5933 = vrcp.f32 %v3949_v60 }
 0x9eb   :  { %v5930_v41 = vpop.eup %5929 }
 0x9ec   :  { %v5932_v16 = vpop.eup %5931  ;;  %v3957_v52 = vmul.f32 %v5930_v41, %v5928_v50 }
 0x9ed   :  { %v3955_v5 = vmul.f32 %v5932_v16, %v7213_v24  ;;  %v5934_v42 = vpop.eup %5933  ;;  %v7596_v24 = vld [vmem:[#allocation52_spill] sm:$0xff] }
 0x9ef   :  { %v3959_v32 = vadd.f32 %v3957_v52, %v3955_v5 }
 0x9f1   :  { %5935 = vtanh.f32 %v3959_v32 }
 0x9fb   :  { %v5936_v33 = vpop.eup %5935 }
 0x9fc   :  { %v3963_v14 = vmul.f32 %v5936_v33, %v5934_v42 }
 0x9fe   :  { %4085 = vmatprep.mubr.f32.mxu1 %v3963_v14 }
 0x9ff   :  { %4086 = vmatmul.mubr.f32.vlgmr.msra.gmra.mrb[64].mxu1 %v7592_v3 }
 0xa00   :  { %4090 = vmatprep.mubr.f32.mxu1 %v7216_v39  ;;  %v7601_v39 = vld [vmem:[#allocation44_spill] sm:$0xff] }
 0xa03   :  { %4091 = vmatmul.mubr.f32.gmra.mrb[66].mxu1 %v7593_v25 }
 0xa04   :  { %4095 = vmatprep.mubr.f32.mxu1 %v7118_v21 }
 0xa07   :  { %4096 = vmatmul.mubr.f32.gmra.mrb[68].mxu1 %v7594_v18 }
 0xa08   :  { %4100 = vmatprep.mubr.f32.mxu1 %v7595_v56 }
 0xa0b   :  { %4101 = vmatmul.mubr.f32.gmra.mrb[70].mxu1 %v7596_v24 }
 0xa0c   :  { %4105 = vmatprep.mubr.f32.mxu1 %v7597_v57 }
 0xa0f   :  { %4106 = vmatmul.mubr.f32.gmra.mrb[72].mxu1 %v7598_v58 }
 0xa10   :  { %4110 = vmatprep.mubr.f32.mxu1 %v7599_v26 }
 0xa13   :  { %4111 = vmatmul.mubr.f32.gmra.mrb[74].mxu1 %v7072_v29 }
 0xa14   :  { %4115 = vmatprep.mubr.f32.mxu1 %v7600_v27 }
 0xa17   :  { %4116 = vmatmul.mubr.f32.gmra.mrb[76].mxu1 %v7172_v13 }
 0xa18   :  { %4120 = vmatprep.mubr.f32.mxu1 %v7601_v39 }
 0xa1b   :  { %4121 = vmatmul.mubr.f32.gmra.mrb[78].mxu1 %v3962_v1 }
 0xad2   :  { %v4258_v21 = vpop.f32.mrb[64].mxu1 }
 0xad3   :  { %v4259_v45 = vpop.f32.mrb[65].mxu1 }
 0xad4   :  { %v4260_v40 = vadd.f32 %v4259_v45, %v4258_v21 }
 0xad6   :  { %v4088_v9 = vadd.f32 %v4260_v40, %v4201_v53  ;;  %v4261_v20 = vpop.f32.mrb[66].mxu1 }
 0xad7   :  { %v4262_v22 = vpop.f32.mrb[67].mxu1 }
 0xad8   :  { %4126 = vst [vmem:[#allocation13] sm:$0xff] %v4088_v9  ;;  %v4263_v62 = vadd.f32 %v4262_v22, %v4261_v20 }
 0xada   :  { %v4093_v29 = vadd.f32 %v4263_v62, %v4201_v53  ;;  %v4264_v38 = vpop.f32.mrb[68].mxu1 }
 0xadb   :  { %v4265_v0 = vpop.f32.mrb[69].mxu1 }
 0xadc   :  { %4127 = vst [vmem:[#allocation13 + $0x8] sm:$0xff] %v4093_v29  ;;  %v4266_v13 = vadd.f32 %v4265_v0, %v4264_v38 }
 0xade   :  { %v4098_v7 = vadd.f32 %v4266_v13, %v4201_v53  ;;  %v4267_v8 = vpop.f32.mrb[70].mxu1 }
 0xadf   :  { %v4268_v47 = vpop.f32.mrb[71].mxu1 }
 0xae0   :  { %4128 = vst [vmem:[#allocation13 + $0x10] sm:$0xff] %v4098_v7  ;;  %v4269_v51 = vadd.f32 %v4268_v47, %v4267_v8 }
 0xae2   :  { %v4103_v55 = vadd.f32 %v4269_v51, %v4201_v53  ;;  %v4270_v19 = vpop.f32.mrb[72].mxu1 }
 0xae3   :  { %v4271_v61 = vpop.f32.mrb[73].mxu1 }
 0xae4   :  { %4129 = vst [vmem:[#allocation13 + $0x18] sm:$0xff] %v4103_v55  ;;  %v4272_v1 = vadd.f32 %v4271_v61, %v4270_v19 }
 0xae6   :  { %v4108_v10 = vadd.f32 %v4272_v1, %v4201_v53  ;;  %v4273_v11 = vpop.f32.mrb[74].mxu1 }
 0xae7   :  { %v4274_v23 = vpop.f32.mrb[75].mxu1 }
 0xae8   :  { %4130 = vst [vmem:[#allocation13 + $0x20] sm:$0xff] %v4108_v10  ;;  %v4275_v28 = vadd.f32 %v4274_v23, %v4273_v11 }
 0xaea   :  { %v4113_v31 = vadd.f32 %v4275_v28, %v4201_v53  ;;  %v4276_v35 = vpop.f32.mrb[76].mxu1 }
 0xaeb   :  { %v4277_v63 = vpop.f32.mrb[77].mxu1 }
 0xaec   :  { %4131 = vst [vmem:[#allocation13 + $0x28] sm:$0xff] %v4113_v31  ;;  %v4278_v15 = vadd.f32 %v4277_v63, %v4276_v35 }
 0xaee   :  { %v4118_v30 = vadd.f32 %v4278_v15, %v4201_v53  ;;  %v4279_v37 = vpop.f32.mrb[78].mxu1 }
 0xaef   :  { %v4280_v6 = vpop.f32.mrb[79].mxu1 }
 0xaf0   :  { %4132 = vst [vmem:[#allocation13 + $0x30] sm:$0xff] %v4118_v30  ;;  %v4281_v48 = vadd.f32 %v4280_v6, %v4279_v37 }
 0xaf2   :  { %v4123_v36 = vadd.f32 %v4281_v48, %v4201_v53 }
 0xaf4   :  { %4133 = vst [vmem:[#allocation13 + $0x38] sm:$0xff] %v4123_v36 }
 0xaf5   :  { %6058 = shalt.err (!%p6055_p2)
}
 0xaf6   :  { %s6059_s24 = scalar_lea.hbm %s7277_s7, 1024 }
 0xaf7   :  { %p6060_p3 = scmp.ne.s32.totalorder %s7277_s7, %s6059_s24  ;;  %p6063_p4 = scmp.lt.u32.totalorder %s6059_s24, %s7277_s7 }
 0xaf9   :  { %p6065_p5 = pnand %p6063_p4, %p6060_p3 }
 0xafb   :  { %6068 = shalt.err (!%p6065_p5)
}
 0xafc   :  { %4145 = dma.vmem_to_hbm [thread:$0]  %s4140_s20, 1024, %s7277_s7, [#allocation6], %s6078_s11, %s6078_s11, %s6079_s12  }
 0xafd   :  { %6075 = dma.done.wait [#allocation6], 1024  }
 0xafe   :  { %6076 = vsyncadd [#allocation6], 4294966272 }
 0xaff   :  { %4149 = vsyncpa [#allocation5], 1 }
 0xb00   :  { %4150 = vsyncpa [#allocation8], 1 }
 0xb01   :  { %4151 = vsyncpa [#allocation11], 1 }
 0xb02   :  { %4152 = vsyncpa [#allocation6], 1 }

</bundles_post_ra>
